<compile_context>
chip_gen: v7x
topology: tpu7x:2x2x1
jax: 0.10.0
libtpu: 0.0.40
codegen_flags: <defaults>
</compile_context>

<pallas_src>
import functools

import jax
import jax.numpy as jnp
from jax import lax
from jax.experimental import pallas as pl
from jax.experimental.pallas import tpu as pltpu

_BIG = 1e30


def _triplet_kernel(xr_ref, xc_ref, sqr_ref, sqc_ref, tc_ref, tr_ref,
                    out_ref, max_acc, min_acc, *, margin, gram_dtype):
    j = pl.program_id(1)

    @pl.when(j == 0)
    def _init():
        max_acc[...] = jnp.full_like(max_acc, -_BIG)
        min_acc[...] = jnp.full_like(min_acc, _BIG)

    # Gram tile on the MXU: contract the last (feature) dims of both operands
    # directly -- no explicit transpose of x.
    xr = xr_ref[...].astype(gram_dtype)
    xc = xc_ref[...].astype(gram_dtype)
    gram = lax.dot_general(
        xr, xc,
        dimension_numbers=(((1,), (1,)), ((), ())),
        preferred_element_type=jnp.float32)               # (TM, TN)

    # Squared pairwise distances (norms stay in f32).
    d2 = sqr_ref[...] + sqc_ref[...] - 2.0 * gram          # (TM, TN)

    same = tc_ref[...] == tr_ref[...]                       # (TM, TN) bool
    col_valid = tr_ref[...] >= 0                            # (1, TN)  bool (pad = -1)

    pos_mask = jnp.logical_and(same, col_valid)
    neg_mask = jnp.logical_and(jnp.logical_not(same), col_valid)

    pos = jnp.where(pos_mask, d2, -_BIG)
    neg = jnp.where(neg_mask, d2, _BIG)

    max_acc[...] = jnp.maximum(max_acc[...], jnp.max(pos, axis=1, keepdims=True))
    min_acc[...] = jnp.minimum(min_acc[...], jnp.min(neg, axis=1, keepdims=True))

    @pl.when(j == pl.num_programs(1) - 1)
    def _finalize():
        # clamp + sqrt only on the 2*TM selected values (hoisted out of n^2).
        d_ap = jnp.sqrt(jnp.maximum(max_acc[...], 1e-12))
        d_an = jnp.sqrt(jnp.maximum(min_acc[...], 1e-12))
        # MarginRankingLoss(margin) with y = 1: max(0, dist_ap - dist_an + margin)
        out_ref[...] = jnp.maximum(d_ap - d_an + jnp.float32(margin), 0.0)


def triplet_loss_mine(inputs, targets, margin=0.3, block=256,
                      gram_dtype=jnp.float32):
    """inputs: (n, feat_dim) float, targets: (n,) int labels -> scalar loss.

    `gram_dtype=jnp.bfloat16` trades bit-exact parity for MXU throughput on
    v6e/v7x; the default keeps full f32 parity with the PyTorch reference.
    """
    n, d = inputs.shape
    x = inputs.astype(jnp.float32)
    t = targets.astype(jnp.int32)

    # Pad the batch to a multiple of the tile size; padded labels are -1 so
    # they never count as positives, and an explicit validity test excludes
    # them from the negative min.
    n_pad = ((n + block - 1) // block) * block
    # Pad the feature dim to a lane multiple (zeros change neither the Gram
    # matrix nor the squared row norms).
    d_pad = ((d + 127) // 128) * 128
    pad_n = n_pad - n
    pad_d = d_pad - d
    if pad_n or pad_d:
        x = jnp.pad(x, ((0, pad_n), (0, pad_d)))
    if pad_n:
        t = jnp.pad(t, (0, pad_n), constant_values=-1)

    # Precompute squared row norms once (O(n*d)); streamed per block.
    sq = jnp.sum(x * x, axis=1, keepdims=True)             # (n_pad, 1)
    sq_row = sq.reshape(1, n_pad)                          # (1, n_pad)
    t_col = t.reshape(n_pad, 1)
    t_row = t.reshape(1, n_pad)

    n_blk = n_pad // block
    grid = (n_blk, n_blk)

    losses = pl.pallas_call(
        functools.partial(_triplet_kernel, margin=margin, gram_dtype=gram_dtype),
        out_shape=jax.ShapeDtypeStruct((n_pad, 1), jnp.float32),
        grid_spec=pltpu.PrefetchScalarGridSpec(
            num_scalar_prefetch=0,
            grid=grid,
            in_specs=[
                pl.BlockSpec((block, d_pad), lambda i, j: (i, 0)),  # x row block
                pl.BlockSpec((block, d_pad), lambda i, j: (j, 0)),  # x col block
                pl.BlockSpec((block, 1), lambda i, j: (i, 0)),      # sq norms (rows)
                pl.BlockSpec((1, block), lambda i, j: (0, j)),      # sq norms (cols)
                pl.BlockSpec((block, 1), lambda i, j: (i, 0)),      # labels (rows)
                pl.BlockSpec((1, block), lambda i, j: (0, j)),      # labels (cols)
            ],
            out_specs=pl.BlockSpec((block, 1), lambda i, j: (i, 0)),
            scratch_shapes=[
                pltpu.VMEM((block, 1), jnp.float32),   # running max (positives)
                pltpu.VMEM((block, 1), jnp.float32),   # running min (negatives)
            ],
        ),
        compiler_params=pltpu.CompilerParams(
            dimension_semantics=("parallel", "arbitrary"),
            vmem_limit_bytes=64 * 1024 * 1024,
        ),
        cost_estimate=pl.CostEstimate(
            flops=int(2 * n_pad * n_pad * d_pad),
            transcendentals=int(2 * n_pad),
            # row blocks once per row-pass + column blocks re-read per row-pass
            bytes_accessed=int((n_pad * d_pad + n_blk * n_pad * d_pad) * 4
                               + 5 * n_pad * 4),
        ),
    )(x, x, sq, sq_row, t_col, t_row)

    # Mean only over the n valid (non-padded) rows.
    return jnp.sum(losses[:n, 0]) / jnp.float32(n)


def _reference(inputs, targets, margin=0.3):
    # Pure-JAX reference mirroring the PyTorch semantics.
    x = inputs.astype(jnp.float32)
    sq = jnp.sum(x * x, axis=1, keepdims=True)
    dist = sq + sq.T - 2.0 * (x @ x.T)
    dist = jnp.sqrt(jnp.maximum(dist, 1e-12))
    mask = targets[:, None] == targets[None, :]
    big = jnp.float32(1e30)
    dist_ap = jnp.max(jnp.where(mask, dist, -big), axis=1)
    dist_an = jnp.min(jnp.where(mask, big, dist), axis=1)
    return jnp.mean(jnp.maximum(dist_ap - dist_an + margin, 0.0))


if __name__ == "__main__":
    key = jax.random.PRNGKey(0)
    n, feat_dim = 8, 128
    inputs = jax.random.normal(key, (n, feat_dim), dtype=jnp.float32)
    # Deterministic labels: 4 classes, 2 samples each (guarantees every row
    # has at least one positive and one negative, as the PyTorch loop assumes).
    targets = jnp.array([0, 0, 1, 1, 2, 2, 3, 3], dtype=jnp.int32)

    loss = triplet_loss_mine(inputs, targets, margin=0.3)
    loss = jax.block_until_ready(loss)

    ref = _reference(inputs, targets, margin=0.3)
    assert jnp.allclose(loss, ref, rtol=1e-5, atol=1e-5), (loss, ref)

    print("KERNEL_OK")
</pallas_src>

<mosaic_0001>
module attributes {stable_mosaic.version = 11 : i64} {
  func.func @_triplet_kernel(%arg0: i32, %arg1: i32, %arg2: memref<256x128xf32, #tpu.memory_space<vmem>>, %arg3: memref<256x128xf32, #tpu.memory_space<vmem>>, %arg4: memref<256x1xf32, #tpu.memory_space<vmem>>, %arg5: memref<1x256xf32, #tpu.memory_space<vmem>>, %arg6: memref<256x1xi32, #tpu.memory_space<vmem>>, %arg7: memref<1x256xi32, #tpu.memory_space<vmem>>, %arg8: memref<256x1xf32, #tpu.memory_space<vmem>>, %arg9: memref<256x1xf32, #tpu.memory_space<vmem>>, %arg10: memref<256x1xf32, #tpu.memory_space<vmem>>) attributes {dimension_semantics = [#tpu.dimension_semantics<parallel>, #tpu.dimension_semantics<arbitrary>], iteration_bounds = array<i64: 1, 1>, scalar_prefetch = 0 : i64, scratch_operands = 2 : i64, tpu.core_type = #tpu.core_type<tc>, window_params = [{transform_indices = @transform_0, window_bounds = array<i64: 256, 128>}, {transform_indices = @transform_1, window_bounds = array<i64: 256, 128>}, {transform_indices = @transform_2, window_bounds = array<i64: 256, 1>}, {transform_indices = @transform_3, window_bounds = array<i64: 1, 256>}, {transform_indices = @transform_4, window_bounds = array<i64: 256, 1>}, {transform_indices = @transform_5, window_bounds = array<i64: 1, 256>}, {transform_indices = @transform_6, window_bounds = array<i64: 256, 1>}]} {
    %c0_i32 = arith.constant 0 : i32
    %0 = arith.cmpi eq, %arg1, %c0_i32 : i32
    %1 = arith.extui %0 : i1 to i32
    %c0_i32_0 = arith.constant 0 : i32
    %2 = arith.cmpi ne, %1, %c0_i32_0 : i32
    scf.if %2 {
      %cst_31 = arith.constant -1.000000e+30 : f32
      %44 = vector.broadcast %cst_31 : f32 to vector<256x1xf32>
      %c0_32 = arith.constant 0 : index
      %c0_33 = arith.constant 0 : index
      %45 = vector.load %arg9[%c0_32, %c0_33] : memref<256x1xf32, #tpu.memory_space<vmem>>, vector<256x1xf32>
      tpu.vector_store %arg9[%c0_32, %c0_33], %44 {strides = array<i32>} : memref<256x1xf32, #tpu.memory_space<vmem>>, vector<256x1xf32>,
      %cst_34 = arith.constant 1.000000e+30 : f32
      %46 = vector.broadcast %cst_34 : f32 to vector<256x1xf32>
      %c0_35 = arith.constant 0 : index
      %c0_36 = arith.constant 0 : index
      %47 = vector.load %arg10[%c0_35, %c0_36] : memref<256x1xf32, #tpu.memory_space<vmem>>, vector<256x1xf32>
      tpu.vector_store %arg10[%c0_35, %c0_36], %46 {strides = array<i32>} : memref<256x1xf32, #tpu.memory_space<vmem>>, vector<256x1xf32>,
    } else {
    }
    %c0 = arith.constant 0 : index
    %c0_1 = arith.constant 0 : index
    %3 = vector.load %arg2[%c0, %c0_1] : memref<256x128xf32, #tpu.memory_space<vmem>>, vector<256x128xf32>
    %c0_2 = arith.constant 0 : index
    %c0_3 = arith.constant 0 : index
    %4 = vector.load %arg3[%c0_2, %c0_3] : memref<256x128xf32, #tpu.memory_space<vmem>>, vector<256x128xf32>
    %cst = arith.constant dense<0.000000e+00> : vector<256x256xf32>
    %5 = tpu.matmul %3, %4, %cst {dimension_numbers = #tpu.dot_dimension_numbers<[1], [1], [0], [0], [0, 0, 1, 0], [], []>} : vector<256x128xf32>, vector<256x128xf32>, vector<256x256xf32> -> vector<256x256xf32>
    %c0_4 = arith.constant 0 : index
    %c0_5 = arith.constant 0 : index
    %6 = vector.load %arg4[%c0_4, %c0_5] : memref<256x1xf32, #tpu.memory_space<vmem>>, vector<256x1xf32>
    %c0_6 = arith.constant 0 : index
    %c0_7 = arith.constant 0 : index
    %7 = vector.load %arg5[%c0_6, %c0_7] : memref<1x256xf32, #tpu.memory_space<vmem>>, vector<1x256xf32>
    %8 = vector.broadcast %6 : vector<256x1xf32> to vector<256x256xf32>
    %9 = vector.broadcast %7 : vector<1x256xf32> to vector<256x256xf32>
    %10 = arith.addf %8, %9 : vector<256x256xf32>
    %cst_8 = arith.constant 2.000000e+00 : f32
    %11 = vector.broadcast %cst_8 : f32 to vector<256x256xf32>
    %12 = arith.mulf %11, %5 : vector<256x256xf32>
    %13 = arith.subf %10, %12 : vector<256x256xf32>
    %c0_9 = arith.constant 0 : index
    %c0_10 = arith.constant 0 : index
    %14 = vector.load %arg6[%c0_9, %c0_10] : memref<256x1xi32, #tpu.memory_space<vmem>>, vector<256x1xi32>
    %c0_11 = arith.constant 0 : index
    %c0_12 = arith.constant 0 : index
    %15 = vector.load %arg7[%c0_11, %c0_12] : memref<1x256xi32, #tpu.memory_space<vmem>>, vector<1x256xi32>
    %16 = vector.broadcast %14 : vector<256x1xi32> to vector<256x256xi32>
    %17 = vector.broadcast %15 : vector<1x256xi32> to vector<256x256xi32>
    %18 = arith.cmpi eq, %16, %17 : vector<256x256xi32>
    %c0_13 = arith.constant 0 : index
    %c0_14 = arith.constant 0 : index
    %19 = vector.load %arg7[%c0_13, %c0_14] : memref<1x256xi32, #tpu.memory_space<vmem>>, vector<1x256xi32>
    %c0_i32_15 = arith.constant 0 : i32
    %20 = vector.broadcast %c0_i32_15 : i32 to vector<1x256xi32>
    %21 = arith.cmpi sge, %19, %20 : vector<1x256xi32>
    %22 = vector.broadcast %21 : vector<1x256xi1> to vector<256x256xi1>
    %23 = arith.andi %18, %22 : vector<256x256xi1>
    %cst_16 = arith.constant dense<true> : vector<256x256xi1>
    %24 = arith.xori %18, %cst_16 : vector<256x256xi1>
    %25 = vector.broadcast %21 : vector<1x256xi1> to vector<256x256xi1>
    %26 = arith.andi %24, %25 : vector<256x256xi1>
    %cst_17 = arith.constant -1.000000e+30 : f32
    %27 = vector.broadcast %cst_17 : f32 to vector<256x256xf32>
    %28 = arith.select %23, %13, %27 : vector<256x256xi1>, vector<256x256xf32>
    %cst_18 = arith.constant 1.000000e+30 : f32
    %29 = vector.broadcast %cst_18 : f32 to vector<256x256xf32>
    %30 = arith.select %26, %13, %29 : vector<256x256xi1>, vector<256x256xf32>
    %c0_19 = arith.constant 0 : index
    %c0_20 = arith.constant 0 : index
    %31 = vector.load %arg9[%c0_19, %c0_20] : memref<256x1xf32, #tpu.memory_space<vmem>>, vector<256x1xf32>
    %cst_21 = arith.constant dense<0xFF800000> : vector<256xf32>
    %32 = vector.multi_reduction <maximumf>, %28, %cst_21 [1] : vector<256x256xf32> to vector<256xf32>
    %33 = vector.shape_cast %32 : vector<256xf32> to vector<256x1xf32>
    %34 = arith.maximumf %31, %33 : vector<256x1xf32>
    %c0_22 = arith.constant 0 : index
    %c0_23 = arith.constant 0 : index
    %35 = vector.load %arg9[%c0_22, %c0_23] : memref<256x1xf32, #tpu.memory_space<vmem>>, vector<256x1xf32>
    tpu.vector_store %arg9[%c0_22, %c0_23], %34 {strides = array<i32>} : memref<256x1xf32, #tpu.memory_space<vmem>>, vector<256x1xf32>,
    %c0_24 = arith.constant 0 : index
    %c0_25 = arith.constant 0 : index
    %36 = vector.load %arg10[%c0_24, %c0_25] : memref<256x1xf32, #tpu.memory_space<vmem>>, vector<256x1xf32>
    %cst_26 = arith.constant dense<0x7F800000> : vector<256xf32>
    %37 = vector.multi_reduction <minimumf>, %30, %cst_26 [1] : vector<256x256xf32> to vector<256xf32>
    %38 = vector.shape_cast %37 : vector<256xf32> to vector<256x1xf32>
    %39 = arith.minimumf %36, %38 : vector<256x1xf32>
    %c0_27 = arith.constant 0 : index
    %c0_28 = arith.constant 0 : index
    %40 = vector.load %arg10[%c0_27, %c0_28] : memref<256x1xf32, #tpu.memory_space<vmem>>, vector<256x1xf32>
    tpu.vector_store %arg10[%c0_27, %c0_28], %39 {strides = array<i32>} : memref<256x1xf32, #tpu.memory_space<vmem>>, vector<256x1xf32>,
    %c0_i32_29 = arith.constant 0 : i32
    %41 = arith.cmpi eq, %arg1, %c0_i32_29 : i32
    %42 = arith.extui %41 : i1 to i32
    %c0_i32_30 = arith.constant 0 : i32
    %43 = arith.cmpi ne, %42, %c0_i32_30 : i32
    scf.if %43 {
      %c0_31 = arith.constant 0 : index
      %c0_32 = arith.constant 0 : index
      %44 = vector.load %arg9[%c0_31, %c0_32] : memref<256x1xf32, #tpu.memory_space<vmem>>, vector<256x1xf32>
      %cst_33 = arith.constant 9.99999996E-13 : f32
      %45 = vector.broadcast %cst_33 : f32 to vector<256x1xf32>
      %46 = arith.maximumf %44, %45 : vector<256x1xf32>
      %47 = math.sqrt %46 : vector<256x1xf32>
      %c0_34 = arith.constant 0 : index
      %c0_35 = arith.constant 0 : index
      %48 = vector.load %arg10[%c0_34, %c0_35] : memref<256x1xf32, #tpu.memory_space<vmem>>, vector<256x1xf32>
      %cst_36 = arith.constant 9.99999996E-13 : f32
      %49 = vector.broadcast %cst_36 : f32 to vector<256x1xf32>
      %50 = arith.maximumf %48, %49 : vector<256x1xf32>
      %51 = math.sqrt %50 : vector<256x1xf32>
      %52 = arith.subf %47, %51 : vector<256x1xf32>
      %cst_37 = arith.constant 3.000000e-01 : f32
      %53 = vector.broadcast %cst_37 : f32 to vector<256x1xf32>
      %54 = arith.addf %52, %53 : vector<256x1xf32>
      %cst_38 = arith.constant 0.000000e+00 : f32
      %55 = vector.broadcast %cst_38 : f32 to vector<256x1xf32>
      %56 = arith.maximumf %54, %55 : vector<256x1xf32>
      %c0_39 = arith.constant 0 : index
      %c0_40 = arith.constant 0 : index
      %57 = vector.load %arg8[%c0_39, %c0_40] : memref<256x1xf32, #tpu.memory_space<vmem>>, vector<256x1xf32>
      tpu.vector_store %arg8[%c0_39, %c0_40], %56 {strides = array<i32>} : memref<256x1xf32, #tpu.memory_space<vmem>>, vector<256x1xf32>,
    } else {
    }
    return
  }
  func.func @transform_0(%arg0: i32, %arg1: i32) -> (i32, i32) {
    %c0_i32 = arith.constant 0 : i32
    %c0_i32_0 = arith.constant 0 : i32
    return %arg0, %c0_i32 : i32, i32
  }
  func.func @transform_1(%arg0: i32, %arg1: i32) -> (i32, i32) {
    %c0_i32 = arith.constant 0 : i32
    %c0_i32_0 = arith.constant 0 : i32
    return %arg1, %c0_i32 : i32, i32
  }
  func.func @transform_2(%arg0: i32, %arg1: i32) -> (i32, i32) {
    %c0_i32 = arith.constant 0 : i32
    %c0_i32_0 = arith.constant 0 : i32
    return %arg0, %c0_i32 : i32, i32
  }
  func.func @transform_3(%arg0: i32, %arg1: i32) -> (i32, i32) {
    %c0_i32 = arith.constant 0 : i32
    %c0_i32_0 = arith.constant 0 : i32
    return %c0_i32, %arg1 : i32, i32
  }
  func.func @transform_4(%arg0: i32, %arg1: i32) -> (i32, i32) {
    %c0_i32 = arith.constant 0 : i32
    %c0_i32_0 = arith.constant 0 : i32
    return %arg0, %c0_i32 : i32, i32
  }
  func.func @transform_5(%arg0: i32, %arg1: i32) -> (i32, i32) {
    %c0_i32 = arith.constant 0 : i32
    %c0_i32_0 = arith.constant 0 : i32
    return %c0_i32, %arg1 : i32, i32
  }
  func.func @transform_6(%arg0: i32, %arg1: i32) -> (i32, i32) {
    %c0_i32 = arith.constant 0 : i32
    %c0_i32_0 = arith.constant 0 : i32
    return %arg0, %c0_i32 : i32, i32
  }
}

</mosaic_0001>

<bundles_post_ra>
// kernel: tpu_custom_call.1
= control target key start
LH: loop header
LB: loop body
LE: loop exit
PB: predicated region body
PF: predicated region fallthrough
CT: control target
= control target key end

     0   :  { %11 = vsyncpa [#allocation5], 0  ;;  %s6624_s0 = inlined_call_operand.hbm [shape: f32[256,128], index: 0, kind: input, shape index: {}]   ;;  %s6625_s1 = inlined_call_operand.hbm [shape: f32[256,128], index: 1, kind: input, shape index: {}]   ;;  %s6626_s2 = inlined_call_operand.hbm [shape: f32[256,1], index: 2, kind: input, shape index: {}]   ;;  %s6627_s3 = inlined_call_operand.hbm [shape: f32[1,256], index: 3, kind: input, shape index: {}]   ;;  %s6628_s4 = inlined_call_operand.hbm [shape: s32[256,1], index: 4, kind: input, shape index: {}]   ;;  %s6629_s5 = inlined_call_operand.hbm [shape: s32[1,256], index: 5, kind: input, shape index: {}]   ;;  %s6630_s6 = inlined_call_operand.hbm [shape: f32[256,1], index: 6, kind: output, shape index: {}]  }
   0x1   :  { %12 = vsyncpa [#allocation8], 0 }
   0x2   :  { %13 = vsyncpa [#allocation11], 0 }
   0x3   :  { %14 = vsyncpa [#allocation14], 0 }
   0x4   :  { %15 = vsyncpa [#allocation6], 0  ;;  %s2984_s21 = smov [#allocation7]   ;;  %s2985_s23 = smov [#allocation10]  }
   0x5   :  { %s33_s22 = sshll.u32 %s2984_s21, 4  ;;  %s58_s24 = sshll.u32 %s2985_s23, 4  ;;  %s34_s22 = int_to_ptr.vmem [resolvable:$true] %s33_s22  ;;  %s59_s24 = int_to_ptr.vmem [resolvable:$true] %s58_s24 }
   0x6   :  { %s2820_s27 = scalar_lea.hbm %s6625_s1, 4096 }
   0x7   :  { %p2821_p0 = scmp.ne.s32.totalorder %s6625_s1, %s2820_s27  ;;  %p2824_p1 = scmp.lt.u32.totalorder %s2820_s27, %s6625_s1 }
   0x9   :  { %p2826_p2 = pnand %p2824_p1, %p2821_p0 }
   0xb   :  { %2829 = shalt.err (!%p2826_p2)
}
   0xc   :  { %s2830_s8 = scalar_lea.vmem %s34_s22, 4096  ;;  %p2835_p4 = scmp.lt.s32.totalorder %s34_s22, %s34_s22 }
   0xd   :  { %p2831_p3 = scmp.ne.s32.totalorder %s34_s22, %s2830_s8  ;;  %p2836_p5 = scmp.lt.s32.totalorder %s2830_s8, %s2830_s8 }
   0xf   :  { %p2837_p6 = por %p2836_p5, %p2835_p4 }
  0x11   :  { %p2838_p7 = pnand %p2837_p6, %p2831_p3 }
  0x13   :  { %2841 = shalt.err (!%p2838_p7)
}
  0x14   :  { %s2986_s9 = smov 128   ;;  %s2987_s10 = smov 8  }
  0x15   :  { %39 = dma.hbm_to_vmem [thread:$0]  %s6625_s1, 4096, %s34_s22, [#allocation8], %s2986_s9, %s2986_s9, %s2987_s10  }
  0x16   :  { %s2842_s15 = scalar_lea.hbm %s6627_s3, 32 }
  0x17   :  { %p2843_p8 = scmp.ne.s32.totalorder %s6627_s3, %s2842_s15  ;;  %p2846_p9 = scmp.lt.u32.totalorder %s2842_s15, %s6627_s3 }
  0x19   :  { %p2848_p10 = pnand %p2846_p9, %p2843_p8 }
  0x1b   :  { %2851 = shalt.err (!%p2848_p10)
}
  0x1c   :  { %s2852_s20 = scalar_lea.vmem %s59_s24, 32  ;;  %p2857_p12 = scmp.lt.s32.totalorder %s59_s24, %s59_s24 }
  0x1d   :  { %p2853_p11 = scmp.ne.s32.totalorder %s59_s24, %s2852_s20  ;;  %p2858_p13 = scmp.lt.s32.totalorder %s2852_s20, %s2852_s20 }
  0x1f   :  { %p2859_p0 = por %p2858_p13, %p2857_p12 }
  0x21   :  { %p2860_p1 = pnand %p2859_p0, %p2853_p11 }
  0x23   :  { %2863 = shalt.err (!%p2860_p1)
}
  0x24   :  { %61 = dma.hbm_to_vmem [thread:$0]  %s6627_s3, 32, %s59_s24, [#allocation11]  }
  0x25   :  { %s2988_s22 = smov [#allocation4]   ;;  %s2989_s25 = smov [#allocation9]  }
  0x26   :  { %s21_s23 = sshll.u32 %s2988_s22, 4  ;;  %s45_s26 = sshll.u32 %s2989_s25, 4  ;;  %s22_s23 = int_to_ptr.vmem [resolvable:$true] %s21_s23  ;;  %s3059_s26 = int_to_ptr.vmem [resolvable:$true] %s45_s26 }
  0x27   :  { %s2864_s29 = scalar_lea.hbm %s6624_s0, 4096 }
  0x28   :  { %p2865_p2 = scmp.ne.s32.totalorder %s6624_s0, %s2864_s29  ;;  %p2868_p3 = scmp.lt.u32.totalorder %s2864_s29, %s6624_s0 }
  0x2a   :  { %p2870_p4 = pnand %p2868_p3, %p2865_p2 }
  0x2c   :  { %2873 = shalt.err (!%p2870_p4)
}
  0x2d   :  { %s2874_s3 = scalar_lea.vmem %s22_s23, 4096  ;;  %p2879_p6 = scmp.lt.s32.totalorder %s22_s23, %s22_s23 }
  0x2e   :  { %p2875_p5 = scmp.ne.s32.totalorder %s22_s23, %s2874_s3  ;;  %p2880_p7 = scmp.lt.s32.totalorder %s2874_s3, %s2874_s3 }
  0x30   :  { %p2881_p8 = por %p2880_p7, %p2879_p6 }
  0x32   :  { %p2882_p9 = pnand %p2881_p8, %p2875_p5 }
  0x34   :  { %2885 = shalt.err (!%p2882_p9)
}
  0x35   :  { %27 = dma.hbm_to_vmem [thread:$0]  %s6624_s0, 4096, %s22_s23, [#allocation5], %s2986_s9, %s2986_s9, %s2987_s10  }
  0x36   :  { %s2886_s15 = scalar_lea.hbm %s6626_s2, 4096 }
  0x37   :  { %p2887_p10 = scmp.ne.s32.totalorder %s6626_s2, %s2886_s15  ;;  %p2890_p11 = scmp.lt.u32.totalorder %s2886_s15, %s6626_s2 }
  0x39   :  { %p2892_p12 = pnand %p2890_p11, %p2887_p10 }
  0x3b   :  { %2895 = shalt.err (!%p2892_p12)
}
  0x3c   :  { %s2896_s20 = scalar_lea.vmem %s3059_s26, 4096  ;;  %p2901_p0 = scmp.lt.s32.totalorder %s3059_s26, %s3059_s26 }
  0x3d   :  { %p2897_p13 = scmp.ne.s32.totalorder %s3059_s26, %s2896_s20  ;;  %p2902_p1 = scmp.lt.s32.totalorder %s2896_s20, %s2896_s20 }
  0x3f   :  { %p2903_p2 = por %p2902_p1, %p2901_p0 }
  0x41   :  { %p2904_p3 = pnand %p2903_p2, %p2897_p13 }
  0x43   :  { %2907 = shalt.err (!%p2904_p3)
}
  0x44   :  { %51 = dma.hbm_to_vmem [thread:$0]  %s6626_s2, 4096, %s3059_s26, [#allocation8], %s2986_s9, %s2986_s9, %s2987_s10  }
  0x45   :  { %s2990_s21 = smov [#allocation12]   ;;  %s2991_s23 = smov [#allocation13]  }
  0x46   :  { %s67_s22 = sshll.u32 %s2990_s21, 4  ;;  %s80_s25 = sshll.u32 %s2991_s23, 4  ;;  %s68_s22 = int_to_ptr.vmem [resolvable:$true] %s67_s22  ;;  %s81_s25 = int_to_ptr.vmem [resolvable:$true] %s80_s25 }
  0x47   :  { %s2908_s29 = scalar_lea.hbm %s6628_s4, 4096 }
  0x48   :  { %p2909_p4 = scmp.ne.s32.totalorder %s6628_s4, %s2908_s29  ;;  %p2912_p5 = scmp.lt.u32.totalorder %s2908_s29, %s6628_s4 }
  0x4a   :  { %p2914_p6 = pnand %p2912_p5, %p2909_p4 }
  0x4c   :  { %2917 = shalt.err (!%p2914_p6)
}
  0x4d   :  { %s2918_s2 = scalar_lea.vmem %s68_s22, 4096  ;;  %p2923_p8 = scmp.lt.s32.totalorder %s68_s22, %s68_s22 }
  0x4e   :  { %p2919_p7 = scmp.ne.s32.totalorder %s68_s22, %s2918_s2  ;;  %p2924_p9 = scmp.lt.s32.totalorder %s2918_s2, %s2918_s2 }
  0x50   :  { %p2925_p10 = por %p2924_p9, %p2923_p8 }
  0x52   :  { %p2926_p11 = pnand %p2925_p10, %p2919_p7 }
  0x54   :  { %2929 = shalt.err (!%p2926_p11)
}
  0x55   :  { %73 = dma.hbm_to_vmem [thread:$0]  %s6628_s4, 4096, %s68_s22, [#allocation11], %s2986_s9, %s2986_s9, %s2987_s10  }
  0x56   :  { %s2930_s13 = scalar_lea.hbm %s6629_s5, 32 }
  0x57   :  { %p2931_p12 = scmp.ne.s32.totalorder %s6629_s5, %s2930_s13  ;;  %p2934_p13 = scmp.lt.u32.totalorder %s2930_s13, %s6629_s5 }
  0x59   :  { %p2936_p0 = pnand %p2934_p13, %p2931_p12 }
  0x5b   :  { %2939 = shalt.err (!%p2936_p0)
}
  0x5c   :  { %s2940_s18 = scalar_lea.vmem %s81_s25, 32  ;;  %p2945_p2 = scmp.lt.s32.totalorder %s81_s25, %s81_s25 }
  0x5d   :  { %p2941_p1 = scmp.ne.s32.totalorder %s81_s25, %s2940_s18  ;;  %p2946_p3 = scmp.lt.s32.totalorder %s2940_s18, %s2940_s18 }
  0x5f   :  { %p2947_p4 = por %p2946_p3, %p2945_p2 }
  0x61   :  { %p2948_p5 = pnand %p2947_p4, %p2941_p1 }
  0x63   :  { %2951 = shalt.err (!%p2948_p5)
}
  0x64   :  { %83 = dma.hbm_to_vmem [thread:$0]  %s6629_s5, 32, %s81_s25, [#allocation14]  }
  0x65   :  { %2974 = dma.done.wait [#allocation5], 4096  }
  0x66   :  { %2975 = vsyncadd [#allocation5], 4294963200 }
  0x67   :  { %2976 = dma.done.wait [#allocation8], 8192  }
  0x68   :  { %2977 = vsyncadd [#allocation8], 4294959104 }
  0x69   :  { %2978 = dma.done.wait [#allocation11], 4128  }
  0x6a   :  { %2979 = vsyncadd [#allocation11], 4294963168 }
  0x6b   :  { %2980 = dma.done.wait [#allocation14], 32  }
  0x6c   :  { %2981 = vsyncadd [#allocation14], 4294967264  ;;  %v2992_v0 = vmov 0   ;;  %v494_v1 = vld [vmem:[#allocation9 + $0x10] sm:$0xff]  ;;  %v492_v2 = vld [vmem:[#allocation9] sm:$0xff]  ;;  %s2996_s5 = smov [#allocation15]  }
  0x6d   :  { %2691 = vset.pattern.permute.xlu1 %v2992_v0  ;;  %2690 = vset.pattern.permute.xlu0 %v2992_v0  ;;  %v219_v3 = vld [vmem:[#allocation7 + $0x80] sm:$0xff]  ;;  %v220_v4 = vld [vmem:[#allocation7 + $0x88] sm:$0xff]  ;;  %v495_v9 = vld [vmem:[#allocation9 + $0x18] sm:$0xff]  ;;  %s2518_s20 = sshll.u32 %s2996_s5, 4  ;;  %s2519_s20 = int_to_ptr.vmem [resolvable:$true] %s2518_s20 }
  0x6e   :  { %537 = vperm.xlu1 %2691, %v494_v1   ;;  %527 = vperm.xlu0 %2690, %v492_v2   ;;  %v2629_v5 = vpack.c.bf16 %v220_v4, %v219_v3  ;;  %v203_v6 = vld [vmem:[#allocation7] sm:$0xff]  ;;  %v204_v7 = vld [vmem:[#allocation7 + $0x8] sm:$0xff]  ;;  %v221_v11 = vld [vmem:[#allocation7 + $0x90] sm:$0xff]  ;;  %s2952_s0 = scalar_lea.vmem %s2519_s20, 4096  ;;  %p2957_p7 = scmp.lt.s32.totalorder %s2519_s20, %s2519_s20 }
  0x6f   :  { %v2631_v8 = vpack.c.bf16 %v204_v7, %v203_v6  ;;  %v493_v10 = vld [vmem:[#allocation9 + $0x8] sm:$0xff]  ;;  %v222_v12 = vld [vmem:[#allocation7 + $0x98] sm:$0xff]  ;;  %v205_v14 = vld [vmem:[#allocation7 + $0x10] sm:$0xff]  ;;  %p2953_p6 = scmp.ne.s32.totalorder %s2519_s20, %s2952_s0  ;;  %p2958_p8 = scmp.lt.s32.totalorder %s2952_s0, %s2952_s0 }
  0x70   :  { %2630 = vmatprep.subr.bf16.mxu0 %v2629_v5  ;;  %2661 = vmatprep.subr.bf16.mxu1 %v2629_v5  ;;  %v2633_v13 = vpack.c.bf16 %v222_v12, %v221_v11  ;;  %v206_v15 = vld [vmem:[#allocation7 + $0x18] sm:$0xff]  ;;  %v497_v16 = vld [vmem:[#allocation9 + $0x28] sm:$0xff]  ;;  %v496_v17 = vld [vmem:[#allocation9 + $0x20] sm:$0xff] }
  0x71   :  { %2632 = vmatpush3.bf16.xpose.msra.mxu0 %v2631_v8  ;;  %2669 = vmatpush3.bf16.xpose.msra.mxu1 %v2631_v8  ;;  %v223_v18 = vld [vmem:[#allocation7 + $0xa0] sm:$0xff]  ;;  %v224_v19 = vld [vmem:[#allocation7 + $0xa8] sm:$0xff]  ;;  %v2635_v20 = vpack.c.bf16 %v206_v15, %v205_v14  ;;  %v499_v21 = vld [vmem:[#allocation9 + $0x38] sm:$0xff]  ;;  %p2959_p9 = por %p2958_p8, %p2957_p7 }
  0x72   :  { %542 = vperm.xlu1 %2691, %v495_v9   ;;  %532 = vperm.xlu0 %2690, %v493_v10   ;;  %v498_v22 = vld [vmem:[#allocation9 + $0x30] sm:$0xff]  ;;  %v2637_v23 = vpack.c.bf16 %v224_v19, %v223_v18  ;;  %v207_v24 = vld [vmem:[#allocation7 + $0x20] sm:$0xff]  ;;  %v208_v25 = vld [vmem:[#allocation7 + $0x28] sm:$0xff] }
  0x73   :  { %2634 = vmatprep.subr.bf16.mxu0 %v2633_v13  ;;  %2662 = vmatprep.subr.bf16.mxu1 %v2633_v13  ;;  %v501_v26 = vld [vmem:[#allocation9 + $0x48] sm:$0xff]  ;;  %v500_v27 = vld [vmem:[#allocation9 + $0x40] sm:$0xff]  ;;  %v225_v28 = vld [vmem:[#allocation7 + $0xb0] sm:$0xff]  ;;  %v2639_v30 = vpack.c.bf16 %v208_v25, %v207_v24  ;;  %p2960_p10 = pnand %p2959_p9, %p2953_p6 }
  0x74   :  { %v226_v29 = vld [vmem:[#allocation7 + $0xb8] sm:$0xff]  ;;  %v502_v32 = vld [vmem:[#allocation9 + $0x50] sm:$0xff]  ;;  %v3125_v36 = vld [vmem:[#allocation4] sm:$0xff] }
  0x75   :  { %v503_v31 = vld [vmem:[#allocation9 + $0x58] sm:$0xff]  ;;  %v2641_v33 = vpack.c.bf16 %v226_v29, %v225_v28  ;;  %v209_v34 = vld [vmem:[#allocation7 + $0x30] sm:$0xff]  ;;  %v505_v37 = vld [vmem:[#allocation9 + $0x68] sm:$0xff]  ;;  %2565 = vmatprep.mubr.f32.mxu0 %v3125_v36 }
  0x76   :  { %552 = vperm.xlu1 %2691, %v497_v16   ;;  %547 = vperm.xlu0 %2690, %v496_v17   ;;  %v210_v35 = vld [vmem:[#allocation7 + $0x38] sm:$0xff]  ;;  %v504_v38 = vld [vmem:[#allocation9 + $0x60] sm:$0xff]  ;;  %v228_v41 = vld [vmem:[#allocation7 + $0xc8] sm:$0xff] }
  0x77   :  { %v3127_v39 = vld [vmem:[#allocation4 + $0x80] sm:$0xff]  ;;  %v2643_v42 = vpack.c.bf16 %v210_v35, %v209_v34  ;;  %v507_v43 = vld [vmem:[#allocation9 + $0x78] sm:$0xff]  ;;  %v506_v44 = vld [vmem:[#allocation9 + $0x70] sm:$0xff] }
  0x78   :  { %v227_v40 = vld [vmem:[#allocation7 + $0xc0] sm:$0xff]  ;;  %2597 = vmatprep.mubr.f32.mxu1 %v3127_v39  ;;  %v212_v47 = vld [vmem:[#allocation7 + $0x48] sm:$0xff]  ;;  %v229_v50 = vld [vmem:[#allocation7 + $0xd0] sm:$0xff] }
  0x79   :  { %2636 = vmatpush3.bf16.xpose.msra.mxu0 %v2635_v20  ;;  %2670 = vmatpush3.bf16.xpose.msra.mxu1 %v2635_v20  ;;  %v2645_v45 = vpack.c.bf16 %v228_v41, %v227_v40  ;;  %v211_v46 = vld [vmem:[#allocation7 + $0x40] sm:$0xff]  ;;  %v509_v48 = vld [vmem:[#allocation9 + $0x88] sm:$0xff]  ;;  %v230_v51 = vld [vmem:[#allocation7 + $0xd8] sm:$0xff] }
  0x7a   :  { %562 = vperm.xlu1 %2691, %v499_v21   ;;  %557 = vperm.xlu0 %2690, %v498_v22   ;;  %v508_v49 = vld [vmem:[#allocation9 + $0x80] sm:$0xff]  ;;  %v2647_v52 = vpack.c.bf16 %v212_v47, %v211_v46  ;;  %v511_v53 = vld [vmem:[#allocation9 + $0x98] sm:$0xff]  ;;  %v510_v54 = vld [vmem:[#allocation9 + $0x90] sm:$0xff]  ;;  %v2649_v55 = vpack.c.bf16 %v230_v51, %v229_v50 }
  0x7b   :  { %2638 = vmatprep.subr.bf16.mxu0 %v2637_v23  ;;  %2663 = vmatprep.subr.bf16.mxu1 %v2637_v23  ;;  %v213_v56 = vld [vmem:[#allocation7 + $0x50] sm:$0xff]  ;;  %v214_v57 = vld [vmem:[#allocation7 + $0x58] sm:$0xff]  ;;  %v513_v58 = vld [vmem:[#allocation9 + $0xa8] sm:$0xff] }
  0x7c   :  { %v512_v59 = vld [vmem:[#allocation9 + $0xa0] sm:$0xff]  ;;  %v232_v61 = vld [vmem:[#allocation7 + $0xe8] sm:$0xff]  ;;  %v2651_v62 = vpack.c.bf16 %v214_v57, %v213_v56  ;;  %v515_v63 = vld [vmem:[#allocation9 + $0xb8] sm:$0xff] }
  0x7d   :  { %v231_v60 = vld [vmem:[#allocation7 + $0xe0] sm:$0xff]  ;;  %v514_v1 = vld [vmem:[#allocation9 + $0xb0] sm:$0xff]  ;;  %v216_v4 = vld [vmem:[#allocation7 + $0x68] sm:$0xff] }
  0x7e   :  { %572 = vperm.xlu1 %2691, %v501_v26   ;;  %567 = vperm.xlu0 %2690, %v500_v27   ;;  %v2653_v2 = vpack.c.bf16 %v232_v61, %v231_v60  ;;  %v215_v3 = vld [vmem:[#allocation7 + $0x60] sm:$0xff]  ;;  %v517_v5 = vld [vmem:[#allocation9 + $0xc8] sm:$0xff]  ;;  %v233_v7 = vld [vmem:[#allocation7 + $0xf0] sm:$0xff] }
  0x7f   :  { %v516_v6 = vld [vmem:[#allocation9 + $0xc0] sm:$0xff]  ;;  %v234_v8 = vld [vmem:[#allocation7 + $0xf8] sm:$0xff]  ;;  %v2655_v9 = vpack.c.bf16 %v216_v4, %v215_v3  ;;  %v518_v11 = vld [vmem:[#allocation9 + $0xd0] sm:$0xff] }
  0x80   :  { %v519_v10 = vld [vmem:[#allocation9 + $0xd8] sm:$0xff]  ;;  %v2657_v12 = vpack.c.bf16 %v234_v8, %v233_v7  ;;  %v217_v13 = vld [vmem:[#allocation7 + $0x70] sm:$0xff]  ;;  %v521_v15 = vld [vmem:[#allocation9 + $0xe8] sm:$0xff] }
  0x81   :  { %2640 = vmatpush3.bf16.xpose.msra.mxu0 %v2639_v30  ;;  %2671 = vmatpush3.bf16.xpose.msra.mxu1 %v2639_v30  ;;  %v218_v14 = vld [vmem:[#allocation7 + $0x78] sm:$0xff]  ;;  %v520_v16 = vld [vmem:[#allocation9 + $0xe0] sm:$0xff]  ;;  %v522_v19 = vld [vmem:[#allocation9 + $0xf0] sm:$0xff] }
  0x82   :  { %582 = vperm.xlu1 %2691, %v503_v31   ;;  %577 = vperm.xlu0 %2690, %v502_v32   ;;  %v2659_v17 = vpack.c.bf16 %v218_v14, %v217_v13  ;;  %v523_v18 = vld [vmem:[#allocation9 + $0xf8] sm:$0xff]  ;;  %v889_v20 = vld [vmem:[#allocation12 + $0x8] sm:$0xff]  ;;  %v888_v21 = vld [vmem:[#allocation12] sm:$0xff] }
  0x83   :  { %2642 = vmatprep.subr.bf16.mxu0 %v2641_v33  ;;  %2664 = vmatprep.subr.bf16.mxu1 %v2641_v33  ;;  %v172_v22 = vld [vmem:[#allocation4 + $0x8] sm:$0xff]  ;;  %v891_v24 = vld [vmem:[#allocation12 + $0x18] sm:$0xff]  ;;  %v890_v25 = vld [vmem:[#allocation12 + $0x10] sm:$0xff] }
  0x84   :  { %v188_v23 = vld [vmem:[#allocation4 + $0x88] sm:$0xff]  ;;  %v173_v26 = vld [vmem:[#allocation4 + $0x10] sm:$0xff]  ;;  %v174_v30 = vld [vmem:[#allocation4 + $0x18] sm:$0xff] }
  0x85   :  { %v189_v27 = vld [vmem:[#allocation4 + $0x90] sm:$0xff]  ;;  %v892_v29 = vld [vmem:[#allocation12 + $0x20] sm:$0xff]  ;;  %v190_v31 = vld [vmem:[#allocation4 + $0x98] sm:$0xff] }
  0x86   :  { %592 = vperm.xlu1 %2691, %v505_v37   ;;  %587 = vperm.xlu0 %2690, %v504_v38   ;;  %v893_v28 = vld [vmem:[#allocation12 + $0x28] sm:$0xff]  ;;  %v895_v32 = vld [vmem:[#allocation12 + $0x38] sm:$0xff]  ;;  %v894_v33 = vld [vmem:[#allocation12 + $0x30] sm:$0xff] }
  0x87   :  { %v175_v34 = vld [vmem:[#allocation4 + $0x20] sm:$0xff]  ;;  %v176_v38 = vld [vmem:[#allocation4 + $0x28] sm:$0xff]  ;;  %v898_v41 = vld [vmem:[#allocation12 + $0x50] sm:$0xff] }
  0x88   :  { %v191_v35 = vld [vmem:[#allocation4 + $0xa0] sm:$0xff]  ;;  %v178_v46 = vld [vmem:[#allocation4 + $0x38] sm:$0xff]  ;;  %v909_v60 = vld [vmem:[#allocation12 + $0xa8] sm:$0xff] }
  0x89   :  { %2644 = vmatpush3.bf16.xpose.msra.mxu0 %v2643_v42  ;;  %2672 = vmatpush3.bf16.xpose.msra.mxu1 %v2643_v42  ;;  %v896_v37 = vld [vmem:[#allocation12 + $0x40] sm:$0xff]  ;;  %v899_v40 = vld [vmem:[#allocation12 + $0x58] sm:$0xff]  ;;  %v177_v42 = vld [vmem:[#allocation4 + $0x30] sm:$0xff] }
  0x8a   :  { %602 = vperm.xlu1 %2691, %v507_v43   ;;  %597 = vperm.xlu0 %2690, %v506_v44   ;;  %v193_v43 = vld [vmem:[#allocation4 + $0xb0] sm:$0xff]  ;;  %v194_v47 = vld [vmem:[#allocation4 + $0xb8] sm:$0xff]  ;;  %v179_v50 = vld [vmem:[#allocation4 + $0x40] sm:$0xff] }
  0x8b   :  { %2646 = vmatprep.subr.bf16.mxu0 %v2645_v45  ;;  %2665 = vmatprep.subr.bf16.mxu1 %v2645_v45  ;;  %v901_v44 = vld [vmem:[#allocation12 + $0x68] sm:$0xff]  ;;  %v900_v45 = vld [vmem:[#allocation12 + $0x60] sm:$0xff]  ;;  %v907_v56 = vld [vmem:[#allocation12 + $0x98] sm:$0xff] }
  0x8c   :  { %v195_v51 = vld [vmem:[#allocation4 + $0xc0] sm:$0xff]  ;;  %v906_v57 = vld [vmem:[#allocation12 + $0x90] sm:$0xff]  ;;  %v184_v7 = vld [vmem:[#allocation4 + $0x68] sm:$0xff] }
  0x8d   :  { %v908_v61 = vld [vmem:[#allocation12 + $0xa0] sm:$0xff]  ;;  %v917_v13 = vld [vmem:[#allocation12 + $0xe8] sm:$0xff] }
  0x8e   :  { %612 = vperm.xlu1 %2691, %v509_v48   ;;  %607 = vperm.xlu0 %2690, %v508_v49   ;;  %v903_v48 = vld [vmem:[#allocation12 + $0x78] sm:$0xff]  ;;  %v902_v49 = vld [vmem:[#allocation12 + $0x70] sm:$0xff]  ;;  %v200_v8 = vld [vmem:[#allocation4 + $0xe8] sm:$0xff] }
  0x8f   :  { %v183_v3 = vld [vmem:[#allocation4 + $0x60] sm:$0xff] }
  0x90   :  { %v199_v4 = vld [vmem:[#allocation4 + $0xe0] sm:$0xff] }
  0x91   :  { %2648 = vmatpush3.bf16.xpose.msra.mxu0 %v2647_v52  ;;  %2673 = vmatpush3.bf16.xpose.msra.mxu1 %v2647_v52  ;;  %v905_v52 = vld [vmem:[#allocation12 + $0x88] sm:$0xff]  ;;  %v916_v14 = vld [vmem:[#allocation12 + $0xe0] sm:$0xff] }
  0x92   :  { %622 = vperm.xlu1 %2691, %v511_v53   ;;  %617 = vperm.xlu0 %2690, %v510_v54   ;;  %v904_v53 = vld [vmem:[#allocation12 + $0x80] sm:$0xff] }
  0x93   :  { %2650 = vmatprep.subr.bf16.mxu0 %v2649_v55  ;;  %2666 = vmatprep.subr.bf16.mxu1 %v2649_v55  ;;  %v180_v54 = vld [vmem:[#allocation4 + $0x48] sm:$0xff] }
  0x94   :  { %v196_v55 = vld [vmem:[#allocation4 + $0xc8] sm:$0xff] }
  0x96   :  { %632 = vperm.xlu1 %2691, %v513_v58   ;;  %627 = vperm.xlu0 %2690, %v512_v59   ;;  %v181_v58 = vld [vmem:[#allocation4 + $0x50] sm:$0xff] }
  0x97   :  { %v197_v59 = vld [vmem:[#allocation4 + $0xd0] sm:$0xff] }
  0x99   :  { %2652 = vmatpush3.bf16.xpose.msra.mxu0 %v2651_v62  ;;  %2674 = vmatpush3.bf16.xpose.msra.mxu1 %v2651_v62  ;;  %v182_v62 = vld [vmem:[#allocation4 + $0x58] sm:$0xff] }
  0x9a   :  { %642 = vperm.xlu1 %2691, %v515_v63   ;;  %637 = vperm.xlu0 %2690, %v514_v1   ;;  %v198_v63 = vld [vmem:[#allocation4 + $0xd8] sm:$0xff] }
  0x9b   :  { %2654 = vmatprep.subr.bf16.mxu0 %v2653_v2  ;;  %2667 = vmatprep.subr.bf16.mxu1 %v2653_v2  ;;  %v911_v1 = vld [vmem:[#allocation12 + $0xb8] sm:$0xff]  ;;  %v910_v2 = vld [vmem:[#allocation12 + $0xb0] sm:$0xff] }
  0x9e   :  { %652 = vperm.xlu1 %2691, %v517_v5   ;;  %647 = vperm.xlu0 %2690, %v516_v6   ;;  %v913_v5 = vld [vmem:[#allocation12 + $0xc8] sm:$0xff]  ;;  %v912_v6 = vld [vmem:[#allocation12 + $0xc0] sm:$0xff] }
  0xa1   :  { %2656 = vmatpush3.bf16.xpose.msra.mxu0 %v2655_v9  ;;  %2675 = vmatpush3.bf16.xpose.msra.mxu1 %v2655_v9  ;;  %v915_v9 = vld [vmem:[#allocation12 + $0xd8] sm:$0xff] }
  0xa2   :  { %662 = vperm.xlu1 %2691, %v519_v10   ;;  %657 = vperm.xlu0 %2690, %v518_v11   ;;  %v914_v10 = vld [vmem:[#allocation12 + $0xd0] sm:$0xff] }
  0xa3   :  { %2658 = vmatprep.subr.bf16.mxu0 %v2657_v12  ;;  %2668 = vmatprep.subr.bf16.mxu1 %v2657_v12  ;;  %v185_v11 = vld [vmem:[#allocation4 + $0x70] sm:$0xff] }
  0xa4   :  { %v201_v12 = vld [vmem:[#allocation4 + $0xf0] sm:$0xff] }
  0xa6   :  { %672 = vperm.xlu1 %2691, %v521_v15   ;;  %667 = vperm.xlu0 %2690, %v520_v16   ;;  %v186_v15 = vld [vmem:[#allocation4 + $0x78] sm:$0xff] }
  0xa7   :  { %v202_v16 = vld [vmem:[#allocation4 + $0xf8] sm:$0xff] }
  0xa9   :  { %2660 = vmatpush3.bf16.xpose.msra.mxu0 %v2659_v17  ;;  %2676 = vmatpush3.bf16.xpose.msra.mxu1 %v2659_v17  ;;  %v919_v17 = vld [vmem:[#allocation12 + $0xf8] sm:$0xff] }
  0xaa   :  { %682 = vperm.xlu1 %2691, %v523_v18   ;;  %677 = vperm.xlu0 %2690, %v522_v19   ;;  %v918_v18 = vld [vmem:[#allocation12 + $0xf0] sm:$0xff] }
  0xae   :  { %925 = vperm.xlu1 %2691, %v889_v20   ;;  %922 = vperm.xlu0 %2690, %v888_v21  }
  0xb0   :  { %2566 = vmatmul.mubr.f32.vlgmr.msra.gmra.mrb[0].mxu0 %v3125_v36  ;;  %2598 = vmatmul.mubr.f32.vlgmr.msra.gmra.mrb[0].mxu1 %v3127_v39  ;;  %v897_v36 = vld [vmem:[#allocation12 + $0x48] sm:$0xff] }
  0xb1   :  { %2567 = vmatprep.mubr.f32.mxu0 %v172_v22  ;;  %2599 = vmatprep.mubr.f32.mxu1 %v188_v23  ;;  %v192_v39 = vld [vmem:[#allocation4 + $0xa8] sm:$0xff] }
  0xb2   :  { %931 = vperm.xlu1 %2691, %v891_v24   ;;  %928 = vperm.xlu0 %2690, %v890_v25  }
  0xb4   :  { %2568 = vmatmul.mubr.f32.gmra.mrb[2].mxu0 %v172_v22  ;;  %2600 = vmatmul.mubr.f32.gmra.mrb[2].mxu1 %v188_v23 }
  0xb5   :  { %2569 = vmatprep.mubr.f32.mxu0 %v173_v26  ;;  %2601 = vmatprep.mubr.f32.mxu1 %v189_v27 }
  0xb6   :  { %937 = vperm.xlu1 %2691, %v893_v28   ;;  %934 = vperm.xlu0 %2690, %v892_v29  }
  0xb8   :  { %2570 = vmatmul.mubr.f32.gmra.mrb[4].mxu0 %v173_v26  ;;  %2602 = vmatmul.mubr.f32.gmra.mrb[4].mxu1 %v189_v27 }
  0xb9   :  { %2571 = vmatprep.mubr.f32.mxu0 %v174_v30  ;;  %2603 = vmatprep.mubr.f32.mxu1 %v190_v31 }
  0xba   :  { %943 = vperm.xlu1 %2691, %v895_v32   ;;  %940 = vperm.xlu0 %2690, %v894_v33  }
  0xbc   :  { %2572 = vmatmul.mubr.f32.gmra.mrb[6].mxu0 %v174_v30  ;;  %2604 = vmatmul.mubr.f32.gmra.mrb[6].mxu1 %v190_v31 }
  0xbd   :  { %2573 = vmatprep.mubr.f32.mxu0 %v175_v34  ;;  %2605 = vmatprep.mubr.f32.mxu1 %v191_v35 }
  0xbe   :  { %949 = vperm.xlu1 %2691, %v897_v36   ;;  %946 = vperm.xlu0 %2690, %v896_v37  }
  0xc0   :  { %2574 = vmatmul.mubr.f32.gmra.mrb[8].mxu0 %v175_v34  ;;  %2606 = vmatmul.mubr.f32.gmra.mrb[8].mxu1 %v191_v35 }
  0xc1   :  { %2575 = vmatprep.mubr.f32.mxu0 %v176_v38  ;;  %2607 = vmatprep.mubr.f32.mxu1 %v192_v39 }
  0xc2   :  { %955 = vperm.xlu1 %2691, %v899_v40   ;;  %952 = vperm.xlu0 %2690, %v898_v41   ;;  %v686_v41 = vlaneseq }
  0xc4   :  { %2576 = vmatmul.mubr.f32.gmra.mrb[10].mxu0 %v176_v38  ;;  %2608 = vmatmul.mubr.f32.gmra.mrb[10].mxu1 %v192_v39 }
  0xc5   :  { %2577 = vmatprep.mubr.f32.mxu0 %v177_v42  ;;  %2609 = vmatprep.mubr.f32.mxu1 %v193_v43 }
  0xc6   :  { %961 = vperm.xlu1 %2691, %v901_v44   ;;  %958 = vperm.xlu0 %2690, %v900_v45   ;;  %v687_v44 = vshrl.u32 %v686_v41, 7 }
  0xc8   :  { %2578 = vmatmul.mubr.f32.gmra.mrb[12].mxu0 %v177_v42  ;;  %2610 = vmatmul.mubr.f32.gmra.mrb[12].mxu1 %v193_v43 }
  0xc9   :  { %2579 = vmatprep.mubr.f32.mxu0 %v178_v46  ;;  %2611 = vmatprep.mubr.f32.mxu1 %v194_v47 }
  0xca   :  { %967 = vperm.xlu1 %2691, %v903_v48   ;;  %964 = vperm.xlu0 %2690, %v902_v49   ;;  %v3187_v48 = vsub.s32 1, %v687_v44  ;;  %v524_v49 = vld [vmem:[#allocation10] sm:$0x3] }
  0xcc   :  { %2580 = vmatmul.mubr.f32.gmra.mrb[14].mxu0 %v178_v46  ;;  %2612 = vmatmul.mubr.f32.gmra.mrb[14].mxu1 %v194_v47  ;;  %v3185_v47 = vsub.s32 0, %v687_v44 }
  0xcd   :  { %2581 = vmatprep.mubr.f32.mxu0 %v179_v50  ;;  %2613 = vmatprep.mubr.f32.mxu1 %v195_v51 }
  0xce   :  { %973 = vperm.xlu1 %2691, %v905_v52   ;;  %970 = vperm.xlu0 %2690, %v904_v53   ;;  %v3194_v52 = vrot.slane %v524_v49, %v3185_v47  ;;  %v3197_v53 = vrot.slane %v524_v49, %v3187_v48 }
  0xd0   :  { %2582 = vmatmul.mubr.f32.gmra.mrb[16].mxu0 %v179_v50  ;;  %2614 = vmatmul.mubr.f32.gmra.mrb[16].mxu1 %v195_v51 }
  0xd1   :  { %2583 = vmatprep.mubr.f32.mxu0 %v180_v54  ;;  %2615 = vmatprep.mubr.f32.mxu1 %v196_v55 }
  0xd2   :  { %979 = vperm.xlu1 %2691, %v907_v56   ;;  %976 = vperm.xlu0 %2690, %v906_v57  }
  0xd4   :  { %2584 = vmatmul.mubr.f32.gmra.mrb[18].mxu0 %v180_v54  ;;  %2616 = vmatmul.mubr.f32.gmra.mrb[18].mxu1 %v196_v55 }
  0xd5   :  { %2585 = vmatprep.mubr.f32.mxu0 %v181_v58  ;;  %2617 = vmatprep.mubr.f32.mxu1 %v197_v59 }
  0xd6   :  { %985 = vperm.xlu1 %2691, %v909_v60   ;;  %982 = vperm.xlu0 %2690, %v908_v61  }
  0xd8   :  { %2586 = vmatmul.mubr.f32.gmra.mrb[20].mxu0 %v181_v58  ;;  %2618 = vmatmul.mubr.f32.gmra.mrb[20].mxu1 %v197_v59  ;;  %v920_v58 = vld [vmem:[#allocation13] sm:$0x3] }
  0xd9   :  { %2587 = vmatprep.mubr.f32.mxu0 %v182_v62  ;;  %2619 = vmatprep.mubr.f32.mxu1 %v198_v63  ;;  %v3210_v61 = vrot.slane %v920_v58, %v3185_v47  ;;  %vm1089_vm13 = vcmp.ge.s32.totalorder %v920_v58, 0 }
  0xda   :  { %991 = vperm.xlu1 %2691, %v911_v1   ;;  %988 = vperm.xlu0 %2690, %v910_v2  }
  0xdc   :  { %2588 = vmatmul.mubr.f32.gmra.mrb[22].mxu0 %v182_v62  ;;  %2620 = vmatmul.mubr.f32.gmra.mrb[22].mxu1 %v198_v63  ;;  %v3213_v62 = vrot.slane %v920_v58, %v3187_v48 }
  0xdd   :  { %2589 = vmatprep.mubr.f32.mxu0 %v183_v3  ;;  %2621 = vmatprep.mubr.f32.mxu1 %v199_v4 }
  0xde   :  { %997 = vperm.xlu1 %2691, %v913_v5   ;;  %994 = vperm.xlu0 %2690, %v912_v6  }
  0xe0   :  { %2590 = vmatmul.mubr.f32.gmra.mrb[24].mxu0 %v183_v3  ;;  %2622 = vmatmul.mubr.f32.gmra.mrb[24].mxu1 %v199_v4 }
  0xe1   :  { %2591 = vmatprep.mubr.f32.mxu0 %v184_v7  ;;  %2623 = vmatprep.mubr.f32.mxu1 %v200_v8 }
  0xe2   :  { %1003 = vperm.xlu1 %2691, %v915_v9   ;;  %1000 = vperm.xlu0 %2690, %v914_v10  }
  0xe4   :  { %2592 = vmatmul.mubr.f32.gmra.mrb[26].mxu0 %v184_v7  ;;  %2624 = vmatmul.mubr.f32.gmra.mrb[26].mxu1 %v200_v8 }
  0xe5   :  { %2593 = vmatprep.mubr.f32.mxu0 %v185_v11  ;;  %2625 = vmatprep.mubr.f32.mxu1 %v201_v12 }
  0xe6   :  { %1009 = vperm.xlu1 %2691, %v917_v13   ;;  %1006 = vperm.xlu0 %2690, %v916_v14  }
  0xe8   :  { %2594 = vmatmul.mubr.f32.gmra.mrb[28].mxu0 %v185_v11  ;;  %2626 = vmatmul.mubr.f32.gmra.mrb[28].mxu1 %v201_v12 }
  0xe9   :  { %2595 = vmatprep.mubr.f32.mxu0 %v186_v15  ;;  %2627 = vmatprep.mubr.f32.mxu1 %v202_v16 }
  0xea   :  { %1015 = vperm.xlu1 %2691, %v919_v17   ;;  %1012 = vperm.xlu0 %2690, %v918_v18   ;;  %v1090_v18 = vsel %vm1089_vm13, 1, %v2992_v0 }
  0xeb   :  { %v1094_v41 = vrot.slane %v1090_v18, %v3185_v47  ;;  %v1098_v44 = vrot.slane %v1090_v18, %v3187_v48 }
  0xec   :  { %2596 = vmatmul.mubr.f32.gmra.mrb[30].mxu0 %v186_v15  ;;  %2628 = vmatmul.mubr.f32.gmra.mrb[30].mxu1 %v202_v16 }
  0xed   :  { %v3133_v19 = vpop.permute.xlu1 %537  ;;  %v3135_v20 = vpop.permute.xlu0 %527  ;;  %vm3384_vm13 = vcmp.eq.s32.totalorder %v1094_v41, 1  ;;  %vm3456_vm14 = vcmp.eq.s32.totalorder %v1098_v44, 1 }
  0xee   :  { %v3318_v49 = vadd.f32 %v3194_v52, %v3133_v19  ;;  %v3330_v58 = vadd.f32 %v3197_v53, %v3135_v20 }
  0xf1   :  { %v3137_v21 = vpop.permute.xlu1 %542  ;;  %v3139_v22 = vpop.permute.xlu0 %532 }
  0xf2   :  { %v3334_v0 = vadd.f32 %v3194_v52, %v3137_v21  ;;  %v3338_v47 = vadd.f32 %v3197_v53, %v3137_v21  ;;  %v3346_v48 = vadd.f32 %v3197_v53, %v3139_v22 }
  0xf5   :  { %v3141_v23 = vpop.permute.xlu1 %552  ;;  %v3143_v24 = vpop.permute.xlu0 %547 }
  0xf6   :  { %v3354_v18 = vadd.f32 %v3197_v53, %v3141_v23  ;;  %v3358_v21 = vadd.f32 %v3194_v52, %v3143_v24 }
  0xf9   :  { %v3145_v25 = vpop.permute.xlu1 %562  ;;  %v3147_v26 = vpop.permute.xlu0 %557 }
  0xfd   :  { %v3149_v27 = vpop.permute.xlu1 %572  ;;  %v3151_v28 = vpop.permute.xlu0 %567 }
 0x101   :  { %v3153_v29 = vpop.permute.xlu1 %582  ;;  %v3155_v30 = vpop.permute.xlu0 %577 }
 0x105   :  { %v3157_v31 = vpop.permute.xlu1 %592  ;;  %v3159_v32 = vpop.permute.xlu0 %587 }
 0x109   :  { %v3161_v33 = vpop.permute.xlu1 %602  ;;  %v3163_v34 = vpop.permute.xlu0 %597 }
 0x10d   :  { %v3165_v35 = vpop.permute.xlu1 %612  ;;  %v3167_v36 = vpop.permute.xlu0 %607 }
 0x111   :  { %v3169_v37 = vpop.permute.xlu1 %622  ;;  %v3171_v38 = vpop.permute.xlu0 %617 }
 0x112   :  { %v3474_v44 = vadd.f32 %v3197_v53, %v3169_v37 }
 0x115   :  { %v3173_v39 = vpop.permute.xlu1 %632  ;;  %v3175_v40 = vpop.permute.xlu0 %627 }
 0x119   :  { %v3177_v42 = vpop.permute.xlu1 %642  ;;  %v3179_v43 = vpop.permute.xlu0 %637 }
 0x11d   :  { %v3181_v45 = vpop.permute.xlu1 %652  ;;  %v3183_v46 = vpop.permute.xlu0 %647 }
 0x121   :  { %v3189_v50 = vpop.permute.xlu1 %662  ;;  %v3191_v51 = vpop.permute.xlu0 %657 }
 0x125   :  { %v673_v54 = vpop.permute.xlu1 %672  ;;  %v3199_v55 = vpop.permute.xlu0 %667 }
 0x126   :  { %v3202_v56 = vadd.f32 %v3194_v52, %v673_v54  ;;  %v3205_v57 = vadd.f32 %v3197_v53, %v673_v54  ;;  %v3322_v54 = vadd.f32 %v3197_v53, %v3133_v19  ;;  %v3342_v19 = vadd.f32 %v3194_v52, %v3139_v22 }
 0x127   :  { %v3366_v22 = vadd.f32 %v3194_v52, %v3145_v25 }
 0x128   :  { %6750 = vst [vmem:[#allocation21_spill] sm:$0xff] %v3202_v56  ;;  %6751 = vst [vmem:[#allocation22_spill] sm:$0xff] %v3205_v57  ;;  %v3378_v57 = vadd.f32 %v3197_v53, %v3147_v26 }
 0x129   :  { %v683_v59 = vpop.permute.xlu1 %682  ;;  %v3207_v60 = vpop.permute.xlu0 %677 }
 0x12a   :  { %v3216_v63 = vadd.f32 %v3194_v52, %v683_v59  ;;  %v3219_v1 = vadd.f32 %v3197_v53, %v683_v59  ;;  %v3326_v59 = vadd.f32 %v3194_v52, %v3135_v20  ;;  %v3350_v20 = vadd.f32 %v3194_v52, %v3141_v23 }
 0x12b   :  { %v3374_v23 = vadd.f32 %v3194_v52, %v3147_v26  ;;  %v3398_v26 = vadd.f32 %v3197_v53, %v3151_v28 }
 0x12c   :  { %6752 = vst [vmem:[#allocation23_spill] sm:$0xff] %v3216_v63  ;;  %6753 = vst [vmem:[#allocation24_spill] sm:$0xff] %v3219_v1  ;;  %v3362_v1 = vadd.f32 %v3197_v53, %v3143_v24  ;;  %v3370_v63 = vadd.f32 %v3197_v53, %v3145_v25  ;;  %v3382_v24 = vadd.f32 %v3194_v52, %v3149_v27 }
 0x12d   :  { %v3221_v2 = vpop.permute.xlu1 %925  ;;  %v3223_v3 = vpop.permute.xlu0 %922  ;;  %v3390_v25 = vadd.f32 %v3197_v53, %v3149_v27  ;;  %6769 = vst [vmem:[#allocation38_spill] sm:$0xff] %v3398_v26  ;;  %v3412_v27 = vadd.f32 %v3194_v52, %v3155_v30  ;;  %v3516_v26 = vadd.f32 %v3197_v53, %v3179_v43 }
 0x12e   :  { %vm6639_vm0 = vcmp.eq.s32.totalorder %v3221_v2, %v3210_v61  ;;  %vm6659_vm1 = vcmp.eq.s32.totalorder %v3221_v2, %v3213_v62  ;;  %6763 = vst [vmem:[#allocation34_spill] sm:$0xff] %v3370_v63  ;;  %6764 = vst [vmem:[#allocation35_spill] sm:$0xff] %v3382_v24  ;;  %v3508_v24 = vadd.f32 %v3197_v53, %v3177_v42 }
 0x12f   :  { %6767 = vst [vmem:[#allocation36_spill] sm:$0xff] %v3390_v25  ;;  %6772 = vst [vmem:[#allocation41_spill] sm:$0xff] %v3412_v27  ;;  %v3416_v25 = vadd.f32 %v3197_v53, %v3155_v30  ;;  %v3436_v30 = vadd.f32 %v3194_v52, %v3161_v33  ;;  %vm6640_vm15 = vcmp.eq.s32.totalorder %v3223_v3, %v3210_v61 }
 0x130   :  { %vm3569_vm11 = vmand %vm6639_vm0, %vm3384_vm13  ;;  %vm6646_vm9 = vcmp.eq.s32.totalorder %v3223_v3, %v3213_v62 }
 0x131   :  { %v3229_v4 = vpop.permute.xlu1 %931  ;;  %v3231_v5 = vpop.permute.xlu0 %928  ;;  %6773 = vst [vmem:[#allocation42_spill] sm:$0xff] %v3416_v25  ;;  %6778 = vst [vmem:[#allocation47_spill] sm:$0xff] %v3436_v30 }
 0x132   :  { %6754 = vst [vmem:[#allocation25_spill] sm:$0xff] %v3229_v4  ;;  %vm6652_vm2 = vcmp.eq.s32.totalorder %v3229_v4, %v3210_v61  ;;  %vm6657_vm3 = vcmp.eq.s32.totalorder %v3229_v4, %v3213_v62  ;;  %vm6658_vm4 = vcmp.eq.s32.totalorder %v3231_v5, %v3210_v61  ;;  %vm6655_vm5 = vcmp.eq.s32.totalorder %v3231_v5, %v3213_v62  ;;  %vm3586_vm0 = vmand %vm6640_vm15, %vm3384_vm13 }
 0x135   :  { %v3241_v6 = vpop.permute.xlu1 %937  ;;  %v3243_v7 = vpop.permute.xlu0 %934 }
 0x136   :  { %6755 = vst [vmem:[#allocation26_spill] sm:$0xff] %v3241_v6  ;;  %6756 = vst [vmem:[#allocation27_spill] sm:$0xff] %v3243_v7 }
 0x139   :  { %v3253_v8 = vpop.permute.xlu1 %943  ;;  %v3255_v9 = vpop.permute.xlu0 %940 }
 0x13a   :  { %6757 = vst [vmem:[#allocation28_spill] sm:$0xff] %v3253_v8  ;;  %6758 = vst [vmem:[#allocation29_spill] sm:$0xff] %v3255_v9 }
 0x13d   :  { %v3265_v10 = vpop.permute.xlu1 %949  ;;  %v3267_v11 = vpop.permute.xlu0 %946 }
 0x141   :  { %v3277_v12 = vpop.permute.xlu1 %955  ;;  %v3279_v13 = vpop.permute.xlu0 %952 }
 0x145   :  { %v3289_v14 = vpop.permute.xlu1 %961  ;;  %v3291_v15 = vpop.permute.xlu0 %958 }
 0x146   :  { %6759 = vst [vmem:[#allocation30_spill] sm:$0xff] %v3289_v14  ;;  %6760 = vst [vmem:[#allocation31_spill] sm:$0xff] %v3291_v15  ;;  %v3408_v14 = vadd.f32 %v3197_v53, %v3153_v29  ;;  %v3532_v15 = vadd.f32 %v3197_v53, %v3183_v46 }
 0x148   :  { %6771 = vst [vmem:[#allocation40_spill] sm:$0xff] %v3408_v14  ;;  %v3432_v14 = vadd.f32 %v3197_v53, %v3159_v32  ;;  %6789 = vst [vmem:[#allocation56_spill] sm:$0xff] %v3532_v15 }
 0x149   :  { %v3301_v16 = vpop.permute.xlu1 %967  ;;  %v3303_v17 = vpop.permute.xlu0 %964 }
 0x14a   :  { %6761 = vst [vmem:[#allocation32_spill] sm:$0xff] %v3301_v16  ;;  %6762 = vst [vmem:[#allocation33_spill] sm:$0xff] %v3303_v17  ;;  %v3394_v16 = vadd.f32 %v3194_v52, %v3151_v28  ;;  %v3402_v17 = vadd.f32 %v3194_v52, %v3153_v29  ;;  %v3420_v28 = vadd.f32 %v3194_v52, %v3157_v31 }
 0x14b   :  { %v3428_v29 = vadd.f32 %v3194_v52, %v3159_v32  ;;  %6777 = vst [vmem:[#allocation46_spill] sm:$0xff] %v3432_v14  ;;  %v3454_v32 = vadd.f32 %v3194_v52, %v3165_v35  ;;  %v3486_v14 = vadd.f32 %v3194_v52, %v3173_v39 }
 0x14c   :  { %6768 = vst [vmem:[#allocation37_spill] sm:$0xff] %v3394_v16  ;;  %6770 = vst [vmem:[#allocation39_spill] sm:$0xff] %v3402_v17  ;;  %v3424_v17 = vadd.f32 %v3197_v53, %v3157_v31  ;;  %v3446_v31 = vadd.f32 %v3194_v52, %v3163_v34  ;;  %v3524_v16 = vadd.f32 %v3197_v53, %v3181_v45 }
 0x14d   :  { %v3404_v41 = vpop.permute.xlu1 %973  ;;  %6774 = vst [vmem:[#allocation43_spill] sm:$0xff] %v3420_v28  ;;  %6776 = vst [vmem:[#allocation45_spill] sm:$0xff] %v3428_v29  ;;  %v3438_v25 = vpop.permute.xlu0 %970  ;;  %v3442_v28 = vadd.f32 %v3197_v53, %v3161_v33  ;;  %v3462_v33 = vadd.f32 %v3197_v53, %v3165_v35  ;;  %v3482_v35 = vadd.f32 %v3197_v53, %v3171_v38 }
 0x14e   :  { %6775 = vst [vmem:[#allocation44_spill] sm:$0xff] %v3424_v17  ;;  %6779 = vst [vmem:[#allocation48_spill] sm:$0xff] %v3438_v25  ;;  %v3450_v17 = vadd.f32 %v3197_v53, %v3163_v34  ;;  %v3470_v34 = vadd.f32 %v3194_v52, %v3169_v37  ;;  %v3494_v37 = vadd.f32 %v3194_v52, %v3175_v40 }
 0x14f   :  { %6780 = vst [vmem:[#allocation49_spill] sm:$0xff] %v3442_v28  ;;  %6781 = vst [vmem:[#allocation50_spill] sm:$0xff] %v3446_v31  ;;  %v728_v28 = vadd.f32 %v3194_v52, %v3167_v36  ;;  %v729_v31 = vadd.f32 %v3197_v53, %v3167_v36  ;;  %v3490_v36 = vadd.f32 %v3197_v53, %v3173_v39 }
 0x150   :  { %6782 = vst [vmem:[#allocation51_spill] sm:$0xff] %v3450_v17  ;;  %v3478_v17 = vadd.f32 %v3194_v52, %v3171_v38  ;;  %v3498_v29 = vadd.f32 %v3197_v53, %v3175_v40  ;;  %v3502_v38 = vadd.f32 %v3194_v52, %v3177_v42  ;;  %v3512_v39 = vadd.f32 %v3194_v52, %v3179_v43 }
 0x151   :  { %v3504_v27 = vpop.permute.xlu1 %979  ;;  %v3520_v40 = vadd.f32 %v3194_v52, %v3181_v45  ;;  %6787 = vst [vmem:[#allocation54_spill] sm:$0xff] %v3524_v16  ;;  %v3528_v42 = vadd.f32 %v3194_v52, %v3183_v46  ;;  %v3536_v43 = vadd.f32 %v3194_v52, %v3189_v50  ;;  %v3538_v63 = vpop.permute.xlu0 %976  ;;  %v3546_v45 = vadd.f32 %v3194_v52, %v3191_v51 }
 0x152   :  { %6785 = vst [vmem:[#allocation52_spill] sm:$0xff] %v3504_v27  ;;  %6791 = vst [vmem:[#allocation58_spill] sm:$0xff] %v3538_v63  ;;  %v3550_v16 = vadd.f32 %v3197_v53, %v3191_v51  ;;  %vm6641_vm10 = vcmp.eq.s32.totalorder %v3438_v25, %v3210_v61  ;;  %v3562_v51 = vadd.f32 %v3197_v53, %v3199_v55 }
 0x153   :  { %6786 = vst [vmem:[#allocation53_spill] sm:$0xff] %v3520_v40  ;;  %6788 = vst [vmem:[#allocation55_spill] sm:$0xff] %v3528_v42  ;;  %v3542_v40 = vadd.f32 %v3197_v53, %v3189_v50  ;;  %vm6642_vm12 = vcmp.eq.s32.totalorder %v3438_v25, %v3213_v62  ;;  %vm6649_vm7 = vcmp.eq.s32.totalorder %v3404_v41, %v3210_v61 }
 0x154   :  { %6790 = vst [vmem:[#allocation57_spill] sm:$0xff] %v3536_v43  ;;  %6793 = vst [vmem:[#allocation60_spill] sm:$0xff] %v3546_v45  ;;  %v3556_v43 = vadd.f32 %v3194_v52, %v3199_v55  ;;  %vm6650_vm8 = vcmp.eq.s32.totalorder %v3404_v41, %v3213_v62 }
 0x155   :  { %6792 = vst [vmem:[#allocation59_spill] sm:$0xff] %v3542_v40  ;;  %6794 = vst [vmem:[#allocation61_spill] sm:$0xff] %v3550_v16 }
 0x156   :  { %6795 = vst [vmem:[#allocation62_spill] sm:$0xff] %v3556_v43  ;;  %6796 = vst [vmem:[#allocation63_spill] sm:$0xff] %v3562_v51  ;;  %v3577_v43 = vadd.f32 %v3194_v52, %v3207_v60  ;;  %v3590_v51 = vpop.permute.xlu1 %985  ;;  %v3599_v52 = vadd.f32 %v3197_v53, %v3207_v60 }
 0x157   :  { %6802 = vst [vmem:[#allocation65_spill] sm:$0xff] %v3590_v51  ;;  %vm3608_vm15 = vmand %vm6641_vm10, %vm3384_vm13 }
 0x158   :  { %6799 = vst [vmem:[#allocation64_spill] sm:$0xff] %v3577_v43  ;;  %6805 = vst [vmem:[#allocation68_spill] sm:$0xff] %v3599_v52 }
 0x159   :  { %vm3624_vm6 = vmand %vm6642_vm12, %vm3456_vm14  ;;  %vm6661_vm12 = vcmp.eq.s32.totalorder %v3504_v27, %v3210_v61 }
 0x15a   :  { %vm3636_vm10 = vmand %vm6646_vm9, %vm3456_vm14  ;;  %vm6664_vm9 = vcmp.eq.s32.totalorder %v3504_v27, %v3213_v62 }
 0x183   :  { %v301_v46 = vpop.f32.mrb[0].mxu0  ;;  %v397_v15 = vpop.f32.mrb[0].mxu1 }
 0x184   :  { %v760_v50 = vmul.f32 2.0, %v301_v46  ;;  %v792_v40 = vmul.f32 2.0, %v397_v15  ;;  %v303_v42 = vpop.f32.mrb[1].mxu0  ;;  %v399_v45 = vpop.f32.mrb[1].mxu1 }
 0x185   :  { %v761_v46 = vmul.f32 2.0, %v303_v42  ;;  %v793_v15 = vmul.f32 2.0, %v399_v45 }
 0x186   :  { %v3593_v42 = vsub.f32 %v3326_v59, %v760_v50  ;;  %v3595_v45 = vsub.f32 %v728_v28, %v792_v40 }
 0x187   :  { %v3613_v59 = vsub.f32 %v3330_v58, %v761_v46  ;;  %v3615_v28 = vsub.f32 %v729_v31, %v793_v15  ;;  %v307_v40 = vpop.f32.mrb[2].mxu0  ;;  %v403_v53 = vpop.f32.mrb[2].mxu1 }
 0x188   :  { %6803 = vst [vmem:[#allocation66_spill] sm:$0xff] %v3593_v42  ;;  %6804 = vst [vmem:[#allocation67_spill] sm:$0xff] %v3595_v45  ;;  %v762_v50 = vmul.f32 2.0, %v307_v40  ;;  %v794_v52 = vmul.f32 2.0, %v403_v53  ;;  %v309_v58 = vpop.f32.mrb[3].mxu0  ;;  %v405_v46 = vpop.f32.mrb[3].mxu1 }
 0x189   :  { %6808 = vst [vmem:[#allocation69_spill] sm:$0xff] %v3613_v59  ;;  %6809 = vst [vmem:[#allocation70_spill] sm:$0xff] %v3615_v28  ;;  %v1325_v31 = vsel %vm3608_vm15, %v3595_v45, -1e+30  ;;  %v763_v40 = vmul.f32 2.0, %v309_v58  ;;  %v795_v53 = vmul.f32 2.0, %v405_v46  ;;  %v3659_v58 = vpop.permute.xlu0 %982 }
 0x18a   :  { %v1326_v25 = vsel %vm3624_vm6, %v3615_v28, -1e+30  ;;  %v1293_v43 = vsel %vm3586_vm0, %v3593_v42, -1e+30  ;;  %vm3653_vm15 = vmand %vm6659_vm1, %vm3456_vm14  ;;  %6816 = vst [vmem:[#allocation71_spill] sm:$0xff] %v3659_v58  ;;  %v3662_v60 = vsub.f32 %v3342_v19, %v762_v50  ;;  %v3665_v55 = vsub.f32 %v3454_v32, %v794_v52 }
 0x18b   :  { %v1501_v46 = vmax.f32 %v1325_v31, %v1326_v25  ;;  %v1294_v28 = vsel %vm3636_vm10, %v3613_v59, -1e+30  ;;  %vm3675_vm0 = vmand %vm6649_vm7, %vm3384_vm13  ;;  %vm6654_vm6 = vcmp.eq.s32.totalorder %v3538_v63, %v3210_v61  ;;  %v3682_v19 = vsub.f32 %v3346_v48, %v763_v40  ;;  %v313_v32 = vpop.f32.mrb[4].mxu0  ;;  %v409_v52 = vpop.f32.mrb[4].mxu1 }
 0x18c   :  { %6817 = vst [vmem:[#allocation72_spill] sm:$0xff] %v3662_v60  ;;  %6818 = vst [vmem:[#allocation73_spill] sm:$0xff] %v3665_v55  ;;  %v3685_v25 = vsub.f32 %v3462_v33, %v795_v53  ;;  %v1453_v50 = vmax.f32 %v1293_v43, %v1294_v28  ;;  %vm6653_vm7 = vcmp.eq.s32.totalorder %v3538_v63, %v3213_v62  ;;  %v764_v48 = vmul.f32 2.0, %v313_v32  ;;  %v411_v33 = vpop.f32.mrb[5].mxu1  ;;  %v315_v40 = vpop.f32.mrb[5].mxu0 }
 0x18d   :  { %6821 = vst [vmem:[#allocation74_spill] sm:$0xff] %v3682_v19  ;;  %vm3692_vm10 = vmand %vm6650_vm8, %vm3456_vm14  ;;  %v796_v15 = vmul.f32 2.0, %v409_v52  ;;  %1502 = vmax.xlane.f32.xlu1 %v1501_v46  ;;  %v1327_v28 = vsel %vm3675_vm0, %v3665_v55, -1e+30  ;;  %v797_v43 = vmul.f32 2.0, %v411_v33  ;;  %v765_v32 = vmul.f32 2.0, %v315_v40  ;;  %v3725_v33 = vpop.permute.xlu1 %991 }
 0x18e   :  { %6822 = vst [vmem:[#allocation75_spill] sm:$0xff] %v3685_v25  ;;  %vm3706_vm8 = vmand %vm6652_vm2, %vm3384_vm13  ;;  %1454 = vmax.xlane.f32.xlu0 %v1453_v50  ;;  %v1328_v46 = vsel %vm3692_vm10, %v3685_v25, -1e+30  ;;  %v1295_v42 = vsel %vm3569_vm11, %v3662_v60, -1e+30  ;;  %v3728_v50 = vsub.f32 %v3318_v49, %v764_v48  ;;  %vm6666_vm10 = vcmp.eq.s32.totalorder %v3659_v58, %v3210_v61 }
 0x18f   :  { %vm3721_vm0 = vmand %vm6658_vm4, %vm3384_vm13  ;;  %6829 = vst [vmem:[#allocation76_spill] sm:$0xff] %v3725_v33  ;;  %v3731_v31 = vsub.f32 %v3478_v17, %v796_v15  ;;  %v1504_v40 = vmax.f32 %v1327_v28, %v1328_v46  ;;  %v1296_v16 = vsel %vm3653_vm15, %v3682_v19, -1e+30  ;;  %v3748_v17 = vsub.f32 %v3482_v35, %v797_v43  ;;  %v319_v45 = vpop.f32.mrb[6].mxu0  ;;  %v415_v48 = vpop.f32.mrb[6].mxu1 }
 0x190   :  { %6830 = vst [vmem:[#allocation77_spill] sm:$0xff] %v3728_v50  ;;  %vm3741_vm11 = vmand %vm6654_vm6, %vm3384_vm13  ;;  %v3751_v49 = vsub.f32 %v3322_v54, %v765_v32  ;;  %v3753_v15 = vmax.f32 %v1295_v42, %v1296_v16  ;;  %vm6667_vm2 = vcmp.eq.s32.totalorder %v3659_v58, %v3213_v62  ;;  %v766_v35 = vmul.f32 2.0, %v319_v45  ;;  %v417_v54 = vpop.f32.mrb[7].mxu1  ;;  %v321_v32 = vpop.f32.mrb[7].mxu0 }
 0x191   :  { %6831 = vst [vmem:[#allocation78_spill] sm:$0xff] %v3731_v31  ;;  %6834 = vst [vmem:[#allocation79_spill] sm:$0xff] %v3748_v17  ;;  %v798_v43 = vmul.f32 2.0, %v415_v48  ;;  %v1329_v46 = vsel %vm3741_vm11, %v3731_v31, -1e+30  ;;  %vm6673_vm6 = vcmp.eq.s32.totalorder %v3590_v51, %v3210_v61  ;;  %v799_v16 = vmul.f32 2.0, %v417_v54 }
 0x192   :  { %6835 = vst [vmem:[#allocation80_spill] sm:$0xff] %v3751_v49  ;;  %6836 = vst [vmem:[#allocation81_spill] sm:$0xff] %v3753_v15  ;;  %1505 = vmax.xlane.f32.xlu0 %v1504_v40  ;;  %v767_v45 = vmul.f32 2.0, %v321_v32  ;;  %v1297_v48 = vsel %vm3721_vm0, %v3728_v50, -1e+30  ;;  %v3797_v40 = vpop.permute.xlu0 %988  ;;  %v3800_v28 = vsub.f32 %v3334_v0, %v766_v35  ;;  %vm6847_vm0 = vcmp.eq.s32.totalorder %v3241_v6, %v3210_v61 }
 0x193   :  { %vm3760_vm15 = vmand %vm6653_vm7, %vm3456_vm14  ;;  %6843 = vst [vmem:[#allocation82_spill] sm:$0xff] %v3797_v40  ;;  %v3803_v52 = vsub.f32 %v3470_v34, %v798_v43  ;;  %v3831_v34 = vsub.f32 %v3474_v44, %v799_v16  ;;  %v325_v43 = vpop.f32.mrb[8].mxu0  ;;  %v7092_v55 = vmov 0  ;;  %v7147_v60 = vmov 0 }
 0x194   :  { %vm3774_vm7 = vmand %vm6655_vm5, %vm3456_vm14  ;;  %v1330_v25 = vsel %vm3760_vm15, %v3748_v17, -1e+30  ;;  %6844 = vst [vmem:[#allocation83_spill] sm:$0xff] %v3800_v28  ;;  %v3834_v35 = vsub.f32 %v3338_v47, %v767_v45  ;;  %v768_v44 = vmul.f32 2.0, %v325_v43 }
 0x195   :  { %vm3791_vm11 = vmand %vm6657_vm3, %vm3456_vm14  ;;  %6845 = vst [vmem:[#allocation84_spill] sm:$0xff] %v3803_v52  ;;  %v3805_v54 = vmax.f32 %v1329_v46, %v1330_v25  ;;  %v1298_v32 = vsel %vm3774_vm7, %v3751_v49, -1e+30  ;;  %vm6850_vm3 = vcmp.eq.s32.totalorder %v3243_v7, %v3210_v61  ;;  %v421_v46 = vpop.f32.mrb[8].mxu1  ;;  %v7001_v25 = vmov 0 }
 0x196   :  { %vm3815_vm15 = vmand %vm6847_vm0, %vm3384_vm13  ;;  %6853 = vst [vmem:[#allocation86_spill] sm:$0xff] %v3831_v34  ;;  %v3836_v42 = vmax.f32 %v1297_v48, %v1298_v32  ;;  %v800_v16 = vmul.f32 2.0, %v421_v46  ;;  %v423_v45 = vpop.f32.mrb[9].mxu1  ;;  %v327_v48 = vpop.f32.mrb[9].mxu0  ;;  %v1299_v32 = vsel %vm3706_vm8, %v3800_v28, -1e+30  ;;  %vm6863_vm8 = vcmp.eq.s32.totalorder %v3243_v7, %v3213_v62 }
 0x197   :  { %6846 = vst [vmem:[#allocation85_spill] sm:$0xff] %v3805_v54  ;;  %vm3824_vm4 = vmand %vm6850_vm3, %vm3384_vm13  ;;  %vm6856_vm3 = vcmp.eq.s32.totalorder %v3241_v6, %v3213_v62  ;;  %v801_v54 = vmul.f32 2.0, %v423_v45  ;;  %v769_v31 = vmul.f32 2.0, %v327_v48  ;;  %v1300_v43 = vsel %vm3791_vm11, %v3834_v35, -1e+30  ;;  %v3885_v28 = vpop.permute.xlu1 %997  ;;  %v3979_v46 = vpop.permute.xlu0 %994  ;;  %v7090_v6 = vld [vmem:[#allocation32_spill] sm:$0xff] }
 0x198   :  { %6854 = vst [vmem:[#allocation87_spill] sm:$0xff] %v3834_v35  ;;  %6855 = vst [vmem:[#allocation88_spill] sm:$0xff] %v3836_v42  ;;  %v3888_v45 = vsub.f32 %v3358_v21, %v768_v44  ;;  %v3891_v15 = vsub.f32 %v3494_v37, %v800_v16  ;;  %v3893_v48 = vmax.f32 %v1299_v32, %v1300_v43  ;;  %v331_v42 = vpop.f32.mrb[10].mxu0  ;;  %v427_v44 = vpop.f32.mrb[10].mxu1  ;;  %v7018_v49 = vmov 0 }
 0x199   :  { %vm3843_vm0 = vmand %vm6856_vm3, %vm3456_vm14  ;;  %v3910_v21 = vsub.f32 %v3498_v29, %v801_v54  ;;  %v3913_v37 = vsub.f32 %v3362_v1, %v769_v31  ;;  %v6879_v1 = vmov 0  ;;  %v770_v31 = vmul.f32 2.0, %v331_v42  ;;  %v429_v43 = vpop.f32.mrb[11].mxu1 }
 0x19a   :  { %vm3852_vm1 = vmand %vm6661_vm12, %vm3384_vm13  ;;  %6866 = vst [vmem:[#allocation89_spill] sm:$0xff] %v3888_v45  ;;  %v802_v54 = vmul.f32 2.0, %v427_v44  ;;  %v6886_v44 = vmov 0 }
 0x19b   :  { %vm3866_vm3 = vmand %vm6664_vm9, %vm3456_vm14  ;;  %v1331_v53 = vsel %vm3852_vm1, %v3803_v52, -1e+30  ;;  %6867 = vst [vmem:[#allocation90_spill] sm:$0xff] %v3891_v15  ;;  %vm6869_vm1 = vcmp.eq.s32.totalorder %v3255_v9, %v3210_v61  ;;  %vm6671_vm9 = vmmov 1   ;;  %v3982_v29 = vsub.f32 %v3350_v20, %v770_v31  ;;  %v4185_v32 = vpop.permute.xlu0 %1000 }
 0x19c   :  { %vm3881_vm12 = vmand %vm6863_vm8, %vm3456_vm14  ;;  %6868 = vst [vmem:[#allocation91_spill] sm:$0xff] %v3893_v48  ;;  %v1332_v47 = vsel %vm3866_vm3, %v3831_v34, -1e+30  ;;  %vm6875_vm3 = vcmp.eq.s32.totalorder %v3255_v9, %v3213_v62  ;;  %vm6878_vm8 = vcmp.eq.s32.totalorder %v3265_v10, %v3210_v61  ;;  %v803_v48 = vmul.f32 2.0, %v429_v43 }
 0x19d   :  { %vm3903_vm11 = vmand %vm6869_vm1, %vm3384_vm13  ;;  %6872 = vst [vmem:[#allocation92_spill] sm:$0xff] %v3910_v21  ;;  %v3915_v16 = vmax.f32 %v1331_v53, %v1332_v47  ;;  %v333_v53 = vpop.f32.mrb[11].mxu0  ;;  %v1301_v47 = vsel %vm3824_vm4, %v3888_v45, -1e+30  ;;  %v1302_v42 = vsel %vm3881_vm12, %v3913_v37, -1e+30  ;;  %vm6885_vm4 = vcmp.eq.s32.totalorder %v3265_v10, %v3213_v62 }
 0x19e   :  { %6873 = vst [vmem:[#allocation93_spill] sm:$0xff] %v3913_v37  ;;  %vm3922_vm1 = vmand %vm6875_vm3, %vm3456_vm14  ;;  %v771_v34 = vmul.f32 2.0, %v333_v53  ;;  %v3985_v53 = vsub.f32 %v3486_v14, %v802_v54  ;;  %vm6897_vm12 = vcmp.eq.s32.totalorder %v3267_v11, %v3213_v62  ;;  %v6898_v14 = vmov 0  ;;  %v337_v31 = vpop.f32.mrb[12].mxu0  ;;  %v433_v54 = vpop.f32.mrb[12].mxu1 }
 0x19f   :  { %6874 = vst [vmem:[#allocation94_spill] sm:$0xff] %v3915_v16  ;;  %vm3930_vm7 = vmxor %vm6878_vm8, %vm6671_vm9  ;;  %v4012_v20 = vsub.f32 %v3490_v36, %v803_v48  ;;  %v772_v36 = vmul.f32 2.0, %v337_v31  ;;  %v435_v48 = vpop.f32.mrb[13].mxu1  ;;  %v6975_v45 = vmov 0 }
 0x1a0   :  { %v6880_v1 = vsel %vm3930_vm7, 4294967295, %v6879_v1  ;;  %vm3939_vm5 = vmand %vm6666_vm10, %vm3384_vm13  ;;  %6891 = vst [vmem:[#allocation95_spill] sm:$0xff] %v3982_v29  ;;  %v4015_v16 = vsub.f32 %v3354_v18, %v771_v34  ;;  %v804_v34 = vmul.f32 2.0, %v433_v54  ;;  %v6913_v54 = vmov 0 }
 0x1a1   :  { %vm3953_vm8 = vmand %vm6667_vm2, %vm3456_vm14  ;;  %v1333_v0 = vsel %vm3939_vm5, %v3891_v15, -1e+30  ;;  %vm6888_vm2 = vcmp.eq.s32.totalorder %v3267_v11, %v3210_v61  ;;  %6892 = vst [vmem:[#allocation96_spill] sm:$0xff] %v3985_v53  ;;  %v3987_v15 = vmax.f32 %v1301_v47, %v1302_v42  ;;  %v6904_v42 = vmov 0 }
 0x1a2   :  { %vm3967_vm10 = vmxor %vm6885_vm4, %vm6671_vm9  ;;  %v1334_v37 = vsel %vm3953_vm8, %v3910_v21, -1e+30  ;;  %6900 = vst [vmem:[#allocation98_spill] sm:$0xff] %v4012_v20  ;;  %v1304_v31 = vsel %vm3843_vm0, %v4015_v16, -1e+30  ;;  %v4077_v18 = vsub.f32 %v3374_v23, %v772_v36  ;;  %vm6921_vm0 = vcmp.eq.s32.totalorder %v3725_v33, %v3213_v62 }
 0x1a3   :  { %v6887_v44 = vsel %vm3967_vm10, 4294967295, %v6886_v44  ;;  %vm3975_vm3 = vmxor %vm6888_vm2, %vm6671_vm9  ;;  %6893 = vst [vmem:[#allocation97_spill] sm:$0xff] %v3987_v15  ;;  %vm6894_vm2 = vcmp.eq.s32.totalorder %v3253_v8, %v3210_v61  ;;  %v4017_v47 = vmax.f32 %v1333_v0, %v1334_v37  ;;  %v339_v37 = vpop.f32.mrb[13].mxu0  ;;  %v1303_v0 = vsel %vm3815_vm15, %v3982_v29, -1e+30 }
 0x1a4   :  { %vm3997_vm5 = vmand %vm6894_vm2, %vm3384_vm13  ;;  %6901 = vst [vmem:[#allocation99_spill] sm:$0xff] %v4015_v16  ;;  %vm6903_vm2 = vcmp.eq.s32.totalorder %v3253_v8, %v3213_v62  ;;  %v805_v15 = vmul.f32 2.0, %v435_v48  ;;  %v773_v21 = vmul.f32 2.0, %v339_v37  ;;  %vm6911_vm15 = vmmov 1   ;;  %v4074_v48 = vpop.permute.xlu1 %1003  ;;  %v343_v36 = vpop.f32.mrb[14].mxu0 }
 0x1a5   :  { %vm4005_vm4 = vmxor %vm6897_vm12, %vm6671_vm9  ;;  %6902 = vst [vmem:[#allocation100_spill] sm:$0xff] %v4017_v47  ;;  %vm6912_vm9 = vcmp.eq.s32.totalorder %v3279_v13, %v3210_v61  ;;  %v4080_v37 = vsub.f32 %v3512_v39, %v804_v34  ;;  %v439_v34 = vpop.f32.mrb[14].mxu1  ;;  %v6952_v29 = vmov 0  ;;  %vm6972_vm7 = vnez %v6887_v44 }
 0x1a6   :  { %v6899_v14 = vsel %vm4005_vm4, 4294967295, %v6898_v14  ;;  %vm4024_vm12 = vmand %vm6903_vm2, %vm3456_vm14  ;;  %vm6908_vm2 = vcmp.eq.s32.totalorder %v3590_v51, %v3213_v62  ;;  %6918 = vst [vmem:[#allocation101_spill] sm:$0xff] %v4077_v18  ;;  %v4103_v39 = vsub.f32 %v3516_v26, %v805_v15  ;;  %v4106_v47 = vsub.f32 %v3378_v57, %v773_v21  ;;  %v441_v21 = vpop.f32.mrb[15].mxu1 }
 0x1a7   :  { %v6905_v42 = vsel %vm4024_vm12, 4294967295, %v6904_v42  ;;  %vm4033_vm8 = vmand %vm6673_vm6, %vm3384_vm13  ;;  %6919 = vst [vmem:[#allocation102_spill] sm:$0xff] %v4080_v37  ;;  %v774_v26 = vmul.f32 2.0, %v343_v36  ;;  %v806_v15 = vmul.f32 2.0, %v439_v34  ;;  %v6937_v36 = vmov 0  ;;  %v445_v52 = vpop.f32.mrb[16].mxu1 }
 0x1a8   :  { %vm4047_vm6 = vmand %vm6908_vm2, %vm3456_vm14  ;;  %v1335_v17 = vsel %vm4033_vm8, %v3985_v53, -1e+30  ;;  %vm6915_vm2 = vcmp.eq.s32.totalorder %v3725_v33, %v3210_v61  ;;  %v4082_v53 = vmax.f32 %v1303_v0, %v1304_v31  ;;  %6924 = vst [vmem:[#allocation104_spill] sm:$0xff] %v4103_v39  ;;  %v6928_v31 = vmov 0  ;;  %v6978_v33 = vld [vmem:[#allocation37_spill] sm:$0xff]  ;;  %v4354_v43 = vpop.permute.xlu1 %1009 }
 0x1a9   :  { %vm4061_vm12 = vmxor %vm6912_vm9, %vm6911_vm15  ;;  %v1336_v16 = vsel %vm4047_vm6, %v4012_v20, -1e+30  ;;  %6925 = vst [vmem:[#allocation105_spill] sm:$0xff] %v4106_v47  ;;  %vm6927_vm6 = vcmp.eq.s32.totalorder %v3267_v11, %v3210_v61  ;;  %vm6933_vm9 = vcmp.eq.s32.totalorder %v3267_v11, %v3213_v62  ;;  %v807_v11 = vmul.f32 2.0, %v441_v21  ;;  %v7045_v21 = vld [vmem:[#allocation33_spill] sm:$0xff] }
 0x1aa   :  { %v6914_v54 = vsel %vm4061_vm12, 4294967295, %v6913_v54  ;;  %vm4070_vm10 = vmand %vm6915_vm2, %vm3384_vm13  ;;  %6920 = vst [vmem:[#allocation103_spill] sm:$0xff] %v4082_v53  ;;  %v4108_v0 = vmax.f32 %v1335_v17, %v1336_v16  ;;  %vm6930_vm2 = vcmp.eq.s32.totalorder %v3797_v40, %v3210_v61  ;;  %v345_v16 = vpop.f32.mrb[15].mxu0  ;;  %v1305_v17 = vsel %vm3903_vm11, %v4077_v18, -1e+30 }
 0x1ab   :  { %vm4096_vm8 = vmand %vm6921_vm0, %vm3456_vm14  ;;  %vm6939_vm11 = vcmp.eq.s32.totalorder %v3797_v40, %v3213_v62  ;;  %v775_v34 = vmul.f32 2.0, %v345_v16  ;;  %v1306_v53 = vsel %vm3922_vm1, %v4106_v47, -1e+30  ;;  %v6943_v20 = vmov 0  ;;  %v6979_v40 = vld [vmem:[#allocation55_spill] sm:$0xff] }
 0x1ac   :  { %6926 = vst [vmem:[#allocation106_spill] sm:$0xff] %v4108_v0  ;;  %vm4115_vm0 = vmand %vm6927_vm6, %vm3384_vm13  ;;  %vm6936_vm6 = vcmp.eq.s32.totalorder %v3279_v13, %v3213_v62  ;;  %v4188_v57 = vsub.f32 %v3366_v22, %v774_v26  ;;  %v4191_v16 = vsub.f32 %v3502_v38, %v806_v15  ;;  %vm6951_vm1 = vcmp.eq.s32.totalorder %v3265_v10, %v3210_v61  ;;  %v6960_v26 = vld [vmem:[#allocation34_spill] sm:$0xff] }
 0x1ad   :  { %v6929_v31 = vsel %vm4115_vm0, 4294967295, %v6928_v31  ;;  %vm4128_vm12 = vmand %vm6930_vm2, %vm3384_vm13  ;;  %v6954_v22 = vmov 0  ;;  %v4234_v15 = vsub.f32 %v6960_v26, %v775_v34  ;;  %v7050_v38 = vmov 0 }
 0x1ae   :  { %vm4142_vm2 = vmand %vm6933_vm9, %vm3456_vm14  ;;  %v1337_v18 = vsel %vm4128_vm12, %v4080_v37, -1e+30  ;;  %vm6942_vm9 = vcmp.eq.s32.totalorder %v3277_v12, %v3210_v61  ;;  %6948 = vst [vmem:[#allocation107_spill] sm:$0xff] %v4188_v57  ;;  %v4193_v37 = vmax.f32 %v1305_v17, %v1306_v53  ;;  %v4231_v53 = vsub.f32 %v3508_v24, %v807_v11  ;;  %v349_v17 = vpop.f32.mrb[16].mxu0  ;;  %v447_v11 = vpop.f32.mrb[17].mxu1 }
 0x1af   :  { %vm4150_vm0 = vmxor %vm6936_vm6, %vm6911_vm15  ;;  %6949 = vst [vmem:[#allocation108_spill] sm:$0xff] %v4191_v16  ;;  %v6967_v24 = vmov 0  ;;  %v351_v34 = vpop.f32.mrb[17].mxu0  ;;  %v1307_v26 = vsel %vm3997_vm5, %v4188_v57, -1e+30 }
 0x1b0   :  { %v6938_v36 = vsel %vm4150_vm0, 4294967295, %v6937_v36  ;;  %vm4159_vm4 = vmand %vm6939_vm11, %vm3456_vm14  ;;  %vm6945_vm11 = vcmp.eq.s32.totalorder %v3885_v28, %v3210_v61  ;;  %6950 = vst [vmem:[#allocation109_spill] sm:$0xff] %v4193_v37  ;;  %v1339_v57 = vsel %vm4070_vm10, %v4191_v16, -1e+30  ;;  %vm6981_vm10 = vcmp.eq.s32.totalorder %v3979_v46, %v3210_v61  ;;  %v7006_v16 = vld [vmem:[#allocation30_spill] sm:$0xff] }
 0x1b1   :  { %vm4173_vm6 = vmxor %vm6942_vm9, %vm6911_vm15  ;;  %v1338_v47 = vsel %vm4159_vm4, %v4103_v39, -1e+30  ;;  %6959 = vst [vmem:[#allocation110_spill] sm:$0xff] %v4231_v53  ;;  %v6964_v39 = vmov 0  ;;  %vm6966_vm9 = vcmp.eq.s32.totalorder %v3885_v28, %v3213_v62 }
 0x1b2   :  { %v6944_v20 = vsel %vm4173_vm6, 4294967295, %v6943_v20  ;;  %vm4181_vm0 = vmxor %vm6945_vm11, %vm6911_vm15  ;;  %6961 = vst [vmem:[#allocation34_spill] sm:$0xff] %v4234_v15  ;;  %v4236_v37 = vmax.f32 %v1337_v18, %v1338_v47  ;;  %v776_v18 = vmul.f32 2.0, %v349_v17  ;;  %v808_v47 = vmul.f32 2.0, %v445_v52  ;;  %v6973_v17 = vld [vmem:[#allocation31_spill] sm:$0xff] }
 0x1b3   :  { %vm4203_vm12 = vmand %vm6951_vm1, %vm3384_vm13  ;;  %vm6956_vm1 = vcmp.eq.s32.totalorder %v3885_v28, %v3213_v62  ;;  %v777_v52 = vmul.f32 2.0, %v351_v34  ;;  %v451_v34 = vpop.f32.mrb[18].mxu1  ;;  %v7436_v56 = vld [vmem:[#allocation106_spill] sm:$0xff] }
 0x1b4   :  { %v6953_v29 = vsel %vm4203_vm12, 4294967295, %v6952_v29  ;;  %vm4216_vm4 = vmand %vm6945_vm11, %vm3384_vm13  ;;  %6962 = vst [vmem:[#allocation111_spill] sm:$0xff] %v4236_v37  ;;  %vm6963_vm11 = vcmp.eq.s32.totalorder %v3277_v12, %v3213_v62  ;;  %v840_v8 = vsub.f32 %v6978_v33, %v776_v18  ;;  %v4297_v35 = vsub.f32 %v6979_v40, %v808_v47  ;;  %v6984_v33 = vld [vmem:[#allocation56_spill] sm:$0xff]  ;;  %v355_v47 = vpop.f32.mrb[18].mxu0 }
 0x1b5   :  { %v6955_v22 = vsel %vm4216_vm4, 4294967295, %v6954_v22  ;;  %vm4224_vm6 = vmxor %vm6956_vm1, %vm6911_vm15 }
 0x1b6   :  { %vm4242_vm1 = vmxor %vm6963_vm11, %vm6911_vm15  ;;  %vm6969_vm11 = vcmp.eq.s32.totalorder %v3265_v10, %v3213_v62  ;;  %v809_v10 = vmul.f32 2.0, %v447_v11 }
 0x1b7   :  { %v6965_v39 = vsel %vm4242_vm1, 4294967295, %v6964_v39  ;;  %vm4251_vm4 = vmand %vm6966_vm9, %vm3456_vm14 }
 0x1b8   :  { %v6968_v24 = vsel %vm4251_vm4, 4294967295, %v6967_v24  ;;  %vm4265_vm9 = vmand %vm6969_vm11, %vm3456_vm14  ;;  %vm6974_vm4 = vcmp.eq.s32.totalorder %v6973_v17, %v3210_v61  ;;  %vm6977_vm11 = vnez %v6905_v42  ;;  %v1340_v42 = vsel %vm4096_vm8, %v4231_v53, -1e+30 }
 0x1b9   :  { %vm4277_vm12 = vmxor %vm6974_vm4, %vm6911_vm15  ;;  %v1308_v37 = vsel %vm6977_vm11, %v4234_v15, -1e+30  ;;  %v4315_v40 = vsub.f32 %v6984_v33, %v809_v10  ;;  %v4318_v23 = vmax.f32 %v1339_v57, %v1340_v42  ;;  %vm6987_vm8 = vcmp.eq.s32.totalorder %v3979_v46, %v3213_v62  ;;  %v453_v42 = vpop.f32.mrb[19].mxu1  ;;  %v357_v33 = vpop.f32.mrb[19].mxu0 }
 0x1ba   :  { %v6976_v45 = vsel %vm4277_vm12, 4294967295, %v6975_v45  ;;  %v4299_v11 = vmax.f32 %v1307_v26, %v1308_v37  ;;  %vm4308_vm11 = vmxor %vm6981_vm10, %vm6911_vm15  ;;  %v6985_v37 = vld [vmem:[#allocation38_spill] sm:$0xff]  ;;  %v778_v57 = vmul.f32 2.0, %v355_v47  ;;  %vm6996_vm12 = vnez %v6899_v14  ;;  %v457_v9 = vpop.f32.mrb[20].mxu1  ;;  %v7068_v26 = vld [vmem:[#allocation60_spill] sm:$0xff] }
 0x1bb   :  { %v841_v18 = vsub.f32 %v6985_v37, %v777_v52  ;;  %6986 = vst [vmem:[#allocation37_spill] sm:$0xff] %v4318_v23  ;;  %vm4324_vm10 = vmxor %vm6987_vm8, %vm6911_vm15  ;;  %v810_v52 = vmul.f32 2.0, %v451_v34  ;;  %vm6992_vm8 = vcmp.eq.s32.totalorder %v3279_v13, %v3210_v61  ;;  %v6993_v37 = vmov 0  ;;  %v7438_v30 = vld [vmem:[#allocation111_spill] sm:$0xff] }
 0x1bc   :  { %6980 = vst [vmem:[#allocation31_spill] sm:$0xff] %v4299_v11  ;;  %vm6990_vm4 = vmand %vm3975_vm3, %vm3384_vm13  ;;  %v811_v34 = vmul.f32 2.0, %v453_v42  ;;  %v779_v23 = vmul.f32 2.0, %v357_v33  ;;  %vm7000_vm3 = vcmp.eq.s32.totalorder %v6973_v17, %v3213_v62  ;;  %v7004_v42 = vld [vmem:[#allocation35_spill] sm:$0xff]  ;;  %v7008_v15 = vmov 0 }
 0x1bd   :  { %v4335_v10 = vsel %vm6990_vm4, %v840_v8, 1e+30  ;;  %vm4342_vm5 = vmand %vm6992_vm8, %vm3384_vm13  ;;  %v842_v33 = vsub.f32 %v7004_v42, %v778_v57  ;;  %v1310_v53 = vsel %vm4142_vm2, %v841_v18, -1e+30  ;;  %vm7017_vm2 = vcmp.eq.s32.totalorder %v3277_v12, %v3210_v61 }
 0x1be   :  { %6991 = vst [vmem:[#allocation55_spill] sm:$0xff] %v4335_v10  ;;  %v6994_v37 = vsel %vm4342_vm5, 4294967295, %v6993_v37  ;;  %vm1277_vm4 = vmand %vm4308_vm11, %vm3384_vm13  ;;  %vm6999_vm5 = vnez %v6929_v31  ;;  %v7005_v31 = vld [vmem:[#allocation53_spill] sm:$0xff]  ;;  %v7064_v10 = vmov 0 }
 0x1bf   :  { %vm6997_vm8 = vmand %vm6996_vm12, %vm3456_vm14  ;;  %v1309_v11 = vsel %vm6999_vm5, %v840_v8, -1e+30  ;;  %v4378_v14 = vsel %vm1277_vm4, %v4297_v35, 1e+30  ;;  %v874_v8 = vsub.f32 %v7005_v31, %v810_v52  ;;  %vm7007_vm5 = vcmp.eq.s32.totalorder %v7006_v16, %v3210_v61  ;;  %v7015_v52 = vld [vmem:[#allocation36_spill] sm:$0xff]  ;;  %v361_v31 = vpop.f32.mrb[20].mxu0 }
 0x1c0   :  { %v4361_v47 = vsel %vm6997_vm8, %v841_v18, 1e+30  ;;  %vm4369_vm1 = vmxor %vm7000_vm3, %vm6911_vm15  ;;  %7003 = vst [vmem:[#allocation38_spill] sm:$0xff] %v4378_v14  ;;  %v7014_v18 = vld [vmem:[#allocation54_spill] sm:$0xff]  ;;  %v843_v42 = vsub.f32 %v7015_v52, %v779_v23  ;;  %v4406_v51 = vmax.f32 %v1309_v11, %v1310_v53  ;;  %vm7020_vm8 = vcmp.eq.s32.totalorder %v3279_v13, %v3213_v62  ;;  %v363_v44 = vpop.f32.mrb[21].mxu0 }
 0x1c1   :  { %6998 = vst [vmem:[#allocation56_spill] sm:$0xff] %v4361_v47  ;;  %v7002_v25 = vsel %vm4369_vm1, 4294967295, %v7001_v25  ;;  %vm1278_vm12 = vmand %vm4324_vm10, %vm3456_vm14  ;;  %vm7010_vm10 = vcmp.eq.s32.totalorder %v3979_v46, %v3210_v61  ;;  %v875_v57 = vsub.f32 %v7014_v18, %v811_v34  ;;  %v7021_v23 = vmov 0 }
 0x1c2   :  { %vm4388_vm11 = vmxor %vm7007_vm5, %vm6911_vm15  ;;  %v4402_v0 = vsel %vm1278_vm12, %v4315_v40, 1e+30  ;;  %7016 = vst [vmem:[#allocation53_spill] sm:$0xff] %v4406_v51  ;;  %vm7031_vm5 = vnez %v6955_v22  ;;  %v1312_v34 = vsel %vm4265_vm9, %v843_v42, -1e+30  ;;  %v780_v14 = vmul.f32 2.0, %v361_v31 }
 0x1c3   :  { %v7009_v15 = vsel %vm4388_vm11, 4294967295, %v7008_v15  ;;  %vm4397_vm3 = vmand %vm7010_vm10, %vm3384_vm13  ;;  %7013 = vst [vmem:[#allocation35_spill] sm:$0xff] %v4402_v0  ;;  %v812_v47 = vmul.f32 2.0, %v457_v9  ;;  %v459_v9 = vpop.f32.mrb[21].mxu1  ;;  %v7127_v22 = vmov 0 }
 0x1c4   :  { %vm4413_vm4 = vmand %vm7017_vm2, %vm3384_vm13  ;;  %vm7024_vm2 = vcmp.eq.s32.totalorder %v3979_v46, %v3213_v62  ;;  %v1343_v46 = vsel %vm7031_vm5, %v874_v8, -1e+30 }
 0x1c5   :  { %v7019_v49 = vsel %vm4413_vm4, 4294967295, %v7018_v49  ;;  %vm4422_vm12 = vmand %vm7020_vm8, %vm3456_vm14  ;;  %vm7027_vm4 = vnez %v6953_v29  ;;  %v7037_v29 = vmov 0  ;;  %v4587_v53 = vsub.f32 %v7068_v26, %v812_v47  ;;  %v7080_v26 = vld [vmem:[#allocation61_spill] sm:$0xff] }
 0x1c6   :  { %v7022_v23 = vsel %vm4422_vm12, 4294967295, %v7021_v23  ;;  %vm4435_vm11 = vmand %vm7024_vm2, %vm3456_vm14  ;;  %v1311_v13 = vsel %vm7027_vm4, %v842_v33, -1e+30  ;;  %vm7028_vm12 = vnez %v6880_v1  ;;  %vm7032_vm2 = vnez %v6944_v20 }
 0x1c7   :  { %vm7029_vm10 = vmand %vm7028_vm12, %vm3384_vm13  ;;  %vm7033_vm4 = vcmp.eq.s32.totalorder %v7006_v16, %v3213_v62  ;;  %v7034_v1 = vmov 0  ;;  %vm7036_vm12 = vcmp.eq.s32.totalorder %v4074_v48, %v3210_v61  ;;  %v1342_v28 = vsel %vm4435_vm11, %v4315_v40, -1e+30 }
 0x1c8   :  { %v4448_v11 = vsel %vm7029_vm10, %v842_v33, 1e+30  ;;  %vm4462_vm1 = vmxor %vm7033_vm4, %vm6911_vm15  ;;  %vm7046_vm4 = vcmp.eq.s32.totalorder %v7045_v21, %v3210_v61  ;;  %vm7073_vm11 = vcmp.eq.s32.totalorder %v4185_v32, %v3213_v62 }
 0x1c9   :  { %7030 = vst [vmem:[#allocation30_spill] sm:$0xff] %v4448_v11  ;;  %v7035_v1 = vsel %vm4462_vm1, 4294967295, %v7034_v1  ;;  %vm4471_vm5 = vmand %vm7036_vm12, %vm3384_vm13 }
 0x1ca   :  { %v7038_v29 = vsel %vm4471_vm5, 4294967295, %v7037_v29  ;;  %vm7039_vm10 = vmmov %vm7036_vm12  ;;  %vm7043_vm12 = vnez %v6968_v24  ;;  %v7136_v24 = vmov 0 }
 0x1cb   :  { %vm4479_vm8 = vmxor %vm7039_vm10, %vm6911_vm15  ;;  %v1344_v18 = vsel %vm7043_vm12, %v875_v57, -1e+30 }
 0x1cc   :  { %vm7042_vm1 = vmand %vm4181_vm0, %vm3384_vm13  ;;  %v4564_v31 = vmax.f32 %v1343_v46, %v1344_v18  ;;  %v781_v46 = vmul.f32 2.0, %v363_v44  ;;  %v463_v18 = vpop.f32.mrb[22].mxu1 }
 0x1cd   :  { %v4490_v33 = vsel %vm7042_vm1, %v874_v8, 1e+30  ;;  %vm7044_vm10 = vmand %vm4224_vm6, %vm3456_vm14  ;;  %v7047_v8 = vmov 0  ;;  %vm7049_vm1 = vcmp.eq.s32.totalorder %v4074_v48, %v3213_v62  ;;  %v7058_v48 = vmov 0 }
 0x1ce   :  { %v4499_v52 = vsel %vm7044_vm10, %v875_v57, 1e+30  ;;  %vm4507_vm0 = vmxor %vm7046_vm4, %vm6911_vm15  ;;  %v4528_v57 = vpop.permute.xlu0 %1006  ;;  %7062 = vst [vmem:[#allocation33_spill] sm:$0xff] %v4564_v31  ;;  %v814_v51 = vmul.f32 2.0, %v463_v18  ;;  %v7087_v31 = vld [vmem:[#allocation42_spill] sm:$0xff] }
 0x1cf   :  { %v7048_v8 = vsel %vm4507_vm0, 4294967295, %v7047_v8  ;;  %vm4516_vm12 = vmand %vm7049_vm1, %vm3456_vm14 }
 0x1d0   :  { %v7051_v38 = vsel %vm4516_vm12, 4294967295, %v7050_v38  ;;  %vm7052_vm6 = vmmov %vm7049_vm1  ;;  %vm7057_vm1 = vcmp.eq.s32.totalorder %v3277_v12, %v3213_v62  ;;  %v1341_v12 = vsel %vm4397_vm3, %v4297_v35, -1e+30  ;;  %v7067_v35 = vld [vmem:[#allocation41_spill] sm:$0xff]  ;;  %vm7076_vm3 = vnez %v6994_v37 }
 0x1d1   :  { %vm4524_vm10 = vmxor %vm7052_vm6, %vm6911_vm15  ;;  %v4584_v40 = vsub.f32 %v7067_v35, %v780_v14  ;;  %v465_v14 = vpop.f32.mrb[23].mxu1  ;;  %v4598_v50 = vmax.f32 %v1341_v12, %v1342_v28  ;;  %v7082_v37 = vmov 0  ;;  %vm7132_vm12 = vnez %v6965_v39 }
 0x1d2   :  { %vm7055_vm4 = vmand %vm6972_vm7, %vm3456_vm14 }
 0x1d3   :  { %v4537_v0 = vsel %vm7055_vm4, %v843_v42, 1e+30  ;;  %vm4544_vm6 = vmand %vm7057_vm1, %vm3456_vm14  ;;  %v4562_v42 = vmax.f32 %v1311_v13, %v1312_v34  ;;  %vm7063_vm4 = vcmp.eq.s32.totalorder %v6973_v17, %v3210_v61  ;;  %v813_v13 = vmul.f32 2.0, %v459_v9  ;;  %v367_v34 = vpop.f32.mrb[22].mxu0  ;;  %7072 = vst [vmem:[#allocation41_spill] sm:$0xff] %v4598_v50  ;;  %v469_v50 = vpop.f32.mrb[24].mxu1 }
 0x1d4   :  { %7056 = vst [vmem:[#allocation54_spill] sm:$0xff] %v4537_v0  ;;  %v7059_v48 = vsel %vm4544_vm6, 4294967295, %v7058_v48  ;;  %vm4571_vm1 = vmand %vm7063_vm4, %vm3384_vm13  ;;  %vm7069_vm4 = vcmp.eq.s32.totalorder %v4185_v32, %v3210_v61  ;;  %v369_v35 = vpop.f32.mrb[23].mxu0  ;;  %v1313_v44 = vsel %vm7076_vm3, %v4584_v40, -1e+30  ;;  %v815_v0 = vmul.f32 2.0, %v465_v14 }
 0x1d5   :  { %7061 = vst [vmem:[#allocation36_spill] sm:$0xff] %v4562_v42  ;;  %v7065_v10 = vsel %vm4571_vm1, 4294967295, %v7064_v10  ;;  %vm4594_vm0 = vmand %vm7069_vm4, %vm3384_vm13  ;;  %v782_v42 = vmul.f32 2.0, %v367_v34  ;;  %vm7077_vm1 = vnez %v6914_v54  ;;  %v877_v34 = vsub.f32 %v7080_v26, %v813_v13  ;;  %v7088_v13 = vld [vmem:[#allocation39_spill] sm:$0xff]  ;;  %v7089_v26 = vld [vmem:[#allocation57_spill] sm:$0xff]  ;;  %v373_v11 = vpop.f32.mrb[24].mxu0 }
 0x1d6   :  { %vm4607_vm7 = vmand %vm7073_vm11, %vm3456_vm14  ;;  %v1345_v28 = vsel %vm4594_vm0, %v4587_v53, -1e+30  ;;  %vm7081_vm11 = vcmp.eq.s32.totalorder %v7045_v21, %v3213_v62  ;;  %v4651_v47 = vsub.f32 %v7089_v26, %v814_v51  ;;  %vm7091_vm3 = vcmp.eq.s32.totalorder %v7090_v6, %v3210_v61  ;;  %v7134_v54 = vld [vmem:[#allocation62_spill] sm:$0xff]  ;;  %v375_v58 = vpop.f32.mrb[25].mxu0 }
 0x1d7   :  { %vm7078_vm9 = vmand %vm7077_vm1, %vm3384_vm13  ;;  %vm7084_vm1 = vcmp.eq.s32.totalorder %v4185_v32, %v3210_v61  ;;  %v4648_v18 = vsub.f32 %v7088_v13, %v782_v42  ;;  %v1346_v51 = vsel %vm4607_vm7, %v877_v34, -1e+30  ;;  %v784_v14 = vmul.f32 2.0, %v373_v11  ;;  %v471_v13 = vpop.f32.mrb[25].mxu1  ;;  %v379_v7 = vpop.f32.mrb[26].mxu0 }
 0x1d8   :  { %v4622_v12 = vsel %vm7078_vm9, %v4584_v40, 1e+30  ;;  %vm4632_vm4 = vmxor %vm7081_vm11, %vm6911_vm15  ;;  %v845_v40 = vsub.f32 %v7087_v31, %v781_v46  ;;  %v783_v46 = vmul.f32 2.0, %v369_v35  ;;  %v816_v31 = vmul.f32 2.0, %v469_v50  ;;  %v4688_v50 = vpop.permute.xlu1 %1015  ;;  %v7106_v35 = vld [vmem:[#allocation59_spill] sm:$0xff]  ;;  %v381_v4 = vpop.f32.mrb[27].mxu0 }
 0x1d9   :  { %7079 = vst [vmem:[#allocation60_spill] sm:$0xff] %v4622_v12  ;;  %v7083_v37 = vsel %vm4632_vm4, 4294967295, %v7082_v37  ;;  %vm4640_vm9 = vmxor %vm7084_vm1, %vm6911_vm15  ;;  %vm7094_vm1 = vcmp.eq.s32.totalorder %v4185_v32, %v3213_v62  ;;  %v7098_v26 = vmov 0  ;;  %vm7101_vm6 = vnez %v7022_v23 }
 0x1da   :  { %vm4657_vm11 = vmxor %vm7091_vm3, %vm6911_vm15  ;;  %vm7097_vm3 = vcmp.eq.s32.totalorder %v6973_v17, %v3213_v62  ;;  %v1314_v32 = vsel %vm7101_vm6, %v845_v40, -1e+30  ;;  %vm7105_vm4 = vnez %v7019_v49  ;;  %v4703_v9 = vsub.f32 %v7106_v35, %v815_v0 }
 0x1db   :  { %v7093_v55 = vsel %vm4657_vm11, 4294967295, %v7092_v55  ;;  %vm4665_vm0 = vmxor %vm7094_vm1, %vm6911_vm15  ;;  %v1315_v11 = vsel %vm7105_vm4, %v4648_v18, -1e+30  ;;  %vm7111_vm4 = vcmp.eq.s32.totalorder %v7090_v6, %v3213_v62  ;;  %v7112_v49 = vmov 0 }
 0x1dc   :  { %vm4676_vm11 = vmand %vm7097_vm3, %vm3456_vm14  ;;  %vm7102_vm3 = vnez %v6938_v36  ;;  %v4812_v42 = vsub.f32 %v7134_v54, %v816_v31  ;;  %v4850_v19 = vmax.f32 %v1313_v44, %v1314_v32  ;;  %v785_v31 = vmul.f32 2.0, %v375_v58 }
 0x1dd   :  { %v7099_v26 = vsel %vm4676_vm11, 4294967295, %v7098_v26  ;;  %vm1281_vm7 = vmand %vm4640_vm9, %vm3384_vm13  ;;  %vm7107_vm9 = vcmp.eq.s32.totalorder %v7006_v16, %v3210_v61  ;;  %v4862_v59 = vmax.f32 %v1345_v28, %v1346_v51  ;;  %v786_v32 = vmul.f32 2.0, %v379_v7  ;;  %v7150_v28 = vld [vmem:[#allocation46_spill] sm:$0xff] }
 0x1de   :  { %vm7103_vm11 = vmand %vm7102_vm3, %vm3456_vm14  ;;  %v4731_v36 = vsel %vm1281_vm7, %v4587_v53, 1e+30  ;;  %v7117_v53 = vmov 0  ;;  %7145 = vst [vmem:[#allocation57_spill] sm:$0xff] %v4850_v19  ;;  %v849_v51 = vsub.f32 %v7150_v28, %v785_v31  ;;  %v787_v27 = vmul.f32 2.0, %v381_v4  ;;  %v7155_v31 = vld [vmem:[#allocation21_spill] sm:$0xff] }
 0x1df   :  { %v4697_v17 = vsel %vm7103_vm11, %v845_v40, 1e+30  ;;  %vm4710_vm6 = vmand %vm7107_vm9, %vm3384_vm13  ;;  %vm7110_vm11 = vnez %v7009_v15  ;;  %v7115_v40 = vld [vmem:[#allocation40_spill] sm:$0xff] }
 0x1e0   :  { %7104 = vst [vmem:[#allocation61_spill] sm:$0xff] %v4697_v17  ;;  %vm4722_vm1 = vmxor %vm7111_vm4, %vm6911_vm15  ;;  %v847_v35 = vsub.f32 %v7115_v40, %v783_v46  ;;  %v7121_v46 = vld [vmem:[#allocation45_spill] sm:$0xff]  ;;  %v385_v17 = vpop.f32.mrb[28].mxu0 }
 0x1e1   :  { %v7113_v49 = vsel %vm4722_vm1, 4294967295, %v7112_v49  ;;  %vm1282_vm9 = vmand %vm4665_vm0, %vm3456_vm14  ;;  %vm7116_vm0 = vcmp.eq.s32.totalorder %v4354_v43, %v3210_v61  ;;  %v4768_v40 = vsub.f32 %v7121_v46, %v784_v14  ;;  %v788_v4 = vmul.f32 2.0, %v385_v17  ;;  %v387_v28 = vpop.f32.mrb[29].mxu0 }
 0x1e2   :  { %vm7114_vm3 = vmand %vm7032_vm2, %vm3384_vm13  ;;  %v4754_v20 = vsel %vm1282_vm9, %v877_v34, 1e+30  ;;  %v7123_v34 = vmov 0  ;;  %vm7131_vm9 = vnez %v7059_v48  ;;  %v4837_v48 = vpop.permute.xlu0 %1012 }
 0x1e3   :  { %v4739_v0 = vsel %vm7114_vm3, %v4648_v18, 1e+30  ;;  %vm4750_vm7 = vmand %vm7116_vm0, %vm3384_vm13  ;;  %vm7122_vm3 = vcmp.eq.s32.totalorder %v7006_v16, %v3213_v62  ;;  %vm7126_vm0 = vcmp.eq.s32.totalorder %v4354_v43, %v3213_v62  ;;  %v1316_v14 = vsel %vm7131_vm9, %v847_v35, -1e+30 }
 0x1e4   :  { %v7118_v53 = vsel %vm4750_vm7, 4294967295, %v7117_v53  ;;  %vm7119_vm2 = vmand %vm4479_vm8, %vm3384_vm13  ;;  %v4873_v63 = vmax.f32 %v1315_v11, %v1316_v14  ;;  %v7154_v11 = vld [vmem:[#allocation43_spill] sm:$0xff]  ;;  %vm7188_vm7 = vnez %v7035_v1 }
 0x1e5   :  { %v4762_v18 = vsel %vm7119_vm2, %v4651_v47, 1e+30  ;;  %vm4775_vm4 = vmand %vm7122_vm3, %vm3456_vm14  ;;  %vm7143_vm3 = vnez %v6976_v45  ;;  %v475_v45 = vpop.f32.mrb[26].mxu1  ;;  %v4892_v14 = vsub.f32 %v7154_v11, %v786_v32 }
 0x1e6   :  { %7120 = vst [vmem:[#allocation42_spill] sm:$0xff] %v4762_v18  ;;  %v7124_v34 = vsel %vm4775_vm4, 4294967295, %v7123_v34  ;;  %vm4788_vm2 = vmand %vm7126_vm0, %vm3456_vm14  ;;  %v818_v58 = vmul.f32 2.0, %v475_v45  ;;  %v477_v19 = vpop.f32.mrb[27].mxu1  ;;  %vm7160_vm4 = vcmp.eq.s32.totalorder %v4528_v57, %v3213_v62  ;;  %v7240_v18 = vmov 0 }
 0x1e7   :  { %v7128_v22 = vsel %vm4788_vm2, 4294967295, %v7127_v22  ;;  %vm7129_vm5 = vmand %vm4524_vm10, %vm3456_vm14  ;;  %vm7135_vm10 = vcmp.eq.s32.totalorder %v7045_v21, %v3210_v61  ;;  %v819_v44 = vmul.f32 2.0, %v477_v19  ;;  %v481_v12 = vpop.f32.mrb[28].mxu1  ;;  %vm7231_vm2 = vnez %v7083_v37 }
 0x1e8   :  { %v4800_v16 = vsel %vm7129_vm5, %v4703_v9, 1e+30  ;;  %vm7133_vm0 = vmand %vm7132_vm12, %vm3456_vm14  ;;  %vm7139_vm12 = vcmp.eq.s32.totalorder %v4354_v43, %v3210_v61  ;;  %v4895_v19 = vsub.f32 %v7155_v31, %v818_v58  ;;  %v820_v45 = vmul.f32 2.0, %v481_v12  ;;  %v7166_v58 = vld [vmem:[#allocation22_spill] sm:$0xff]  ;;  %v7175_v31 = vld [vmem:[#allocation44_spill] sm:$0xff]  ;;  %v391_v12 = vpop.f32.mrb[30].mxu0 }
 0x1e9   :  { %7130 = vst [vmem:[#allocation39_spill] sm:$0xff] %v4800_v16  ;;  %v4809_v46 = vsel %vm7133_vm0, %v847_v35, 1e+30  ;;  %vm4819_vm5 = vmand %vm7135_vm10, %vm3384_vm13  ;;  %v817_v35 = vmul.f32 2.0, %v471_v13  ;;  %v4934_v11 = vsub.f32 %v7166_v58, %v819_v44  ;;  %v1319_v44 = vsel %vm4710_vm6, %v4892_v14, -1e+30 }
 0x1ea   :  { %v7137_v24 = vsel %vm4819_vm5, 4294967295, %v7136_v24  ;;  %vm4831_vm0 = vmxor %vm7139_vm12, %vm6911_vm15  ;;  %vm7146_vm12 = vcmp.eq.s32.totalorder %v4354_v43, %v3213_v62  ;;  %v7149_v43 = vld [vmem:[#allocation63_spill] sm:$0xff]  ;;  %vm7164_vm5 = vnez %v7002_v25  ;;  %v851_v58 = vsub.f32 %v7175_v31, %v787_v27  ;;  %v7190_v25 = vld [vmem:[#allocation64_spill] sm:$0xff] }
 0x1eb   :  { %vm7144_vm9 = vmand %vm7143_vm3, %vm3384_vm13  ;;  %v4871_v13 = vsub.f32 %v7149_v43, %v817_v35  ;;  %v483_v43 = vpop.f32.mrb[29].mxu1  ;;  %v7157_v35 = vmov 0  ;;  %v7211_v27 = vmov 0  ;;  %v7220_v16 = vmov 0 }
 0x1ec   :  { %v4848_v54 = vsel %vm7144_vm9, %v4768_v40, 1e+30  ;;  %vm4856_vm8 = vmxor %vm7146_vm12, %vm6911_vm15  ;;  %vm7151_vm12 = vcmp.eq.s32.totalorder %v4528_v57, %v3210_v61  ;;  %vm7156_vm9 = vcmp.eq.s32.totalorder %v7045_v21, %v3213_v62  ;;  %v7262_v31 = vmov 0 }
 0x1ed   :  { %v7148_v60 = vsel %vm4856_vm8, 4294967295, %v7147_v60  ;;  %vm4887_vm3 = vmand %vm7151_vm12, %vm3384_vm13 }
 0x1ee   :  { %vm4902_vm10 = vmand %vm7156_vm9, %vm3456_vm14  ;;  %v1349_v21 = vsel %vm4887_vm3, %v4812_v42, -1e+30 }
 0x1ef   :  { %v7158_v35 = vsel %vm4902_vm10, 4294967295, %v7157_v35  ;;  %vm4915_vm8 = vmand %vm7160_vm4, %vm3456_vm14  ;;  %vm7163_vm10 = vnez %v7099_v26  ;;  %vm7167_vm4 = vcmp.eq.s32.totalorder %v7090_v6, %v3210_v61 }
 0x1f0   :  { %v1318_v17 = vsel %vm7163_vm10, %v849_v51, -1e+30  ;;  %vm7165_vm12 = vmand %vm7164_vm5, %vm3456_vm14  ;;  %vm7170_vm10 = vnez %v7093_v55  ;;  %vm7171_vm5 = vcmp.eq.s32.totalorder %v4528_v57, %v3210_v61  ;;  %v1350_v26 = vsel %vm4915_vm8, %v4871_v13, -1e+30 }
 0x1f1   :  { %v4931_v32 = vsel %vm7165_vm12, %v849_v51, 1e+30  ;;  %vm4941_vm9 = vmand %vm7167_vm4, %vm3384_vm13  ;;  %v7273_v55 = vmov 0 }
 0x1f2   :  { %vm4953_vm12 = vmxor %vm7171_vm5, %vm6911_vm15  ;;  %vm7176_vm5 = vcmp.eq.s32.totalorder %v4528_v57, %v3213_v62  ;;  %v7180_v57 = vld [vmem:[#allocation50_spill] sm:$0xff] }
 0x1f3   :  { %vm7174_vm4 = vmand %vm7110_vm11, %vm3384_vm13  ;;  %vm7181_vm11 = vcmp.eq.s32.totalorder %v7090_v6, %v3213_v62 }
 0x1f4   :  { %v4971_v51 = vsel %vm7174_vm4, %v4892_v14, 1e+30  ;;  %vm4978_vm1 = vmxor %vm7176_vm5, %vm6911_vm15  ;;  %v4997_v14 = vsub.f32 %v7180_v57, %v788_v4  ;;  %v5034_v57 = vsub.f32 %v7190_v25, %v820_v45 }
 0x1f5   :  { %vm7179_vm6 = vmand %vm4831_vm0, %vm3384_vm13 }
 0x1f6   :  { %v4991_v15 = vsel %vm7179_vm6, %v4895_v19, 1e+30  ;;  %vm5004_vm8 = vmand %vm7181_vm11, %vm3456_vm14  ;;  %vm7185_vm6 = vnez %v7148_v60  ;;  %vm7187_vm11 = vnez %v7124_v34 }
 0x1f7   :  { %vm1285_vm5 = vmand %vm4953_vm12, %vm3384_vm13  ;;  %v1320_v39 = vsel %vm7187_vm11, %v851_v58, -1e+30 }
 0x1f8   :  { %vm7186_vm3 = vmand %vm7185_vm6, %vm3456_vm14  ;;  %v5041_v60 = vsel %vm1285_vm5, %v4812_v42, 1e+30  ;;  %vm7194_vm6 = vnez %v7051_v38  ;;  %vm7198_vm5 = vcmp.eq.s32.totalorder %v4688_v50, %v3210_v61  ;;  %v821_v38 = vmul.f32 2.0, %v483_v43 }
 0x1f9   :  { %v5022_v6 = vsel %vm7186_vm3, %v4934_v11, 1e+30  ;;  %vm7189_vm4 = vmand %vm7188_vm7, %vm3456_vm14  ;;  %vm7191_vm3 = vnez %v7137_v24  ;;  %vm7192_vm7 = vnez %v7048_v8  ;;  %v7195_v45 = vsel %vm7194_vm6, %v4703_v9, -1e+30 }
 0x1fa   :  { %v5031_v4 = vsel %vm7189_vm4, %v851_v58, 1e+30  ;;  %vm1286_vm12 = vmand %vm4978_vm1, %vm3456_vm14  ;;  %v1321_v1 = vsel %vm7191_vm3, %v4997_v14, -1e+30  ;;  %vm7196_vm1 = vnez %v7038_v29  ;;  %v789_v9 = vmul.f32 2.0, %v387_v28  ;;  %v487_v29 = vpop.f32.mrb[30].mxu1 }
 0x1fb   :  { %vm7193_vm4 = vmand %vm7192_vm7, %vm3384_vm13  ;;  %v7197_v42 = vsel %vm7196_vm1, %v4651_v47, -1e+30  ;;  %v5074_v24 = vsel %vm1286_vm12, %v4871_v13, 1e+30  ;;  %vm7201_vm3 = vcmp.eq.s32.totalorder %v3223_v3, %v3210_v61  ;;  %vm7204_vm12 = vcmp.eq.s32.totalorder %v4688_v50, %v3213_v62  ;;  %v489_v25 = vpop.f32.mrb[31].mxu1 }
 0x1fc   :  { %v5052_v34 = vsel %vm7193_vm4, %v4997_v14, 1e+30  ;;  %v5062_v58 = vmax.f32 %v7197_v42, %v7195_v45  ;;  %vm5069_vm11 = vmand %vm7198_vm5, %vm3384_vm13  ;;  %v7202_v14 = vmov 0  ;;  %v790_v43 = vmul.f32 2.0, %v391_v12  ;;  %v393_v45 = vpop.f32.mrb[31].mxu0  ;;  %v7217_v12 = vld [vmem:[#allocation51_spill] sm:$0xff] }
 0x1fd   :  { %vm5082_vm7 = vmxor %vm7201_vm3, %vm6911_vm15  ;;  %v822_v28 = vmul.f32 2.0, %v487_v29  ;;  %vm7207_vm6 = vnez %v7065_v10  ;;  %vm7210_vm1 = vcmp.eq.s32.totalorder %v3223_v3, %v3213_v62  ;;  %vm7213_vm3 = vcmp.eq.s32.totalorder %v4688_v50, %v3210_v61  ;;  %v7218_v3 = vld [vmem:[#allocation48_spill] sm:$0xff] }
 0x1fe   :  { %v7203_v14 = vsel %vm5082_vm7, 4294967295, %v7202_v14  ;;  %vm5091_vm4 = vmand %vm7204_vm12, %vm3456_vm14  ;;  %v7208_v42 = vsel %vm7207_vm6, %v4768_v40, -1e+30  ;;  %v7216_v40 = vld [vmem:[#allocation68_spill] sm:$0xff]  ;;  %v853_v29 = vsub.f32 %v7217_v12, %v789_v9  ;;  %v791_v23 = vmul.f32 2.0, %v393_v45 }
 0x1ff   :  { %v5099_v47 = vmax.f32 %v7208_v42, %v1318_v17  ;;  %vm5107_vm5 = vmxor %vm7210_vm1, %vm6911_vm15  ;;  %v885_v17 = vsub.f32 %v7216_v40, %v821_v38  ;;  %v823_v42 = vmul.f32 2.0, %v489_v25  ;;  %vm7219_vm6 = vcmp.eq.s32.totalorder %v7218_v3, %v3210_v61  ;;  %v7225_v38 = vld [vmem:[#allocation47_spill] sm:$0xff]  ;;  %v7406_v10 = vld [vmem:[#allocation76_spill] sm:$0xff] }
 0x200   :  { %v7212_v27 = vsel %vm5107_vm5, 4294967295, %v7211_v27  ;;  %vm5115_vm12 = vmxor %vm7213_vm3, %vm6911_vm15  ;;  %vm7222_vm3 = vcmp.eq.s32.totalorder %v4688_v50, %v3213_v62  ;;  %v854_v9 = vsub.f32 %v7225_v38, %v790_v43  ;;  %v7226_v25 = vld [vmem:[#allocation23_spill] sm:$0xff]  ;;  %v5139_v40 = vmax.f32 %v1349_v21, %v1350_v26  ;;  %v7233_v26 = vld [vmem:[#allocation24_spill] sm:$0xff] }
 0x201   :  { %7209 = vst [vmem:[#allocation32_spill] sm:$0xff] %v5099_v47  ;;  %vm5125_vm1 = vmxor %vm7219_vm6, %vm6911_vm15  ;;  %v886_v45 = vsub.f32 %v7226_v25, %v822_v28  ;;  %v1682_v12 = vmin.f32 %v4848_v54, %v4931_v32  ;;  %vm7227_vm6 = vcmp.eq.s32.totalorder %v7218_v3, %v3213_v62  ;;  %v7228_v47 = vmov 0  ;;  %v7234_v28 = vld [vmem:[#allocation49_spill] sm:$0xff] }
 0x202   :  { %v7221_v16 = vsel %vm5125_vm1, 4294967295, %v7220_v16  ;;  %vm5133_vm5 = vmxor %vm7222_vm3, %vm6911_vm15  ;;  %vm7230_vm7 = vnez %v7158_v35  ;;  %v887_v43 = vsub.f32 %v7233_v26, %v823_v42  ;;  %v855_v3 = vsub.f32 %v7234_v28, %v791_v23 }
 0x203   :  { %vm5147_vm1 = vmxor %vm7227_vm6, %vm6911_vm15  ;;  %v1322_v50 = vsel %vm7230_vm7, %v853_v29, -1e+30  ;;  %vm7235_vm6 = vcmp.eq.s32.totalorder %v3221_v2, %v3210_v61  ;;  %v1323_v37 = vsel %vm4941_vm9, %v854_v9, -1e+30  ;;  %v1355_v23 = vsel %vm5069_vm11, %v886_v45, -1e+30 }
 0x204   :  { %v7229_v47 = vsel %vm5147_vm1, 4294967295, %v7228_v47  ;;  %vm1291_vm3 = vmand %vm5115_vm12, %vm3384_vm13  ;;  %vm7242_vm9 = vcmp.eq.s32.totalorder %v4837_v48, %v3210_v61  ;;  %vm7245_vm11 = vcmp.eq.s32.totalorder %v3404_v41, %v3210_v61  ;;  %v7246_v8 = vmov 0 }
 0x205   :  { %vm7232_vm0 = vmand %vm7231_vm2, %vm3456_vm14  ;;  %v5208_v7 = vsel %vm1291_vm3, %v886_v45, 1e+30  ;;  %vm7248_vm3 = vcmp.eq.s32.totalorder %v4837_v48, %v3213_v62  ;;  %v1324_v42 = vsel %vm5004_vm8, %v855_v3, -1e+30  ;;  %vm7255_vm8 = vcmp.eq.s32.totalorder %v3404_v41, %v3213_v62  ;;  %v7405_v41 = vld [vmem:[#allocation93_spill] sm:$0xff] }
 0x206   :  { %v5162_v21 = vsel %vm7232_vm0, %v853_v29, 1e+30  ;;  %vm5170_vm1 = vmxor %vm7235_vm6, %vm6911_vm15  ;;  %v5189_v29 = vmax.f32 %v1319_v44, %v1320_v39  ;;  %vm7239_vm0 = vcmp.eq.s32.totalorder %v3221_v2, %v3213_v62  ;;  %v1356_v44 = vsel %vm5091_vm4, %v887_v43, -1e+30 }
 0x207   :  { %vm1292_vm7 = vmand %vm5133_vm5, %vm3456_vm14  ;;  %v1730_v2 = vmin.f32 %v5041_v60, %v5074_v24  ;;  %vm7249_vm4 = vnez %v7113_v49  ;;  %v7256_v49 = vmov 0  ;;  %v7266_v28 = vmov 0 }
 0x208   :  { %vm7238_vm2 = vmand %vm7170_vm10, %vm3384_vm13  ;;  %v5212_v39 = vsel %vm1292_vm7, %v887_v43, 1e+30  ;;  %v5291_v43 = vmax.f32 %v1355_v23, %v1356_v44 }
 0x209   :  { %v5185_v35 = vsel %vm7238_vm2, %v854_v9, 1e+30  ;;  %vm5195_vm5 = vmxor %vm7239_vm0, %vm6911_vm15  ;;  %vm7251_vm2 = vnez %v7128_v22  ;;  %vm7253_vm0 = vnez %v7118_v53 }
 0x20a   :  { %v7241_v18 = vsel %vm5195_vm5, 4294967295, %v7240_v18  ;;  %vm5204_vm10 = vmand %vm7242_vm9, %vm3384_vm13  ;;  %v7252_v9 = vsel %vm7251_vm2, %v4934_v11, -1e+30  ;;  %v7254_v25 = vsel %vm7253_vm0, %v4895_v19, -1e+30  ;;  %v1685_v19 = vmin.f32 %v4971_v51, %v5031_v4 }
 0x20b   :  { %vm5220_vm12 = vmxor %vm7245_vm11, %vm6911_vm15  ;;  %v1353_v13 = vsel %vm5204_vm10, %v5034_v57, -1e+30  ;;  %v5249_v45 = vmax.f32 %v7254_v25, %v7252_v9  ;;  %vm7258_vm10 = vcmp.eq.s32.totalorder %v4837_v48, %v3210_v61  ;;  %v5269_v11 = vmax.f32 %v1321_v1, %v1322_v50  ;;  %v7285_v25 = vld [vmem:[#allocation69_spill] sm:$0xff] }
 0x20c   :  { %v7247_v8 = vsel %vm5220_vm12, 4294967295, %v7246_v8  ;;  %vm1162_vm6 = vmand %vm7248_vm3, %vm3456_vm14  ;;  %vm7261_vm3 = vcmp.eq.s32.totalorder %v3231_v5, %v3210_v61  ;;  %v5289_v50 = vmax.f32 %v1323_v37, %v1324_v42  ;;  %vm7265_vm2 = vcmp.eq.s32.totalorder %v3231_v5, %v3213_v62  ;;  %v7268_v37 = vld [vmem:[#allocation58_spill] sm:$0xff] }
 0x20d   :  { %vm7250_vm7 = vmand %vm7249_vm4, %vm3456_vm14  ;;  %v1354_v53 = vsel %vm1162_vm6, %v885_v17, -1e+30  ;;  %vm7264_vm6 = vcmp.eq.s32.totalorder %v4837_v48, %v3213_v62  ;;  %v7270_v5 = vmov 0  ;;  %v7281_v42 = vld [vmem:[#allocation66_spill] sm:$0xff] }
 0x20e   :  { %v5239_v38 = vsel %vm7250_vm7, %v855_v3, 1e+30  ;;  %vm5255_vm9 = vmxor %vm7255_vm8, %vm6911_vm15  ;;  %v5285_v26 = vmax.f32 %v1353_v13, %v1354_v53  ;;  %v7276_v13 = vld [vmem:[#allocation25_spill] sm:$0xff]  ;;  %v7287_v53 = vld [vmem:[#allocation52_spill] sm:$0xff] }
 0x20f   :  { %v7257_v49 = vsel %vm5255_vm9, 4294967295, %v7256_v49  ;;  %vm5263_vm11 = vmxor %vm7258_vm10, %vm6911_vm15  ;;  %vm7269_vm10 = vcmp.eq.s32.totalorder %v7268_v37, %v3210_v61  ;;  %v7339_v3 = vld [vmem:[#allocation74_spill] sm:$0xff] }
 0x210   :  { %vm5277_vm4 = vmxor %vm7261_vm3, %vm6911_vm15 }
 0x211   :  { %v7263_v31 = vsel %vm5277_vm4, 4294967295, %v7262_v31  ;;  %vm1226_vm7 = vmxor %vm7264_vm6, %vm6911_vm15 }
 0x212   :  { %vm5297_vm0 = vmxor %vm7265_vm2, %vm6911_vm15 }
 0x213   :  { %v7267_v28 = vsel %vm5297_vm0, 4294967295, %v7266_v28  ;;  %vm1289_vm8 = vmand %vm5263_vm11, %vm3384_vm13  ;;  %vm7272_vm11 = vcmp.eq.s32.totalorder %v7268_v37, %v3213_v62  ;;  %v7289_v37 = vmov 0 }
 0x214   :  { %vm5313_vm3 = vmxor %vm7269_vm10, %vm6911_vm15  ;;  %v5320_v23 = vsel %vm1289_vm8, %v5034_v57, 1e+30  ;;  %vm7275_vm10 = vnez %v7203_v14  ;;  %v7278_v57 = vmov 0 }
 0x215   :  { %v7271_v5 = vsel %vm5313_vm3, 4294967295, %v7270_v5  ;;  %vm1290_vm6 = vmand %vm1226_vm7, %vm3456_vm14  ;;  %vm7277_vm7 = vcmp.eq.s32.totalorder %v7276_v13, %v3210_v61 }
 0x216   :  { %vm5326_vm2 = vmxor %vm7272_vm11, %vm6911_vm15  ;;  %v5334_v44 = vsel %vm1290_vm6, %v885_v17, 1e+30  ;;  %vm7280_vm11 = vnez %v7212_v27  ;;  %vm6749_vm6 = vcmask 7168   ;;  %v7283_v17 = vmov 0 }
 0x217   :  { %v7274_v55 = vsel %vm5326_vm2, 4294967295, %v7273_v55  ;;  %vm1229_vm0 = vmand %vm7275_vm10, %vm3384_vm13  ;;  %vm7282_vm10 = vcmp.eq.s32.totalorder %v7276_v13, %v3213_v62  ;;  %v2994_v27 = vmov -1e+30  }
 0x218   :  { %vm5340_vm8 = vmxor %vm7277_vm7, %vm6911_vm15  ;;  %v5349_v9 = vsel %vm1229_vm0, %v7281_v42, 1e+30  ;;  %vm7286_vm0 = vnez %v7221_v16  ;;  %123 = vst.msk [vmem:[#allocation2 + $0x80] sm:$0xff] %vm6749_vm6, %v2994_v27  ;;  %v7292_v42 = vld [vmem:[#allocation67_spill] sm:$0xff]  ;;  %v7395_v16 = vld [vmem:[#allocation28_spill] sm:$0xff] }
 0x219   :  { %v7279_v57 = vsel %vm5340_vm8, 4294967295, %v7278_v57  ;;  %vm1230_vm2 = vmand %vm7280_vm11, %vm3456_vm14  ;;  %107 = vst.msk [vmem:[#allocation2] sm:$0xff] %vm6749_vm6, %v2994_v27  ;;  %vm7291_vm11 = vnez %v7229_v47  ;;  %v7335_v47 = vld [vmem:[#allocation72_spill] sm:$0xff] }
 0x21a   :  { %vm5357_vm7 = vmxor %vm7282_vm10, %vm6911_vm15  ;;  %v5362_v22 = vsel %vm1230_vm2, %v7285_v25, 1e+30  ;;  %108 = vst.msk [vmem:[#allocation2 + $0x8] sm:$0xff] %vm6749_vm6, %v2994_v27  ;;  %vm7288_vm2 = vcmp.eq.s32.totalorder %v7287_v53, %v3210_v61 }
 0x21b   :  { %v7284_v17 = vsel %vm5357_vm7, 4294967295, %v7283_v17  ;;  %109 = vst.msk [vmem:[#allocation2 + $0x10] sm:$0xff] %vm6749_vm6, %v2994_v27  ;;  %110 = vst.msk [vmem:[#allocation2 + $0x18] sm:$0xff] %vm6749_vm6, %v2994_v27  ;;  %v1646_v13 = vmin.f32 %v5349_v9, %v5362_v22  ;;  %v7328_v9 = vld [vmem:[#allocation70_spill] sm:$0xff] }
 0x21c   :  { %111 = vst.msk [vmem:[#allocation2 + $0x20] sm:$0xff] %vm6749_vm6, %v2994_v27  ;;  %112 = vst.msk [vmem:[#allocation2 + $0x28] sm:$0xff] %vm6749_vm6, %v2994_v27 }
 0x21d   :  { %113 = vst.msk [vmem:[#allocation2 + $0x30] sm:$0xff] %vm6749_vm6, %v2994_v27  ;;  %114 = vst.msk [vmem:[#allocation2 + $0x38] sm:$0xff] %vm6749_vm6, %v2994_v27  ;;  %1647 = vmin.xlane.f32.xlu1 %v1646_v13  ;;  %v7439_v13 = vld [vmem:[#allocation31_spill] sm:$0xff] }
 0x21e   :  { %115 = vst.msk [vmem:[#allocation2 + $0x40] sm:$0xff] %vm6749_vm6, %v2994_v27  ;;  %116 = vst.msk [vmem:[#allocation2 + $0x48] sm:$0xff] %vm6749_vm6, %v2994_v27 }
 0x21f   :  { %117 = vst.msk [vmem:[#allocation2 + $0x50] sm:$0xff] %vm6749_vm6, %v2994_v27  ;;  %118 = vst.msk [vmem:[#allocation2 + $0x58] sm:$0xff] %vm6749_vm6, %v2994_v27 }
 0x220   :  { %119 = vst.msk [vmem:[#allocation2 + $0x60] sm:$0xff] %vm6749_vm6, %v2994_v27  ;;  %120 = vst.msk [vmem:[#allocation2 + $0x68] sm:$0xff] %vm6749_vm6, %v2994_v27 }
 0x221   :  { %121 = vst.msk [vmem:[#allocation2 + $0x70] sm:$0xff] %vm6749_vm6, %v2994_v27  ;;  %122 = vst.msk [vmem:[#allocation2 + $0x78] sm:$0xff] %vm6749_vm6, %v2994_v27 }
 0x222   :  { %124 = vst.msk [vmem:[#allocation2 + $0x88] sm:$0xff] %vm6749_vm6, %v2994_v27  ;;  %125 = vst.msk [vmem:[#allocation2 + $0x90] sm:$0xff] %vm6749_vm6, %v2994_v27 }
 0x223   :  { %126 = vst.msk [vmem:[#allocation2 + $0x98] sm:$0xff] %vm6749_vm6, %v2994_v27  ;;  %127 = vst.msk [vmem:[#allocation2 + $0xa0] sm:$0xff] %vm6749_vm6, %v2994_v27 }
 0x224   :  { %128 = vst.msk [vmem:[#allocation2 + $0xa8] sm:$0xff] %vm6749_vm6, %v2994_v27  ;;  %129 = vst.msk [vmem:[#allocation2 + $0xb0] sm:$0xff] %vm6749_vm6, %v2994_v27 }
 0x225   :  { %130 = vst.msk [vmem:[#allocation2 + $0xb8] sm:$0xff] %vm6749_vm6, %v2994_v27  ;;  %131 = vst.msk [vmem:[#allocation2 + $0xc0] sm:$0xff] %vm6749_vm6, %v2994_v27 }
 0x226   :  { %132 = vst.msk [vmem:[#allocation2 + $0xc8] sm:$0xff] %vm6749_vm6, %v2994_v27  ;;  %133 = vst.msk [vmem:[#allocation2 + $0xd0] sm:$0xff] %vm6749_vm6, %v2994_v27 }
 0x227   :  { %134 = vst.msk [vmem:[#allocation2 + $0xd8] sm:$0xff] %vm6749_vm6, %v2994_v27  ;;  %135 = vst.msk [vmem:[#allocation2 + $0xe0] sm:$0xff] %vm6749_vm6, %v2994_v27 }
 0x228   :  { %136 = vst.msk [vmem:[#allocation2 + $0xe8] sm:$0xff] %vm6749_vm6, %v2994_v27  ;;  %137 = vst.msk [vmem:[#allocation2 + $0xf0] sm:$0xff] %vm6749_vm6, %v2994_v27 }
 0x229   :  { %138 = vst.msk [vmem:[#allocation2 + $0xf8] sm:$0xff] %vm6749_vm6, %v2994_v27  ;;  %vm5404_vm10 = vmxor %vm7288_vm2, %vm6911_vm15  ;;  %v2995_v27 = vmov 1e+30   ;;  %vm7294_vm2 = vcmask 7168  }
 0x22a   :  { %v7290_v37 = vsel %vm5404_vm10, 4294967295, %v7289_v37  ;;  %vm7293_vm6 = vmand %vm7286_vm0, %vm3384_vm13  ;;  %139 = vst.msk [vmem:[#allocation3] sm:$0xff] %vm7294_vm2, %v2995_v27 }
 0x22b   :  { %v1389_v25 = vsel %vm7293_vm6, %v7292_v42, 1e+30  ;;  %vm7295_vm8 = vmmov %vm7294_vm2  ;;  %v7330_v42 = vld [vmem:[#allocation27_spill] sm:$0xff] }
 0x22c   :  { %140 = vst.msk [vmem:[#allocation3 + $0x8] sm:$0xff] %vm7295_vm8, %v2995_v27  ;;  %vm7296_vm10 = vmmov %vm7294_vm2 }
 0x22d   :  { %141 = vst.msk [vmem:[#allocation3 + $0x10] sm:$0xff] %vm7296_vm10, %v2995_v27  ;;  %vm7297_vm3 = vmmov %vm7294_vm2 }
 0x22e   :  { %142 = vst.msk [vmem:[#allocation3 + $0x18] sm:$0xff] %vm7297_vm3, %v2995_v27  ;;  %vm7298_vm4 = vmmov %vm7294_vm2 }
 0x22f   :  { %143 = vst.msk [vmem:[#allocation3 + $0x20] sm:$0xff] %vm7298_vm4, %v2995_v27  ;;  %vm7299_vm9 = vmmov %vm7294_vm2 }
 0x230   :  { %144 = vst.msk [vmem:[#allocation3 + $0x28] sm:$0xff] %vm7299_vm9, %v2995_v27  ;;  %vm7300_vm7 = vmmov %vm7294_vm2 }
 0x231   :  { %145 = vst.msk [vmem:[#allocation3 + $0x30] sm:$0xff] %vm7300_vm7, %v2995_v27  ;;  %vm7301_vm12 = vmmov %vm7294_vm2 }
 0x232   :  { %146 = vst.msk [vmem:[#allocation3 + $0x38] sm:$0xff] %vm7301_vm12, %v2995_v27  ;;  %vm7302_vm5 = vmmov %vm7294_vm2 }
 0x233   :  { %147 = vst.msk [vmem:[#allocation3 + $0x40] sm:$0xff] %vm7302_vm5, %v2995_v27  ;;  %vm7303_vm6 = vmmov %vm7294_vm2 }
 0x234   :  { %148 = vst.msk [vmem:[#allocation3 + $0x48] sm:$0xff] %vm7303_vm6, %v2995_v27  ;;  %vm7304_vm0 = vmmov %vm7294_vm2 }
 0x235   :  { %149 = vst.msk [vmem:[#allocation3 + $0x50] sm:$0xff] %vm7304_vm0, %v2995_v27  ;;  %vm7305_vm2 = vmmov %vm7304_vm0 }
 0x236   :  { %150 = vst.msk [vmem:[#allocation3 + $0x58] sm:$0xff] %vm7305_vm2, %v2995_v27  ;;  %vm7306_vm8 = vmmov %vm7304_vm0 }
 0x237   :  { %151 = vst.msk [vmem:[#allocation3 + $0x60] sm:$0xff] %vm7306_vm8, %v2995_v27  ;;  %vm7307_vm10 = vmmov %vm7304_vm0 }
 0x238   :  { %152 = vst.msk [vmem:[#allocation3 + $0x68] sm:$0xff] %vm7307_vm10, %v2995_v27  ;;  %vm7308_vm3 = vmmov %vm7304_vm0 }
 0x239   :  { %153 = vst.msk [vmem:[#allocation3 + $0x70] sm:$0xff] %vm7308_vm3, %v2995_v27  ;;  %vm7309_vm4 = vmmov %vm7304_vm0 }
 0x23a   :  { %154 = vst.msk [vmem:[#allocation3 + $0x78] sm:$0xff] %vm7309_vm4, %v2995_v27  ;;  %vm7310_vm9 = vmmov %vm7304_vm0 }
 0x23b   :  { %155 = vst.msk [vmem:[#allocation3 + $0x80] sm:$0xff] %vm7310_vm9, %v2995_v27  ;;  %vm7311_vm7 = vmmov %vm7304_vm0 }
 0x23c   :  { %156 = vst.msk [vmem:[#allocation3 + $0x88] sm:$0xff] %vm7311_vm7, %v2995_v27  ;;  %vm7312_vm12 = vmmov %vm7304_vm0 }
 0x23d   :  { %157 = vst.msk [vmem:[#allocation3 + $0x90] sm:$0xff] %vm7312_vm12, %v2995_v27  ;;  %vm7313_vm5 = vmmov %vm7304_vm0 }
 0x23e   :  { %158 = vst.msk [vmem:[#allocation3 + $0x98] sm:$0xff] %vm7313_vm5, %v2995_v27  ;;  %vm7314_vm6 = vmmov %vm7304_vm0 }
 0x23f   :  { %159 = vst.msk [vmem:[#allocation3 + $0xa0] sm:$0xff] %vm7314_vm6, %v2995_v27  ;;  %vm7315_vm2 = vmmov %vm7304_vm0 }
 0x240   :  { %160 = vst.msk [vmem:[#allocation3 + $0xa8] sm:$0xff] %vm7304_vm0, %v2995_v27  ;;  %vm7316_vm8 = vmmov %vm7304_vm0 }
 0x241   :  { %161 = vst.msk [vmem:[#allocation3 + $0xb0] sm:$0xff] %vm7315_vm2, %v2995_v27  ;;  %vm7317_vm10 = vmmov %vm7304_vm0 }
 0x242   :  { %162 = vst.msk [vmem:[#allocation3 + $0xb8] sm:$0xff] %vm7316_vm8, %v2995_v27  ;;  %vm7318_vm3 = vmmov %vm7304_vm0  ;;  %v1630_v24 = vld [vmem:[#allocation3 + $0x80] sm:$0xff] }
 0x243   :  { %163 = vst.msk [vmem:[#allocation3 + $0xc0] sm:$0xff] %vm7317_vm10, %v2995_v27  ;;  %vm7319_vm4 = vmmov %vm7304_vm0 }
 0x244   :  { %164 = vst.msk [vmem:[#allocation3 + $0xc8] sm:$0xff] %vm7318_vm3, %v2995_v27  ;;  %vm7320_vm9 = vmmov %vm7304_vm0  ;;  %vm7331_vm3 = vcmp.eq.s32.totalorder %v7330_v42, %v3210_v61 }
 0x245   :  { %165 = vst.msk [vmem:[#allocation3 + $0xd0] sm:$0xff] %vm7319_vm4, %v2995_v27  ;;  %vm7321_vm7 = vmmov %vm7304_vm0 }
 0x246   :  { %166 = vst.msk [vmem:[#allocation3 + $0xd8] sm:$0xff] %vm7320_vm9, %v2995_v27  ;;  %vm7322_vm12 = vmmov %vm7304_vm0 }
 0x247   :  { %167 = vst.msk [vmem:[#allocation3 + $0xe0] sm:$0xff] %vm7321_vm7, %v2995_v27  ;;  %vm7323_vm5 = vmmov %vm7304_vm0 }
 0x248   :  { %168 = vst.msk [vmem:[#allocation3 + $0xe8] sm:$0xff] %vm7322_vm12, %v2995_v27  ;;  %vm7324_vm6 = vmmov %vm7304_vm0  ;;  %vm7325_vm0 = vcmp.eq.s32.totalorder %v7287_v53, %v3213_v62  ;;  %vm7340_vm12 = vnez %v7247_v8  ;;  %v7401_v53 = vld [vmem:[#allocation89_spill] sm:$0xff]  ;;  %v7415_v8 = vld [vmem:[#allocation91_spill] sm:$0xff] }
 0x249   :  { %169 = vst.msk [vmem:[#allocation3 + $0xf0] sm:$0xff] %vm7323_vm5, %v2995_v27  ;;  %vm5456_vm2 = vmxor %vm7325_vm0, %vm6911_vm15 }
 0x24a   :  { %170 = vst.msk [vmem:[#allocation3 + $0xf8] sm:$0xff] %vm7324_vm6, %v2995_v27  ;;  %vm7329_vm8 = vmand %vm7291_vm11, %vm3456_vm14  ;;  %vm7334_vm11 = vnez %v7241_v18  ;;  %v7341_v18 = vld [vmem:[#allocation71_spill] sm:$0xff] }
 0x24b   :  { %v1390_v22 = vsel %vm7329_vm8, %v7328_v9, 1e+30  ;;  %vm1231_vm10 = vmand %vm5170_vm1, %vm3384_vm13  ;;  %vm7336_vm1 = vcmp.eq.s32.totalorder %v7330_v42, %v3213_v62  ;;  %vm7342_vm6 = vcmp.eq.s32.totalorder %v7341_v18, %v3210_v61  ;;  %vm7345_vm8 = vnez %v7257_v49  ;;  %v7350_v42 = vld [vmem:[#allocation75_spill] sm:$0xff]  ;;  %v7352_v49 = vld [vmem:[#allocation26_spill] sm:$0xff] }
 0x24c   :  { %vm5474_vm4 = vmxor %vm7331_vm3, %vm6911_vm15  ;;  %v1694_v27 = vmin.f32 %v1389_v25, %v1390_v22  ;;  %v1359_v9 = vsel %vm1231_vm10, %v7335_v47, 1e+30  ;;  %vm7347_vm3 = vcmp.eq.s32.totalorder %v7341_v18, %v3213_v62  ;;  %v7357_v18 = vld [vmem:[#allocation77_spill] sm:$0xff] }
 0x24d   :  { %vm1232_vm9 = vmand %vm7334_vm11, %vm3456_vm14 }
 0x24e   :  { %vm5487_vm7 = vmxor %vm7336_vm1, %vm6911_vm15  ;;  %v1360_v48 = vsel %vm1232_vm9, %v7339_v3, 1e+30  ;;  %v7346_v3 = vld [vmem:[#allocation73_spill] sm:$0xff]  ;;  %vm7351_vm9 = vnez %v7263_v31  ;;  %1695 = vmin.xlane.f32.xlu1 %v1694_v27  ;;  %v7359_v31 = vmov 0  ;;  %v7365_v27 = vmov 0 }
 0x24f   :  { %vm1263_vm5 = vmand %vm7340_vm12, %vm3384_vm13  ;;  %v1649_v25 = vmin.f32 %v1359_v9, %v1360_v48  ;;  %vm7353_vm12 = vcmp.eq.s32.totalorder %v7352_v49, %v3210_v61 }
 0x250   :  { %vm5500_vm0 = vmxor %vm7342_vm6, %vm6911_vm15  ;;  %v1391_v22 = vsel %vm1263_vm5, %v7346_v3, 1e+30  ;;  %vm7356_vm6 = vnez %v7267_v28  ;;  %v7363_v28 = vld [vmem:[#allocation65_spill] sm:$0xff] }
 0x251   :  { %vm1264_vm10 = vmand %vm7345_vm8, %vm3456_vm14  ;;  %1650 = vmin.xlane.f32.xlu0 %v1649_v25 }
 0x252   :  { %vm5513_vm11 = vmxor %vm7347_vm3, %vm6911_vm15  ;;  %v1392_v47 = vsel %vm1264_vm10, %v7350_v42, 1e+30  ;;  %vm7358_vm10 = vcmp.eq.s32.totalorder %v7352_v49, %v3213_v62  ;;  %v7361_v42 = vld [vmem:[#allocation80_spill] sm:$0xff]  ;;  %v7372_v49 = vld [vmem:[#allocation79_spill] sm:$0xff] }
 0x253   :  { %vm1233_vm1 = vmand %vm7351_vm9, %vm3384_vm13  ;;  %v1697_v9 = vmin.f32 %v1391_v22, %v1392_v47  ;;  %vm7362_vm9 = vnez %v7271_v5  ;;  %v7368_v22 = vld [vmem:[#allocation78_spill] sm:$0xff]  ;;  %v7370_v5 = vmov 0 }
 0x254   :  { %vm5526_vm5 = vmxor %vm7353_vm12, %vm6911_vm15  ;;  %v1361_v3 = vsel %vm1233_vm1, %v7357_v18, 1e+30 }
 0x255   :  { %vm1234_vm8 = vmand %vm7356_vm6, %vm3456_vm14  ;;  %vm7364_vm6 = vcmp.eq.s32.totalorder %v7363_v28, %v3210_v61  ;;  %1698 = vmin.xlane.f32.xlu0 %v1697_v9 }
 0x256   :  { %vm5539_vm3 = vmxor %vm7358_vm10, %vm6911_vm15  ;;  %v1362_v14 = vsel %vm1234_vm8, %v7361_v42, 1e+30  ;;  %vm7367_vm10 = vnez %v7274_v55  ;;  %vm7369_vm8 = vcmp.eq.s32.totalorder %v7363_v28, %v3213_v62  ;;  %v7374_v55 = vld [vmem:[#allocation29_spill] sm:$0xff]  ;;  %v7380_v28 = vld [vmem:[#allocation83_spill] sm:$0xff] }
 0x257   :  { %v7360_v31 = vsel %vm5539_vm3, 4294967295, %v7359_v31  ;;  %vm1265_vm12 = vmand %vm7362_vm9, %vm3384_vm13  ;;  %v1652_v25 = vmin.f32 %v1361_v3, %v1362_v14  ;;  %v7376_v14 = vmov 0  ;;  %v7378_v3 = vld [vmem:[#allocation81_spill] sm:$0xff] }
 0x258   :  { %vm5552_vm1 = vmxor %vm7364_vm6, %vm6911_vm15  ;;  %v1393_v47 = vsel %vm1265_vm12, %v7368_v22, 1e+30  ;;  %vm7373_vm6 = vnez %v7279_v57  ;;  %1457 = vmax.xlane.f32.xlu1 %v7378_v3 }
 0x259   :  { %v7366_v27 = vsel %vm5552_vm1, 4294967295, %v7365_v27  ;;  %vm1266_vm3 = vmand %vm7367_vm10, %vm3456_vm14  ;;  %vm7375_vm10 = vcmp.eq.s32.totalorder %v7374_v55, %v3210_v61 }
 0x25a   :  { %vm5565_vm9 = vmxor %vm7369_vm8, %vm6911_vm15  ;;  %v1394_v18 = vsel %vm1266_vm3, %v7372_v49, 1e+30  ;;  %vm7379_vm3 = vnez %v7284_v17  ;;  %v7384_v49 = vld [vmem:[#allocation87_spill] sm:$0xff]  ;;  %v7386_v17 = vld [vmem:[#allocation82_spill] sm:$0xff] }
 0x25b   :  { %v7371_v5 = vsel %vm5565_vm9, 4294967295, %v7370_v5  ;;  %vm1235_vm1 = vmand %vm7373_vm6, %vm3384_vm13  ;;  %v1700_v42 = vmin.f32 %v1393_v47, %v1394_v18  ;;  %vm7381_vm6 = vcmp.eq.s32.totalorder %v7374_v55, %v3213_v62  ;;  %v7390_v55 = vld [vmem:[#allocation84_spill] sm:$0xff] }
 0x25c   :  { %vm5578_vm12 = vmxor %vm7375_vm10, %vm6911_vm15  ;;  %v1363_v57 = vsel %vm1235_vm1, %v7380_v28, 1e+30  ;;  %vm7385_vm10 = vnez %v7290_v37  ;;  %v7394_v28 = vld [vmem:[#allocation86_spill] sm:$0xff]  ;;  %v7430_v37 = vld [vmem:[#allocation107_spill] sm:$0xff] }
 0x25d   :  { %v7377_v14 = vsel %vm5578_vm12, 4294967295, %v7376_v14  ;;  %vm1236_vm8 = vmand %vm7379_vm3, %vm3456_vm14  ;;  %vm7387_vm3 = vcmp.eq.s32.totalorder %v7386_v17, %v3210_v61 }
 0x25e   :  { %vm5592_vm9 = vmxor %vm7381_vm6, %vm6911_vm15  ;;  %v1364_v9 = vsel %vm1236_vm8, %v7384_v49, 1e+30  ;;  %vm7391_vm8 = vcmp.eq.s32.totalorder %v7386_v17, %v3213_v62  ;;  %v7400_v17 = vld [vmem:[#allocation88_spill] sm:$0xff] }
 0x25f   :  { %vm1267_vm12 = vmand %vm7385_vm10, %vm3384_vm13  ;;  %v1655_v18 = vmin.f32 %v1363_v57, %v1364_v9  ;;  %v7399_v9 = vld [vmem:[#allocation85_spill] sm:$0xff]  ;;  %1460 = vmax.xlane.f32.xlu0 %v7400_v17 }
 0x260   :  { %vm5605_vm1 = vmxor %vm7387_vm3, %vm6911_vm15  ;;  %v1395_v3 = vsel %vm1267_vm12, %v7390_v55, 1e+30  ;;  %1508 = vmax.xlane.f32.xlu1 %v7399_v9 }
 0x261   :  { %vm1268_vm6 = vmand %vm5456_vm2, %vm3456_vm14  ;;  %vm7396_vm2 = vcmp.eq.s32.totalorder %v7395_v16, %v3210_v61 }
 0x262   :  { %vm5618_vm10 = vmxor %vm7391_vm8, %vm6911_vm15  ;;  %v1396_v49 = vsel %vm1268_vm6, %v7394_v28, 1e+30 }
 0x263   :  { %vm1237_vm3 = vmand %vm5474_vm4, %vm3384_vm13  ;;  %v1703_v55 = vmin.f32 %v1395_v3, %v1396_v49  ;;  %vm7402_vm4 = vcmp.eq.s32.totalorder %v7395_v16, %v3213_v62  ;;  %1463 = vmax.xlane.f32.xlu0 %v7415_v8  ;;  %v7426_v8 = vld [vmem:[#allocation105_spill] sm:$0xff] }
 0x264   :  { %vm5631_vm12 = vmxor %vm7396_vm2, %vm6911_vm15  ;;  %v1365_v28 = vsel %vm1237_vm3, %v7401_v53, 1e+30  ;;  %1653 = vmin.xlane.f32.xlu1 %v1652_v25  ;;  %v7421_v25 = vld [vmem:[#allocation96_spill] sm:$0xff]  ;;  %v7437_v3 = vld [vmem:[#allocation109_spill] sm:$0xff] }
 0x265   :  { %vm1238_vm6 = vmand %vm5487_vm7, %vm3456_vm14  ;;  %vm7407_vm7 = vcmp.eq.s32.totalorder %v7406_v10, %v3210_v61  ;;  %v7414_v61 = vld [vmem:[#allocation92_spill] sm:$0xff] }
 0x266   :  { %vm5646_vm8 = vmxor %vm7402_vm4, %vm6911_vm15  ;;  %v1366_v9 = vsel %vm1238_vm6, %v7405_v41, 1e+30  ;;  %v7410_v41 = vld [vmem:[#allocation90_spill] sm:$0xff] }
 0x267   :  { %vm1269_vm2 = vmand %vm5500_vm0, %vm3384_vm13  ;;  %v1658_v49 = vmin.f32 %v1365_v28, %v1366_v9  ;;  %vm7411_vm0 = vcmp.eq.s32.totalorder %v7406_v10, %v3213_v62  ;;  %v7417_v62 = vld [vmem:[#allocation95_spill] sm:$0xff] }
 0x268   :  { %vm5659_vm3 = vmxor %vm7407_vm7, %vm6911_vm15  ;;  %v1397_v16 = vsel %vm1269_vm2, %v7410_v41, 1e+30  ;;  %v7418_v9 = vld [vmem:[#allocation99_spill] sm:$0xff]  ;;  %1701 = vmin.xlane.f32.xlu1 %v1700_v42  ;;  %v7427_v42 = vld [vmem:[#allocation102_spill] sm:$0xff] }
 0x269   :  { %vm1270_vm4 = vmand %vm5513_vm11, %vm3456_vm14  ;;  %vm7416_vm11 = vnez %v7360_v31 }
 0x26a   :  { %vm5672_vm6 = vmxor %vm7411_vm0, %vm6911_vm15  ;;  %v1398_v17 = vsel %vm1270_vm4, %v7414_v61, 1e+30  ;;  %vm7419_vm15 = vnez %v7366_v27  ;;  %v7424_v61 = vld [vmem:[#allocation94_spill] sm:$0xff] }
 0x26b   :  { %vm1239_vm7 = vmand %vm5526_vm5, %vm3384_vm13  ;;  %v1706_v53 = vmin.f32 %v1397_v16, %v1398_v17  ;;  %vm7420_vm5 = vnez %v7371_v5  ;;  %v7422_v16 = vld [vmem:[#allocation98_spill] sm:$0xff]  ;;  %1511 = vmax.xlane.f32.xlu0 %v7424_v61  ;;  %v7425_v5 = vld [vmem:[#allocation101_spill] sm:$0xff] }
 0x26c   :  { %vm1240_vm2 = vmand %vm7416_vm11, %vm3456_vm14  ;;  %v1367_v28 = vsel %vm1239_vm7, %v7417_v62, 1e+30  ;;  %vm7423_vm7 = vnez %v7377_v14  ;;  %v7433_v61 = vld [vmem:[#allocation110_spill] sm:$0xff] }
 0x26d   :  { %v1368_v10 = vsel %vm1240_vm2, %v7418_v9, 1e+30  ;;  %vm1271_vm4 = vmand %vm7419_vm15, %vm3384_vm13  ;;  %v7428_v9 = vld [vmem:[#allocation104_spill] sm:$0xff] }
 0x26e   :  { %v1661_v48 = vmin.f32 %v1367_v28, %v1368_v10  ;;  %vm1272_vm0 = vmand %vm7420_vm5, %vm3456_vm14  ;;  %v1399_v41 = vsel %vm1271_vm4, %v7421_v25, 1e+30  ;;  %v7429_v10 = vld [vmem:[#allocation97_spill] sm:$0xff] }
 0x26f   :  { %v1400_v31 = vsel %vm1272_vm0, %v7422_v16, 1e+30  ;;  %vm1241_vm11 = vmand %vm7423_vm7, %vm3384_vm13  ;;  %1656 = vmin.xlane.f32.xlu0 %v1655_v18  ;;  %1466 = vmax.xlane.f32.xlu1 %v7429_v10  ;;  %v7432_v18 = vld [vmem:[#allocation108_spill] sm:$0xff]  ;;  %v7450_v10 = vld [vmem:[#allocation33_spill] sm:$0xff] }
 0x270   :  { %v1709_v27 = vmin.f32 %v1399_v41, %v1400_v31  ;;  %vm1242_vm2 = vmand %vm5592_vm9, %vm3456_vm14  ;;  %v1369_v17 = vsel %vm1241_vm11, %v7425_v5, 1e+30  ;;  %v7431_v41 = vld [vmem:[#allocation34_spill] sm:$0xff]  ;;  %v7434_v5 = vld [vmem:[#allocation100_spill] sm:$0xff] }
 0x271   :  { %v1370_v62 = vsel %vm1242_vm2, %v7426_v8, 1e+30  ;;  %vm1273_vm15 = vmand %vm5605_vm1, %vm3384_vm13  ;;  %v7435_v8 = vld [vmem:[#allocation103_spill] sm:$0xff] }
 0x272   :  { %v1664_v14 = vmin.f32 %v1369_v17, %v1370_v62  ;;  %vm1274_vm4 = vmand %vm5618_vm10, %vm3456_vm14  ;;  %v1401_v28 = vsel %vm1273_vm15, %v7427_v42, 1e+30  ;;  %v7441_v62 = vld [vmem:[#allocation53_spill] sm:$0xff]  ;;  %v7444_v42 = vld [vmem:[#allocation56_spill] sm:$0xff] }
 0x273   :  { %v1402_v22 = vsel %vm1274_vm4, %v7428_v9, 1e+30  ;;  %vm1243_vm9 = vmand %vm5631_vm12, %vm3384_vm13  ;;  %1704 = vmin.xlane.f32.xlu0 %v1703_v55  ;;  %1514 = vmax.xlane.f32.xlu1 %v7434_v5  ;;  %v7440_v55 = vld [vmem:[#allocation37_spill] sm:$0xff]  ;;  %v7447_v9 = vld [vmem:[#allocation38_spill] sm:$0xff] }
 0x274   :  { %v1712_v47 = vmin.f32 %v1401_v28, %v1402_v22  ;;  %vm1244_vm1 = vmand %vm5646_vm8, %vm3456_vm14  ;;  %v1371_v25 = vsel %vm1243_vm9, %v7430_v37, 1e+30  ;;  %v7446_v28 = vld [vmem:[#allocation36_spill] sm:$0xff]  ;;  %v1503_v37 = vpop.xlane.xlu1 %1502 }
 0x275   :  { %v1372_v16 = vsel %vm1244_vm1, %v7431_v41, 1e+30  ;;  %vm1275_vm10 = vmand %vm5659_vm3, %vm3384_vm13  ;;  %v1455_v41 = vpop.xlane.xlu0 %1454 }
 0x276   :  { %v1667_v57 = vmin.f32 %v1371_v25, %v1372_v16  ;;  %vm1276_vm12 = vmand %vm5672_vm6, %vm3456_vm14  ;;  %v1403_v31 = vsel %vm1275_vm10, %v7432_v18, 1e+30  ;;  %v7452_v18 = vld [vmem:[#allocation54_spill] sm:$0xff]  ;;  %vm7455_vm14 = vcmask 7168  }
 0x277   :  { %v1404_v1 = vsel %vm1276_vm12, %v7433_v61, 1e+30  ;;  %1659 = vmin.xlane.f32.xlu1 %v1658_v49  ;;  %1469 = vmax.xlane.f32.xlu0 %v7435_v8  ;;  %v7442_v49 = vld [vmem:[#allocation41_spill] sm:$0xff]  ;;  %vm7456_vm13 = vmmov %vm7455_vm14  ;;  %v7457_v8 = vmin.f32 %v4490_v33, %v4499_v52  ;;  %v7463_v33 = vmin.f32 %v4739_v0, %v4809_v46  ;;  %v7464_v52 = vld [vmem:[#allocation32_spill] sm:$0xff]  ;;  %v7470_v0 = vmin.f32 %v5320_v23, %v5334_v44 }
 0x278   :  { %v1715_v17 = vmin.f32 %v1403_v31, %v1404_v1  ;;  %v7454_v61 = vld [vmem:[#allocation57_spill] sm:$0xff]  ;;  %vm7458_vm8 = vmmov %vm7456_vm13  ;;  %v7472_v46 = vmin.f32 %v5208_v7, %v5212_v39 }
 0x279   :  { %v1438_v1 = vld [vmem:[#allocation2 + $0x88] sm:$0xff]  ;;  %v1506_v5 = vpop.xlane.xlu0 %1505  ;;  %vm7473_vm3 = vmmov %vm7458_vm8 }
 0x27a   :  { %v1631_v7 = vld [vmem:[#allocation3 + $0x88] sm:$0xff]  ;;  %vm7474_vm6 = vmmov %vm7473_vm3 }
 0x27b   :  { %1707 = vmin.xlane.f32.xlu1 %v1706_v53  ;;  %1517 = vmax.xlane.f32.xlu0 %v7436_v56  ;;  %v7443_v53 = vld [vmem:[#allocation55_spill] sm:$0xff]  ;;  %v7459_v56 = vld [vmem:[#allocation60_spill] sm:$0xff]  ;;  %v1422_v39 = vld [vmem:[#allocation2 + $0x8] sm:$0xff] }
 0x27c   :  { %vm7475_vm5 = vmmov %vm7473_vm3 }
 0x27d   :  { %vm7476_vm0 = vmmov %vm7473_vm3 }
 0x27e   :  { %vm7477_vm7 = vmmov %vm7476_vm0 }
 0x27f   :  { %1662 = vmin.xlane.f32.xlu0 %v1661_v48  ;;  %1472 = vmax.xlane.f32.xlu1 %v7437_v3  ;;  %v7445_v48 = vmin.f32 %v7443_v53, %v7444_v42  ;;  %v7460_v3 = vld [vmem:[#allocation61_spill] sm:$0xff]  ;;  %vm7478_vm11 = vmmov %vm7476_vm0 }
 0x280   :  { %vm7479_vm2 = vmmov %vm7476_vm0 }
 0x281   :  { %vm7480_vm10 = vmmov %vm7476_vm0 }
 0x282   :  { %vm7481_vm12 = vmmov %vm7476_vm0 }
 0x283   :  { %1710 = vmin.xlane.f32.xlu0 %v1709_v27  ;;  %1520 = vmax.xlane.f32.xlu1 %v7438_v30  ;;  %v1437_v27 = vld [vmem:[#allocation2 + $0x80] sm:$0xff]  ;;  %v7461_v30 = vmin.f32 %v7459_v56, %v7460_v3 }
 0x284   :  { %v1565_v25 = vmax.f32 %v1437_v27, %v1503_v37 }
 0x286   :  { %1598 = vst.msk [vmem:[#allocation2 + $0x80] sm:$0xff] %vm7455_vm14, %v1565_v25  ;;  %v1616_v25 = vld [vmem:[#allocation3 + $0x10] sm:$0xff] }
 0x287   :  { %1665 = vmin.xlane.f32.xlu1 %v1664_v14  ;;  %1475 = vmax.xlane.f32.xlu0 %v7439_v13  ;;  %v7448_v14 = vld [vmem:[#allocation35_spill] sm:$0xff]  ;;  %v7462_v13 = vmin.f32 %v4731_v36, %v4754_v20  ;;  %v7469_v36 = vmin.f32 %v5052_v34, %v5162_v21  ;;  %v7471_v20 = vmin.f32 %v5185_v35, %v5239_v38 }
 0x288   :  { %v7449_v22 = vmin.f32 %v7447_v9, %v7448_v14 }
 0x28b   :  { %1713 = vmin.xlane.f32.xlu1 %v1712_v47  ;;  %1523 = vmax.xlane.f32.xlu0 %v7440_v55  ;;  %v1421_v47 = vld [vmem:[#allocation2] sm:$0xff]  ;;  %v7466_v55 = vld [vmem:[#allocation39_spill] sm:$0xff] }
 0x28c   :  { %v1549_v16 = vmax.f32 %v1421_v47, %v1455_v41 }
 0x28d   :  { %v1825_v54 = vld [vmem:[#allocation2 + $0x80] sm:$0xff] }
 0x28e   :  { %1582 = vst.msk [vmem:[#allocation2] sm:$0xff] %vm7456_vm13, %v1549_v16  ;;  %v1424_v16 = vld [vmem:[#allocation2 + $0x18] sm:$0xff] }
 0x28f   :  { %1668 = vmin.xlane.f32.xlu0 %v1667_v57  ;;  %1478 = vmax.xlane.f32.xlu1 %v7441_v62  ;;  %v7451_v57 = vld [vmem:[#allocation30_spill] sm:$0xff] }
 0x290   :  { %v7453_v31 = vmin.f32 %v7451_v57, %v7452_v18 }
 0x293   :  { %1716 = vmin.xlane.f32.xlu0 %v1715_v17  ;;  %1526 = vmax.xlane.f32.xlu1 %v7442_v49  ;;  %v1566_v17 = vmax.f32 %v1438_v1, %v1506_v5 }
 0x295   :  { %1599 = vst.msk [vmem:[#allocation2 + $0x88] sm:$0xff] %vm7458_vm8, %v1566_v17  ;;  %v1809_v32 = vld [vmem:[#allocation2] sm:$0xff] }
 0x296   :  { %v5816_v4 = vmax.f32 %v1809_v32, 1e-12 }
 0x297   :  { %1671 = vmin.xlane.f32.xlu1 %v7445_v48  ;;  %1481 = vmax.xlane.f32.xlu0 %v7446_v28 }
 0x298   :  { %vm1875_vm4 = vcmp.eq.f32.partialorder %v5816_v4, inf  ;;  %vm1877_vm14 = vcmp.eq.f32.partialorder %v5816_v4, 0.0 }
 0x29b   :  { %1719 = vmin.xlane.f32.xlu1 %v7449_v22  ;;  %1529 = vmax.xlane.f32.xlu0 %v7450_v10 }
 0x29c   :  { %v1826_v51 = vld [vmem:[#allocation2 + $0x88] sm:$0xff] }
 0x29d   :  { %v5818_v34 = vmax.f32 %v1826_v51, 1e-12 }
 0x29f   :  { %1674 = vmin.xlane.f32.xlu0 %v7453_v31  ;;  %1484 = vmax.xlane.f32.xlu1 %v7454_v61  ;;  %vm1994_vm1 = vcmp.eq.f32.partialorder %v5818_v34, inf  ;;  %vm1996_vm13 = vcmp.eq.f32.partialorder %v5818_v34, 0.0 }
 0x2a3   :  { %1722 = vmin.xlane.f32.xlu0 %v7457_v8  ;;  %1532 = vmax.xlane.f32.xlu1 %v4862_v59  ;;  %v7465_v59 = vld [vmem:[#allocation42_spill] sm:$0xff] }
 0x2a4   :  { %v7467_v62 = vmin.f32 %v7465_v59, %v7466_v55  ;;  %v1878_v59 = vand.u32 2147483648, %v5816_v4 }
 0x2a7   :  { %1677 = vmin.xlane.f32.xlu1 %v7461_v30  ;;  %1487 = vmax.xlane.f32.xlu0 %v4873_v63  ;;  %v7468_v63 = vmin.f32 %v4991_v15, %v5022_v6  ;;  %v5814_v15 = vmax.f32 %v1825_v54, 1e-12  ;;  %v1614_v6 = vld [vmem:[#allocation3] sm:$0xff]  ;;  %v1632_v30 = vld [vmem:[#allocation3 + $0x90] sm:$0xff] }
 0x2a9   :  { %2692 = vrsqrt.f32 %v5814_v15  ;;  %vm1987_vm15 = vcmp.eq.f32.partialorder %v5814_v15, inf  ;;  %vm1989_vm9 = vcmp.eq.f32.partialorder %v5814_v15, 0.0 }
 0x2aa   :  { %v1648_v60 = vpop.xlane.xlu1 %1647  ;;  %2694 = vrsqrt.f32 %v5816_v4 }
 0x2ab   :  { %1725 = vmin.xlane.f32.xlu1 %v7462_v13  ;;  %1535 = vmax.xlane.f32.xlu0 %v5062_v58  ;;  %v1742_v58 = vmin.f32 %v1614_v6, %v1648_v60  ;;  %2696 = vrsqrt.f32 %v5818_v34 }
 0x2ad   :  { %1774 = vst.msk [vmem:[#allocation3] sm:$0xff] %vm7473_vm3, %v1742_v58  ;;  %vm7482_vm3 = vmmov %vm7476_vm0 }
 0x2af   :  { %1680 = vmin.xlane.f32.xlu0 %v7463_v33  ;;  %1490 = vmax.xlane.f32.xlu1 %v7464_v52  ;;  %v1440_v33 = vld [vmem:[#allocation2 + $0x98] sm:$0xff]  ;;  %v1990_v52 = vand.u32 2147483648, %v5814_v15 }
 0x2b3   :  { %1728 = vmin.xlane.f32.xlu0 %v7467_v62  ;;  %1538 = vmax.xlane.f32.xlu1 %v5139_v40  ;;  %v1615_v40 = vld [vmem:[#allocation3 + $0x8] sm:$0xff]  ;;  %v2693_v23 = vpop.eup %2692  ;;  %v1997_v62 = vand.u32 2147483648, %v5818_v34 }
 0x2b4   :  { %v2695_v53 = vpop.eup %2694  ;;  %v1986_v10 = vmul.f32 %v2693_v23, %v5814_v15 }
 0x2b5   :  { %v2697_v42 = vpop.eup %2696  ;;  %v1874_v47 = vmul.f32 %v2695_v53, %v5816_v4 }
 0x2b6   :  { %v1993_v57 = vmul.f32 %v2697_v42, %v5818_v34  ;;  %v1988_v8 = vsel %vm1987_vm15, %v5814_v15, %v1986_v10 }
 0x2b7   :  { %1683 = vmin.xlane.f32.xlu1 %v1682_v12  ;;  %1493 = vmax.xlane.f32.xlu0 %v5189_v29  ;;  %v1876_v56 = vsel %vm1875_vm4, %v5816_v4, %v1874_v47 }
 0x2b8   :  { %v1995_v55 = vsel %vm1994_vm1, %v5818_v34, %v1993_v57  ;;  %vm7485_vm1 = vmmov %vm7479_vm2 }
 0x2b9   :  { %v5867_v60 = vsel %vm1996_vm13, %v1997_v62, %v1995_v55 }
 0x2bb   :  { %1731 = vmin.xlane.f32.xlu1 %v1730_v2  ;;  %1541 = vmax.xlane.f32.xlu0 %v5249_v45 }
 0x2bf   :  { %1686 = vmin.xlane.f32.xlu0 %v1685_v19  ;;  %1496 = vmax.xlane.f32.xlu1 %v5269_v11  ;;  %v2097_v11 = vld [vmem:[#allocation3] sm:$0xff] }
 0x2c3   :  { %1734 = vmin.xlane.f32.xlu0 %v7468_v63  ;;  %1544 = vmax.xlane.f32.xlu1 %v5285_v26  ;;  %v5826_v26 = vmax.f32 %v2097_v11, 1e-12  ;;  %v1617_v63 = vld [vmem:[#allocation3 + $0x18] sm:$0xff] }
 0x2c5   :  { %2698 = vrsqrt.f32 %v5826_v26  ;;  %vm2163_vm8 = vcmp.eq.f32.partialorder %v5826_v26, inf  ;;  %v2166_v15 = vand.u32 2147483648, %v5826_v26 }
 0x2c7   :  { %1689 = vmin.xlane.f32.xlu1 %v7469_v36  ;;  %1499 = vmax.xlane.f32.xlu0 %v5289_v50  ;;  %v1439_v50 = vld [vmem:[#allocation2 + $0x90] sm:$0xff]  ;;  %v1425_v36 = vld [vmem:[#allocation2 + $0x20] sm:$0xff] }
 0x2cb   :  { %1737 = vmin.xlane.f32.xlu1 %v7470_v0  ;;  %1547 = vmax.xlane.f32.xlu0 %v5291_v43  ;;  %v1423_v43 = vld [vmem:[#allocation2 + $0x10] sm:$0xff] }
 0x2cf   :  { %1692 = vmin.xlane.f32.xlu0 %v7471_v20  ;;  %v2699_v0 = vpop.eup %2698  ;;  %v5864_v20 = vsel %vm1989_vm9, %v1990_v52, %v1988_v8 }
 0x2d0   :  { %v2162_v4 = vmul.f32 %v2699_v0, %v5826_v26 }
 0x2d3   :  { %1740 = vmin.xlane.f32.xlu0 %v7472_v46  ;;  %v1879_v46 = vsel %vm1877_vm14, %v1878_v59, %v1876_v56 }
 0x2db   :  { %v1696_v12 = vpop.xlane.xlu1 %1695 }
 0x2dc   :  { %v1758_v35 = vmin.f32 %v1630_v24, %v1696_v12 }
 0x2de   :  { %v1651_v21 = vpop.xlane.xlu0 %1650  ;;  %1790 = vst.msk [vmem:[#allocation3 + $0x80] sm:$0xff] %vm7474_vm6, %v1758_v35  ;;  %vm7483_vm6 = vmmov %vm7476_vm0  ;;  %v2164_v35 = vsel %vm2163_vm8, %v5826_v26, %v2162_v4 }
 0x2df   :  { %v1743_v29 = vmin.f32 %v1615_v40, %v1651_v21  ;;  %vm7487_vm8 = vmmov %vm7485_vm1 }
 0x2e1   :  { %1775 = vst.msk [vmem:[#allocation3 + $0x8] sm:$0xff] %vm7475_vm5, %v1743_v29  ;;  %vm2165_vm5 = vcmp.eq.f32.partialorder %v5826_v26, 0.0  ;;  %v1633_v29 = vld [vmem:[#allocation3 + $0x98] sm:$0xff] }
 0x2e2   :  { %v1699_v2 = vpop.xlane.xlu0 %1698 }
 0x2e3   :  { %v1759_v45 = vmin.f32 %v1631_v7, %v1699_v2 }
 0x2e5   :  { %v1458_v38 = vpop.xlane.xlu1 %1457  ;;  %1791 = vst.msk [vmem:[#allocation3 + $0x88] sm:$0xff] %vm7476_vm0, %v1759_v45  ;;  %v2113_v48 = vld [vmem:[#allocation3 + $0x80] sm:$0xff] }
 0x2e6   :  { %v1550_v19 = vmax.f32 %v1422_v39, %v1458_v38  ;;  %v5831_v14 = vmax.f32 %v2113_v48, 1e-12  ;;  %v2167_v39 = vsel %vm2165_vm5, %v2166_v15, %v2164_v35  ;;  %v1441_v38 = vld [vmem:[#allocation2 + $0xa0] sm:$0xff] }
 0x2e8   :  { %1583 = vst.msk [vmem:[#allocation2 + $0x8] sm:$0xff] %vm7477_vm7, %v1550_v19  ;;  %v2098_v28 = vld [vmem:[#allocation3 + $0x8] sm:$0xff]  ;;  %2700 = vrsqrt.f32 %v5831_v14  ;;  %vm2275_vm0 = vcmp.eq.f32.partialorder %v5831_v14, inf  ;;  %vm2277_vm7 = vcmp.eq.f32.partialorder %v5831_v14, 0.0  ;;  %v2278_v2 = vand.u32 2147483648, %v5831_v14 }
 0x2e9   :  { %v5833_v22 = vmax.f32 %v2098_v28, 1e-12  ;;  %v2385_v19 = vsub.f32 %v1879_v46, %v2167_v39 }
 0x2eb   :  { %2702 = vrsqrt.f32 %v5833_v22  ;;  %vm2170_vm15 = vcmp.eq.f32.partialorder %v5833_v22, inf  ;;  %vm2172_vm4 = vcmp.eq.f32.partialorder %v5833_v22, 0.0  ;;  %v2417_v48 = vadd.f32 0.3, %v2385_v19 }
 0x2ec   :  { %v1461_v49 = vpop.xlane.xlu0 %1460  ;;  %v2114_v18 = vld [vmem:[#allocation3 + $0x88] sm:$0xff] }
 0x2ed   :  { %v1509_v44 = vpop.xlane.xlu1 %1508  ;;  %v1551_v9 = vmax.f32 %v1423_v43, %v1461_v49  ;;  %v5844_v61 = vmax.f32 %v2114_v18, 1e-12  ;;  %v2173_v49 = vand.u32 2147483648, %v5833_v22 }
 0x2ee   :  { %v1567_v27 = vmax.f32 %v1439_v50, %v1509_v44 }
 0x2ef   :  { %1584 = vst.msk [vmem:[#allocation2 + $0x10] sm:$0xff] %vm7479_vm2, %v1551_v9  ;;  %v1810_v31 = vld [vmem:[#allocation2 + $0x8] sm:$0xff]  ;;  %2704 = vrsqrt.f32 %v5844_v61  ;;  %vm2282_vm9 = vcmp.eq.f32.partialorder %v5844_v61, inf }
 0x2f0   :  { %1600 = vst.msk [vmem:[#allocation2 + $0x90] sm:$0xff] %vm7478_vm11, %v1567_v27  ;;  %v1464_v41 = vpop.xlane.xlu0 %1463  ;;  %v5846_v1 = vmax.f32 %v1810_v31, 1e-12  ;;  %vm7484_vm11 = vmmov %vm7479_vm2 }
 0x2f1   :  { %v1654_v37 = vpop.xlane.xlu1 %1653  ;;  %v1552_v17 = vmax.f32 %v1424_v16, %v1464_v41  ;;  %v2449_v41 = vmax.f32 %v2417_v48, 0.0 }
 0x2f2   :  { %v1744_v5 = vmin.f32 %v1616_v25, %v1654_v37  ;;  %2706 = vrsqrt.f32 %v5846_v1  ;;  %v2701_v7 = vpop.eup %2700  ;;  %vm1882_vm14 = vcmp.eq.f32.partialorder %v5846_v1, inf  ;;  %vm1884_vm13 = vcmp.eq.f32.partialorder %v5846_v1, 0.0 }
 0x2f3   :  { %1585 = vst.msk [vmem:[#allocation2 + $0x18] sm:$0xff] %vm7481_vm12, %v1552_v17  ;;  %v2274_v11 = vmul.f32 %v2701_v7, %v5831_v14  ;;  %vm7486_vm12 = vmmov %vm7485_vm1 }
 0x2f4   :  { %1776 = vst.msk [vmem:[#allocation3 + $0x10] sm:$0xff] %vm7480_vm10, %v1744_v5  ;;  %vm2284_vm10 = vcmp.eq.f32.partialorder %v5844_v61, 0.0  ;;  %v2285_v5 = vand.u32 2147483648, %v5844_v61 }
 0x2f5   :  { %v1702_v3 = vpop.xlane.xlu1 %1701  ;;  %v2703_v45 = vpop.eup %2702  ;;  %v2276_v28 = vsel %vm2275_vm0, %v5831_v14, %v2274_v11  ;;  %2481 = vst.msk [vmem:[#allocation15] sm:$0xff] %vm7487_vm8, %v2449_v41 }
 0x2f6   :  { %v1811_v32 = vld [vmem:[#allocation2 + $0x10] sm:$0xff]  ;;  %v1760_v51 = vmin.f32 %v1632_v30, %v1702_v3  ;;  %v2169_v44 = vmul.f32 %v2703_v45, %v5833_v22  ;;  %v2279_v10 = vsel %vm2277_vm7, %v2278_v2, %v2276_v28  ;;  %v1618_v28 = vld [vmem:[#allocation3 + $0x20] sm:$0xff] }
 0x2f7   :  { %v1827_v54 = vld [vmem:[#allocation2 + $0x90] sm:$0xff]  ;;  %v5871_v34 = vmax.f32 %v1811_v32, 1e-12  ;;  %v2401_v16 = vsub.f32 %v5864_v20, %v2279_v10  ;;  %v1634_v10 = vld [vmem:[#allocation3 + $0xa0] sm:$0xff] }
 0x2f8   :  { %v1512_v13 = vpop.xlane.xlu0 %1511  ;;  %v5869_v58 = vmax.f32 %v1827_v54, 1e-12  ;;  %1792 = vst.msk [vmem:[#allocation3 + $0x90] sm:$0xff] %vm7482_vm3, %v1760_v51  ;;  %v2171_v47 = vsel %vm2170_vm15, %v5833_v22, %v2169_v44  ;;  %vm7488_vm3 = vmmov %vm7485_vm1 }
 0x2f9   :  { %v1568_v6 = vmax.f32 %v1440_v33, %v1512_v13  ;;  %v2705_v9 = vpop.eup %2704  ;;  %v2433_v56 = vadd.f32 0.3, %v2401_v16  ;;  %v2174_v3 = vsel %vm2172_vm4, %v2173_v49, %v2171_v47  ;;  %v1885_v13 = vand.u32 2147483648, %v5846_v1  ;;  %v1442_v47 = vld [vmem:[#allocation2 + $0xa8] sm:$0xff] }
 0x2fa   :  { %2708 = vrsqrt.f32 %v5869_v58  ;;  %v1812_v50 = vld [vmem:[#allocation2 + $0x18] sm:$0xff]  ;;  %v2281_v57 = vmul.f32 %v2705_v9, %v5844_v61  ;;  %vm2003_vm5 = vcmp.eq.f32.partialorder %v5869_v58, 0.0  ;;  %vm1889_vm0 = vcmp.eq.f32.partialorder %v5871_v34, inf  ;;  %v1426_v9 = vld [vmem:[#allocation2 + $0x28] sm:$0xff] }
 0x2fb   :  { %1601 = vst.msk [vmem:[#allocation2 + $0x98] sm:$0xff] %vm7483_vm6, %v1568_v6  ;;  %2710 = vrsqrt.f32 %v5871_v34  ;;  %v2099_v26 = vld [vmem:[#allocation3 + $0x10] sm:$0xff]  ;;  %v5903_v37 = vmax.f32 %v1812_v50, 1e-12  ;;  %v2465_v62 = vmax.f32 %v2433_v56, 0.0  ;;  %vm2001_vm6 = vcmp.eq.f32.partialorder %v5869_v58, inf }
 0x2fc   :  { %v1657_v24 = vpop.xlane.xlu0 %1656  ;;  %v1467_v40 = vpop.xlane.xlu1 %1466  ;;  %v5891_v53 = vmax.f32 %v2099_v26, 1e-12  ;;  %v2283_v30 = vsel %vm2282_vm9, %v5844_v61, %v2281_v57  ;;  %vm1891_vm7 = vcmp.eq.f32.partialorder %v5871_v34, 0.0  ;;  %v1892_v39 = vand.u32 2147483648, %v5871_v34  ;;  %v1619_v16 = vld [vmem:[#allocation3 + $0x28] sm:$0xff] }
 0x2fd   :  { %v1745_v12 = vmin.f32 %v1617_v63, %v1657_v24  ;;  %v1553_v21 = vmax.f32 %v1425_v36, %v1467_v40  ;;  %v2707_v25 = vpop.eup %2706  ;;  %v2286_v33 = vsel %vm2284_vm10, %v2285_v5, %v2283_v30  ;;  %2497 = vst.msk [vmem:[#allocation15 + $0x80] sm:$0xff] %vm7488_vm3, %v2465_v62  ;;  %v2004_v49 = vand.u32 2147483648, %v5869_v58  ;;  %v1620_v62 = vld [vmem:[#allocation3 + $0x30] sm:$0xff] }
 0x2fe   :  { %2712 = vrsqrt.f32 %v5891_v53  ;;  %v1881_v17 = vmul.f32 %v2707_v25, %v5846_v1  ;;  %v2402_v63 = vsub.f32 %v5867_v60, %v2286_v33  ;;  %vm2177_vm15 = vcmp.eq.f32.partialorder %v5891_v53, inf }
 0x2ff   :  { %1777 = vst.msk [vmem:[#allocation3 + $0x18] sm:$0xff] %vm7484_vm11, %v1745_v12  ;;  %v2115_v14 = vld [vmem:[#allocation3 + $0x90] sm:$0xff]  ;;  %2714 = vrsqrt.f32 %v5903_v37  ;;  %vm7489_vm11 = vmmov %vm7485_vm1  ;;  %v2180_v45 = vand.u32 2147483648, %v5891_v53  ;;  %vm2179_vm4 = vcmp.eq.f32.partialorder %v5891_v53, 0.0  ;;  %vm1896_vm9 = vcmp.eq.f32.partialorder %v5903_v37, inf }
 0x300   :  { %1586 = vst.msk [vmem:[#allocation2 + $0x20] sm:$0xff] %vm7479_vm2, %v1553_v21  ;;  %v1705_v43 = vpop.xlane.xlu0 %1704  ;;  %v1515_v23 = vpop.xlane.xlu1 %1514  ;;  %v1883_v52 = vsel %vm1882_vm14, %v5846_v1, %v1881_v17  ;;  %v5927_v59 = vmax.f32 %v2115_v14, 1e-12  ;;  %v2434_v1 = vadd.f32 0.3, %v2402_v63  ;;  %vm7490_vm2 = vmmov %vm7485_vm1  ;;  %vm1898_vm10 = vcmp.eq.f32.partialorder %v5903_v37, 0.0 }
 0x301   :  { %v1761_v42 = vmin.f32 %v1633_v29, %v1705_v43  ;;  %v1569_v27 = vmax.f32 %v1441_v38, %v1515_v23  ;;  %v1886_v36 = vsel %vm1884_vm13, %v1885_v13, %v1883_v52  ;;  %v1427_v17 = vld [vmem:[#allocation2 + $0x30] sm:$0xff]  ;;  %v1428_v63 = vld [vmem:[#allocation2 + $0x38] sm:$0xff]  ;;  %vm7491_vm14 = vmmov %vm7490_vm2 }
 0x302   :  { %v1828_v8 = vld [vmem:[#allocation2 + $0x98] sm:$0xff]  ;;  %v2386_v46 = vsub.f32 %v1886_v36, %v2174_v3  ;;  %2716 = vrsqrt.f32 %v5927_v59  ;;  %v2466_v4 = vmax.f32 %v2434_v1, 0.0  ;;  %vm7492_vm13 = vmmov %vm7490_vm2 }
 0x303   :  { %1793 = vst.msk [vmem:[#allocation3 + $0x98] sm:$0xff] %vm7485_vm1, %v1761_v42  ;;  %v5930_v22 = vmax.f32 %v1828_v8, 1e-12  ;;  %vm2289_vm1 = vcmp.eq.f32.partialorder %v5927_v59, inf  ;;  %v1635_v8 = vld [vmem:[#allocation3 + $0xa8] sm:$0xff]  ;;  %vm7493_vm8 = vmmov %vm7490_vm2 }
 0x304   :  { %1602 = vst.msk [vmem:[#allocation2 + $0xa0] sm:$0xff] %vm7486_vm12, %v1569_v27  ;;  %v5910_v18 = vpop.xlane.xlu1 %1659  ;;  %v5912_v31 = vpop.xlane.xlu0 %1469  ;;  %v2418_v51 = vadd.f32 0.3, %v2386_v46  ;;  %vm2291_vm12 = vcmp.eq.f32.partialorder %v5927_v59, 0.0  ;;  %vm7494_vm3 = vmmov %vm7490_vm2 }
 0x305   :  { %v2709_v55 = vpop.eup %2708  ;;  %2718 = vrsqrt.f32 %v5930_v22  ;;  %2498 = vst.msk [vmem:[#allocation15 + $0x88] sm:$0xff] %vm7489_vm11, %v2466_v4  ;;  %v1746_v13 = vmin.f32 %v1618_v28, %v5910_v18  ;;  %v1554_v33 = vmax.f32 %v1426_v9, %v5912_v31 }
 0x306   :  { %v2711_v61 = vpop.eup %2710  ;;  %v2100_v32 = vld [vmem:[#allocation3 + $0x18] sm:$0xff]  ;;  %v2000_v60 = vmul.f32 %v2709_v55, %v5869_v58  ;;  %v2450_v21 = vmax.f32 %v2418_v51, 0.0 }
 0x307   :  { %v1888_v54 = vmul.f32 %v2711_v61, %v5871_v34  ;;  %v1813_v24 = vld [vmem:[#allocation2 + $0x20] sm:$0xff]  ;;  %v5949_v35 = vmax.f32 %v2100_v32, 1e-12  ;;  %v1444_v32 = vld [vmem:[#allocation2 + $0xb8] sm:$0xff]  ;;  %1778 = vst.msk [vmem:[#allocation3 + $0x20] sm:$0xff] %vm7491_vm14, %v1746_v13 }
 0x308   :  { %v5932_v0 = vpop.xlane.xlu1 %1707  ;;  %v5934_v20 = vpop.xlane.xlu0 %1517  ;;  %2482 = vst.msk [vmem:[#allocation15 + $0x8] sm:$0xff] %vm7490_vm2, %v2450_v21  ;;  %v5961_v19 = vmax.f32 %v1813_v24, 1e-12  ;;  %v2002_v11 = vsel %vm2001_vm6, %v5869_v58, %v2000_v60  ;;  %v1443_v58 = vld [vmem:[#allocation2 + $0xb0] sm:$0xff]  ;;  %vm7495_vm6 = vmmov %vm7490_vm2 }
 0x309   :  { %v2713_v12 = vpop.eup %2712  ;;  %v1890_v7 = vsel %vm1889_vm0, %v5871_v34, %v1888_v54  ;;  %2720 = vrsqrt.f32 %v5949_v35  ;;  %v2005_v41 = vsel %vm2003_vm5, %v2004_v49, %v2002_v11  ;;  %v2292_v34 = vand.u32 2147483648, %v5927_v59  ;;  %v1636_v54 = vld [vmem:[#allocation3 + $0xb0] sm:$0xff]  ;;  %1587 = vst.msk [vmem:[#allocation2 + $0x28] sm:$0xff] %vm7492_vm13, %v1554_v33  ;;  %vm7496_vm0 = vmmov %vm7490_vm2 }
 0x30a   :  { %v2116_v6 = vld [vmem:[#allocation3 + $0x98] sm:$0xff]  ;;  %v2176_v2 = vmul.f32 %v2713_v12, %v5891_v53  ;;  %v2715_v44 = vpop.eup %2714  ;;  %v1893_v42 = vsel %vm1891_vm7, %v1892_v39, %v1890_v7  ;;  %v1762_v52 = vmin.f32 %v1634_v10, %v5932_v0  ;;  %v1570_v55 = vmax.f32 %v1442_v47, %v5934_v20  ;;  %vm7497_vm11 = vmmov %vm7496_vm0 }
 0x30b   :  { %v1829_v29 = vld [vmem:[#allocation2 + $0xa0] sm:$0xff]  ;;  %v5955_v38 = vmax.f32 %v2116_v6, 1e-12  ;;  %v1895_v14 = vmul.f32 %v2715_v44, %v5903_v37  ;;  %vm2008_vm5 = vcmp.eq.f32.partialorder %v5930_v22, inf  ;;  %vm2010_vm7 = vcmp.eq.f32.partialorder %v5930_v22, 0.0  ;;  %vm7498_vm2 = vmmov %vm7496_vm0  ;;  %v1621_v39 = vld [vmem:[#allocation3 + $0x38] sm:$0xff] }
 0x30c   :  { %v5943_v40 = vpop.xlane.xlu0 %1662  ;;  %v5945_v15 = vpop.xlane.xlu1 %1472  ;;  %v2178_v26 = vsel %vm2177_vm15, %v5891_v53, %v2176_v2  ;;  %v5968_v50 = vmax.f32 %v1829_v29, 1e-12  ;;  %v1899_v53 = vand.u32 2147483648, %v5903_v37  ;;  %1794 = vst.msk [vmem:[#allocation3 + $0xa0] sm:$0xff] %vm7493_vm8, %v1762_v52  ;;  %vm7499_vm15 = vmmov %vm7496_vm0  ;;  %v2011_v29 = vand.u32 2147483648, %v5930_v22  ;;  %v1429_v2 = vld [vmem:[#allocation2 + $0x40] sm:$0xff] }
 0x30d   :  { %v2181_v48 = vsel %vm2179_vm4, %v2180_v45, %v2178_v26  ;;  %2722 = vrsqrt.f32 %v5955_v38  ;;  %v2717_v25 = vpop.eup %2716  ;;  %v1747_v1 = vmin.f32 %v1619_v16, %v5943_v40  ;;  %1603 = vst.msk [vmem:[#allocation2 + $0xa8] sm:$0xff] %vm7494_vm3, %v1570_v55  ;;  %v1555_v31 = vmax.f32 %v1427_v17, %v5945_v15  ;;  %vm7502_vm13 = vmmov %vm7496_vm0 }
 0x30e   :  { %v2387_v27 = vsub.f32 %v1893_v42, %v2181_v48  ;;  %2724 = vrsqrt.f32 %v5961_v19  ;;  %v2288_v5 = vmul.f32 %v2717_v25, %v5927_v59  ;;  %v1897_v40 = vsel %vm1896_vm9, %v5903_v37, %v1895_v14  ;;  %vm7501_vm9 = vmmov %vm7496_vm0 }
 0x30f   :  { %2726 = vrsqrt.f32 %v5968_v50  ;;  %v2719_v30 = vpop.eup %2718  ;;  %1779 = vst.msk [vmem:[#allocation3 + $0x28] sm:$0xff] %vm7496_vm0, %v1747_v1  ;;  %vm2184_vm4 = vcmp.eq.f32.partialorder %v5949_v35, inf  ;;  %v2187_v26 = vand.u32 2147483648, %v5949_v35  ;;  %vm2296_vm14 = vcmp.eq.f32.partialorder %v5955_v38, inf  ;;  %vm7503_vm8 = vmmov %vm7496_vm0 }
 0x310   :  { %v5970_v43 = vpop.xlane.xlu0 %1710  ;;  %v5972_v23 = vpop.xlane.xlu1 %1520  ;;  %v2419_v57 = vadd.f32 0.3, %v2387_v27  ;;  %v2290_v61 = vsel %vm2289_vm1, %v5927_v59, %v2288_v5  ;;  %v2007_v46 = vmul.f32 %v2719_v30, %v5930_v22  ;;  %1588 = vst.msk [vmem:[#allocation2 + $0x30] sm:$0xff] %vm7497_vm11, %v1555_v31  ;;  %vm7500_vm1 = vmmov %vm7496_vm0  ;;  %v2299_v9 = vand.u32 2147483648, %v5955_v38 }
 0x311   :  { %v2293_v18 = vsel %vm2291_vm12, %v2292_v34, %v2290_v61  ;;  %v1763_v0 = vmin.f32 %v1635_v8, %v5970_v43  ;;  %v1571_v20 = vmax.f32 %v1443_v58, %v5972_v23  ;;  %vm2186_vm12 = vcmp.eq.f32.partialorder %v5949_v35, 0.0  ;;  %vm7504_vm3 = vmmov %vm7496_vm0  ;;  %v1814_v34 = vld [vmem:[#allocation2 + $0x28] sm:$0xff] }
 0x312   :  { %v2451_v36 = vmax.f32 %v2419_v57, 0.0  ;;  %v2403_v51 = vsub.f32 %v2005_v41, %v2293_v18  ;;  %v2009_v11 = vsel %vm2008_vm5, %v5930_v22, %v2007_v46  ;;  %v1900_v43 = vsel %vm1898_vm10, %v1899_v53, %v1897_v40  ;;  %v2101_v41 = vld [vmem:[#allocation3 + $0x20] sm:$0xff]  ;;  %vm7506_vm5 = vmmov %vm7496_vm0 }
 0x313   :  { %v2721_v24 = vpop.eup %2720  ;;  %1795 = vst.msk [vmem:[#allocation3 + $0xa8] sm:$0xff] %vm7498_vm2, %v1763_v0  ;;  %v2012_v37 = vsel %vm2010_vm7, %v2011_v29, %v2009_v11  ;;  %vm2298_vm10 = vcmp.eq.f32.partialorder %v5955_v38, 0.0  ;;  %v2117_v16 = vld [vmem:[#allocation3 + $0xa0] sm:$0xff]  ;;  %v6045_v14 = vmax.f32 %v2101_v41, 1e-12  ;;  %vm1903_vm7 = vcmp.eq.f32.partialorder %v5961_v19, inf  ;;  %vm7507_vm2 = vmmov %vm7496_vm0 }
 0x314   :  { %v1666_v56 = vpop.xlane.xlu1 %1665  ;;  %v1476_v3 = vpop.xlane.xlu0 %1475  ;;  %2483 = vst.msk [vmem:[#allocation15 + $0x10] sm:$0xff] %vm7495_vm6, %v2451_v36  ;;  %v2435_v21 = vadd.f32 0.3, %v2403_v51  ;;  %v2183_v7 = vmul.f32 %v2721_v24, %v5949_v35  ;;  %v6047_v5 = vmax.f32 %v1814_v34, 1e-12  ;;  %vm7505_vm6 = vmmov %vm7496_vm0  ;;  %v1830_v52 = vld [vmem:[#allocation2 + $0xa8] sm:$0xff] }
 0x315   :  { %v1748_v59 = vmin.f32 %v1620_v62, %v1666_v56  ;;  %v1556_v6 = vmax.f32 %v1428_v63, %v1476_v3  ;;  %1604 = vst.msk [vmem:[#allocation2 + $0xb0] sm:$0xff] %vm7499_vm15, %v1571_v20  ;;  %v6049_v17 = vmax.f32 %v2117_v16, 1e-12  ;;  %2728 = vrsqrt.f32 %v6045_v14  ;;  %v1637_v3 = vld [vmem:[#allocation3 + $0xb8] sm:$0xff]  ;;  %v1445_v36 = vld [vmem:[#allocation2 + $0xc0] sm:$0xff]  ;;  %vm7508_vm15 = vmmov %vm7496_vm0 }
 0x316   :  { %v2467_v23 = vmax.f32 %v2435_v21, 0.0  ;;  %v2185_v44 = vsel %vm2184_vm4, %v5949_v35, %v2183_v7  ;;  %2730 = vrsqrt.f32 %v6047_v5  ;;  %v2102_v55 = vld [vmem:[#allocation3 + $0x28] sm:$0xff]  ;;  %vm2015_vm11 = vcmp.eq.f32.partialorder %v5968_v50, inf }
 0x317   :  { %1780 = vst.msk [vmem:[#allocation3 + $0x30] sm:$0xff] %vm7500_vm1, %v1748_v59  ;;  %v2723_v45 = vpop.eup %2722  ;;  %v2188_v27 = vsel %vm2186_vm12, %v2187_v26, %v2185_v44  ;;  %v1815_v62 = vld [vmem:[#allocation2 + $0x30] sm:$0xff]  ;;  %2732 = vrsqrt.f32 %v6049_v17  ;;  %v6065_v18 = vmax.f32 %v1830_v52, 1e-12  ;;  %v6067_v31 = vmax.f32 %v2102_v55, 1e-12 }
 0x318   :  { %v1714_v4 = vpop.xlane.xlu1 %1713  ;;  %v1524_v60 = vpop.xlane.xlu0 %1523  ;;  %1589 = vst.msk [vmem:[#allocation2 + $0x38] sm:$0xff] %vm7501_vm9, %v1556_v6  ;;  %v2295_v49 = vmul.f32 %v2723_v45, %v5955_v38  ;;  %v2388_v53 = vsub.f32 %v1900_v43, %v2188_v27  ;;  %v6069_v0 = vmax.f32 %v1815_v62, 1e-12  ;;  %v2018_v24 = vand.u32 2147483648, %v5968_v50  ;;  %vm7509_vm9 = vmmov %vm7496_vm0 }
 0x319   :  { %v1764_v15 = vmin.f32 %v1636_v54, %v1714_v4  ;;  %v1572_v12 = vmax.f32 %v1444_v32, %v1524_v60  ;;  %v2725_v28 = vpop.eup %2724  ;;  %2499 = vst.msk [vmem:[#allocation15 + $0x90] sm:$0xff] %vm7504_vm3, %v2467_v23  ;;  %v1906_v60 = vand.u32 2147483648, %v5961_v19  ;;  %2734 = vrsqrt.f32 %v6065_v18 }
 0x31a   :  { %v2727_v25 = vpop.eup %2726  ;;  %v2297_v35 = vsel %vm2296_vm14, %v5955_v38, %v2295_v49  ;;  %v2420_v22 = vadd.f32 0.3, %v2388_v53  ;;  %v1902_v38 = vmul.f32 %v2725_v28, %v5961_v19  ;;  %v2118_v63 = vld [vmem:[#allocation3 + $0xa8] sm:$0xff]  ;;  %vm1905_vm4 = vcmp.eq.f32.partialorder %v5961_v19, 0.0 }
 0x31b   :  { %1796 = vst.msk [vmem:[#allocation3 + $0xb0] sm:$0xff] %vm7502_vm13, %v1764_v15  ;;  %v2300_v57 = vsel %vm2298_vm10, %v2299_v9, %v2297_v35  ;;  %v2014_v33 = vmul.f32 %v2727_v25, %v5968_v50  ;;  %v6074_v6 = vmax.f32 %v2118_v63, 1e-12  ;;  %vm2017_vm1 = vcmp.eq.f32.partialorder %v5968_v50, 0.0 }
 0x31c   :  { %1605 = vst.msk [vmem:[#allocation2 + $0xb8] sm:$0xff] %vm7503_vm8, %v1572_v12  ;;  %v1669_v42 = vpop.xlane.xlu0 %1668  ;;  %v1479_v48 = vpop.xlane.xlu1 %1478  ;;  %v2404_v8 = vsub.f32 %v2012_v37, %v2300_v57  ;;  %v2452_v30 = vmax.f32 %v2420_v22, 0.0  ;;  %v1831_v46 = vld [vmem:[#allocation2 + $0xb0] sm:$0xff]  ;;  %v1904_v51 = vsel %vm1903_vm7, %v5961_v19, %v1902_v38  ;;  %2736 = vrsqrt.f32 %v6067_v31 }
 0x31d   :  { %v1749_v10 = vmin.f32 %v1621_v39, %v1669_v42  ;;  %v1557_v47 = vmax.f32 %v1429_v2, %v1479_v48  ;;  %v2016_v59 = vsel %vm2015_vm11, %v5968_v50, %v2014_v33  ;;  %v6079_v40 = vmax.f32 %v1831_v46, 1e-12 }
 0x31e   :  { %v2436_v13 = vadd.f32 0.3, %v2404_v8  ;;  %2484 = vst.msk [vmem:[#allocation15 + $0x18] sm:$0xff] %vm7496_vm0, %v2452_v30  ;;  %v2103_v1 = vld [vmem:[#allocation3 + $0x30] sm:$0xff]  ;;  %v1907_v29 = vsel %vm1905_vm4, %v1906_v60, %v1904_v51  ;;  %v2019_v7 = vsel %vm2017_vm1, %v2018_v24, %v2016_v59  ;;  %vm2191_vm12 = vcmp.eq.f32.partialorder %v6045_v14, inf }
 0x31f   :  { %1781 = vst.msk [vmem:[#allocation3 + $0x38] sm:$0xff] %vm7505_vm6, %v1749_v10  ;;  %v6085_v15 = vmax.f32 %v2103_v1, 1e-12  ;;  %2738 = vrsqrt.f32 %v6069_v0  ;;  %vm2193_vm14 = vcmp.eq.f32.partialorder %v6045_v14, 0.0  ;;  %v2194_v19 = vand.u32 2147483648, %v6045_v14  ;;  %v1816_v50 = vld [vmem:[#allocation2 + $0x38] sm:$0xff]  ;;  %v2729_v2 = vpop.eup %2728 }
 0x320   :  { %1590 = vst.msk [vmem:[#allocation2 + $0x40] sm:$0xff] %vm7506_vm5, %v1557_v47  ;;  %v1717_v58 = vpop.xlane.xlu0 %1716  ;;  %v1527_v56 = vpop.xlane.xlu1 %1526  ;;  %v2468_v61 = vmax.f32 %v2436_v13, 0.0  ;;  %vm1910_vm13 = vcmp.eq.f32.partialorder %v6047_v5, inf  ;;  %2740 = vrsqrt.f32 %v6074_v6  ;;  %v1913_v45 = vand.u32 2147483648, %v6047_v5 }
 0x321   :  { %v1765_v20 = vmin.f32 %v1637_v3, %v1717_v58  ;;  %v1573_v4 = vmax.f32 %v1445_v36, %v1527_v56  ;;  %vm2303_vm8 = vcmp.eq.f32.partialorder %v6049_v17, inf  ;;  %vm2305_vm3 = vcmp.eq.f32.partialorder %v6049_v17, 0.0  ;;  %v2731_v11 = vpop.eup %2730 }
 0x322   :  { %2500 = vst.msk [vmem:[#allocation15 + $0x98] sm:$0xff] %vm7507_vm2, %v2468_v61  ;;  %v2119_v39 = vld [vmem:[#allocation3 + $0xb0] sm:$0xff]  ;;  %2742 = vrsqrt.f32 %v6079_v40  ;;  %v2190_v26 = vmul.f32 %v2729_v2, %v6045_v14  ;;  %v2306_v43 = vand.u32 2147483648, %v6049_v17  ;;  %vm2022_vm10 = vcmp.eq.f32.partialorder %v6065_v18, inf  ;;  %v2733_v49 = vpop.eup %2732 }
 0x323   :  { %1797 = vst.msk [vmem:[#allocation3 + $0xb8] sm:$0xff] %vm7508_vm15, %v1765_v20  ;;  %2744 = vrsqrt.f32 %v6085_v15  ;;  %vm1912_vm6 = vcmp.eq.f32.partialorder %v6047_v5, 0.0  ;;  %v2025_v42 = vand.u32 2147483648, %v6065_v18  ;;  %vm2198_vm5 = vcmp.eq.f32.partialorder %v6067_v31, inf  ;;  %v1832_v47 = vld [vmem:[#allocation2 + $0xb8] sm:$0xff]  ;;  %v2735_v57 = vpop.eup %2734 }
 0x324   :  { %v6061_v54 = vpop.xlane.xlu1 %1671  ;;  %v6063_v32 = vpop.xlane.xlu0 %1481  ;;  %1606 = vst.msk [vmem:[#allocation2 + $0xc0] sm:$0xff] %vm7509_vm9, %v1573_v4  ;;  %v6113_v48 = vmax.f32 %v1816_v50, 1e-12  ;;  %v6115_v28 = vmax.f32 %v2119_v39, 1e-12  ;;  %v2192_v27 = vsel %vm2191_vm12, %v6045_v14, %v2190_v26  ;;  %v2302_v9 = vmul.f32 %v2733_v49, %v6049_v17 }
 0x325   :  { %vm2200_vm0 = vcmp.eq.f32.partialorder %v6067_v31, 0.0  ;;  %v2201_v10 = vand.u32 2147483648, %v6067_v31  ;;  %v2195_v25 = vsel %vm2193_vm14, %v2194_v19, %v2192_v27  ;;  %v1909_v37 = vmul.f32 %v2731_v11, %v6047_v5 }
 0x326   :  { %vm2024_vm7 = vcmp.eq.f32.partialorder %v6065_v18, 0.0  ;;  %vm1917_vm11 = vcmp.eq.f32.partialorder %v6069_v0, inf  ;;  %2746 = vrsqrt.f32 %v6113_v48  ;;  %v2389_v53 = vsub.f32 %v1907_v29, %v2195_v25  ;;  %v2104_v8 = vld [vmem:[#allocation3 + $0x38] sm:$0xff]  ;;  %v2737_v58 = vpop.eup %2736 }
 0x327   :  { %v2304_v35 = vsel %vm2303_vm8, %v6049_v17, %v2302_v9  ;;  %v1920_v41 = vand.u32 2147483648, %v6069_v0  ;;  %vm2310_vm2 = vcmp.eq.f32.partialorder %v6074_v6, inf  ;;  %vm1919_vm15 = vcmp.eq.f32.partialorder %v6069_v0, 0.0 }
 0x328   :  { %v6088_v12 = vpop.xlane.xlu1 %1719  ;;  %v6090_v21 = vpop.xlane.xlu0 %1529  ;;  %v2307_v14 = vsel %vm2305_vm3, %v2306_v43, %v2304_v35  ;;  %vm2312_vm4 = vcmp.eq.f32.partialorder %v6074_v6, 0.0  ;;  %2748 = vrsqrt.f32 %v6115_v28  ;;  %v6143_v22 = vmax.f32 %v1832_v47, 1e-12 }
 0x329   :  { %v2421_v56 = vadd.f32 0.3, %v2389_v53  ;;  %v2405_v38 = vsub.f32 %v2019_v7, %v2307_v14  ;;  %v2021_v3 = vmul.f32 %v2735_v57, %v6065_v18  ;;  %v2313_v30 = vand.u32 2147483648, %v6074_v6  ;;  %v2739_v13 = vpop.eup %2738 }
 0x32a   :  { %v1911_v17 = vsel %vm1910_vm13, %v6047_v5, %v1909_v37  ;;  %v2197_v33 = vmul.f32 %v2737_v58, %v6067_v31  ;;  %vm2029_vm1 = vcmp.eq.f32.partialorder %v6079_v40, inf  ;;  %vm2205_vm9 = vcmp.eq.f32.partialorder %v6085_v15, inf  ;;  %v2741_v52 = vpop.eup %2740 }
 0x32b   :  { %v2453_v55 = vmax.f32 %v2421_v56, 0.0  ;;  %v2437_v62 = vadd.f32 0.3, %v2405_v38  ;;  %v1916_v63 = vmul.f32 %v2739_v13, %v6069_v0  ;;  %v6154_v36 = vmax.f32 %v2104_v8, 1e-12  ;;  %v1833_v37 = vld [vmem:[#allocation2 + $0xc0] sm:$0xff] }
 0x32c   :  { %v6106_v23 = vpop.xlane.xlu0 %1674  ;;  %v6108_v44 = vpop.xlane.xlu1 %1484  ;;  %v2023_v20 = vsel %vm2022_vm10, %v6065_v18, %v2021_v3  ;;  %v2199_v51 = vsel %vm2198_vm5, %v6067_v31, %v2197_v33  ;;  %v2309_v59 = vmul.f32 %v2741_v52, %v6074_v6  ;;  %vm2031_vm12 = vcmp.eq.f32.partialorder %v6079_v40, 0.0  ;;  %v1817_v18 = vld [vmem:[#allocation2 + $0x40] sm:$0xff] }
 0x32d   :  { %v2743_v1 = vpop.eup %2742  ;;  %2750 = vrsqrt.f32 %v6143_v22  ;;  %vm7510_vm14 = vcmask 7168   ;;  %v1914_v60 = vsel %vm1912_vm6, %v1913_v45, %v1911_v17  ;;  %v2469_v24 = vmax.f32 %v2437_v62, 0.0 }
 0x32e   :  { %v2745_v4 = vpop.eup %2744  ;;  %2485 = vst.msk [vmem:[#allocation15 + $0x20] sm:$0xff] %vm7510_vm14, %v2453_v55  ;;  %v2202_v29 = vsel %vm2200_vm0, %v2201_v10, %v2199_v51  ;;  %v2028_v7 = vmul.f32 %v2743_v1, %v6079_v40  ;;  %v1918_v50 = vsel %vm1917_vm11, %v6069_v0, %v1916_v63  ;;  %v2311_v39 = vsel %vm2310_vm2, %v6074_v6, %v2309_v59  ;;  %vm7511_vm13 = vmmov %vm7510_vm14  ;;  %v2120_v6 = vld [vmem:[#allocation3 + $0xb8] sm:$0xff]  ;;  %v1430_v51 = vld [vmem:[#allocation2 + $0x48] sm:$0xff] }
 0x32f   :  { %v2390_v19 = vsub.f32 %v1914_v60, %v2202_v29  ;;  %v2204_v2 = vmul.f32 %v2745_v4, %v6085_v15  ;;  %2501 = vst.msk [vmem:[#allocation15 + $0xa0] sm:$0xff] %vm7511_vm13, %v2469_v24  ;;  %v2026_v5 = vsel %vm2024_vm7, %v2025_v42, %v2023_v20  ;;  %v2314_v31 = vsel %vm2312_vm4, %v2313_v30, %v2311_v39  ;;  %vm7512_vm10 = vmmov %vm7511_vm13  ;;  %v1638_v59 = vld [vmem:[#allocation3 + $0xc0] sm:$0xff]  ;;  %v1446_v60 = vld [vmem:[#allocation2 + $0xc8] sm:$0xff] }
 0x330   :  { %v6134_v34 = vpop.xlane.xlu0 %1722  ;;  %v6136_v16 = vpop.xlane.xlu1 %1532  ;;  %v2208_v45 = vand.u32 2147483648, %v6085_v15  ;;  %2752 = vrsqrt.f32 %v6154_v36  ;;  %v2406_v27 = vsub.f32 %v2026_v5, %v2314_v31  ;;  %vm2207_vm8 = vcmp.eq.f32.partialorder %v6085_v15, 0.0  ;;  %vm7513_vm0 = vmmov %vm7512_vm10  ;;  %v1623_v24 = vld [vmem:[#allocation3 + $0x48] sm:$0xff]  ;;  %v1431_v29 = vld [vmem:[#allocation2 + $0x50] sm:$0xff] }
 0x331   :  { %v2747_v43 = vpop.eup %2746  ;;  %v2422_v49 = vadd.f32 0.3, %v2390_v19  ;;  %v2206_v9 = vsel %vm2205_vm9, %v6085_v15, %v2204_v2  ;;  %v1921_v42 = vsel %vm1919_vm15, %v1920_v41, %v1918_v50  ;;  %v2030_v10 = vsel %vm2029_vm1, %v6079_v40, %v2028_v7  ;;  %vm7514_vm7 = vmmov %vm7513_vm0  ;;  %v1639_v5 = vld [vmem:[#allocation3 + $0xc8] sm:$0xff]  ;;  %v1447_v31 = vld [vmem:[#allocation2 + $0xd0] sm:$0xff] }
 0x332   :  { %v2032_v47 = vand.u32 2147483648, %v6079_v40  ;;  %v2209_v25 = vsel %vm2207_vm8, %v2208_v45, %v2206_v9  ;;  %v2749_v53 = vpop.eup %2748  ;;  %v2438_v57 = vadd.f32 0.3, %v2406_v27  ;;  %v1923_v8 = vmul.f32 %v2747_v43, %v6113_v48  ;;  %v1622_v40 = vld [vmem:[#allocation3 + $0x40] sm:$0xff]  ;;  %v1624_v45 = vld [vmem:[#allocation3 + $0x50] sm:$0xff]  ;;  %v1432_v9 = vld [vmem:[#allocation2 + $0x58] sm:$0xff] }
 0x333   :  { %v2454_v35 = vmax.f32 %v2422_v49, 0.0  ;;  %v2391_v14 = vsub.f32 %v1921_v42, %v2209_v25  ;;  %v2316_v15 = vmul.f32 %v2749_v53, %v6115_v28  ;;  %vm2317_vm3 = vcmp.eq.f32.partialorder %v6115_v28, inf  ;;  %v1433_v53 = vld [vmem:[#allocation2 + $0x60] sm:$0xff]  ;;  %vm7515_vm4 = vmmov %vm7513_vm0 }
 0x334   :  { %v6156_v61 = vpop.xlane.xlu1 %1677  ;;  %v6158_v46 = vpop.xlane.xlu0 %1487  ;;  %v6208_v0 = vmax.f32 %v1817_v18, 1e-12  ;;  %v6210_v41 = vmax.f32 %v2120_v6, 1e-12  ;;  %v2470_v38 = vmax.f32 %v2438_v57, 0.0  ;;  %v2320_v30 = vand.u32 2147483648, %v6115_v28  ;;  %vm7516_vm1 = vmmov %vm7513_vm0 }
 0x335   :  { %2486 = vst.msk [vmem:[#allocation15 + $0x28] sm:$0xff] %vm7512_vm10, %v2454_v35  ;;  %v2423_v3 = vadd.f32 0.3, %v2391_v14  ;;  %v6218_v13 = vmax.f32 %v1833_v37, 1e-12  ;;  %v2033_v17 = vsel %vm2031_vm12, %v2032_v47, %v2030_v10  ;;  %vm1924_vm6 = vcmp.eq.f32.partialorder %v6113_v48, inf  ;;  %vm7517_vm9 = vmmov %vm7513_vm0 }
 0x336   :  { %v2318_v33 = vsel %vm2317_vm3, %v6115_v28, %v2316_v15  ;;  %vm2319_vm5 = vcmp.eq.f32.partialorder %v6115_v28, 0.0  ;;  %2502 = vst.msk [vmem:[#allocation15 + $0xa8] sm:$0xff] %vm7513_vm0, %v2470_v38  ;;  %v1925_v62 = vsel %vm1924_vm6, %v6113_v48, %v1923_v8  ;;  %2754 = vrsqrt.f32 %v6208_v0  ;;  %v1640_v18 = vld [vmem:[#allocation3 + $0xd0] sm:$0xff]  ;;  %v1448_v6 = vld [vmem:[#allocation2 + $0xd8] sm:$0xff]  ;;  %v1434_v8 = vld [vmem:[#allocation2 + $0x68] sm:$0xff] }
 0x337   :  { %v2751_v52 = vpop.eup %2750  ;;  %v2455_v55 = vmax.f32 %v2423_v3, 0.0  ;;  %v2321_v63 = vsel %vm2319_vm5, %v2320_v30, %v2318_v33  ;;  %v1927_v1 = vand.u32 2147483648, %v6113_v48  ;;  %2756 = vrsqrt.f32 %v6210_v41  ;;  %v1625_v37 = vld [vmem:[#allocation3 + $0x58] sm:$0xff]  ;;  %vm7518_vm12 = vmmov %vm7513_vm0  ;;  %v1642_v38 = vld [vmem:[#allocation3 + $0xe0] sm:$0xff] }
 0x338   :  { %v6191_v11 = vpop.xlane.xlu1 %1725  ;;  %v6193_v26 = vpop.xlane.xlu0 %1535  ;;  %v2407_v20 = vsub.f32 %v2033_v17, %v2321_v63  ;;  %vm1926_vm11 = vcmp.eq.f32.partialorder %v6113_v48, 0.0  ;;  %vm2212_vm2 = vcmp.eq.f32.partialorder %v6154_v36, inf  ;;  %vm2214_vm15 = vcmp.eq.f32.partialorder %v6154_v36, 0.0  ;;  %v1641_v35 = vld [vmem:[#allocation3 + $0xd8] sm:$0xff]  ;;  %vm7519_vm14 = vmmov %vm7513_vm0  ;;  %v1450_v3 = vld [vmem:[#allocation2 + $0xe8] sm:$0xff] }
 0x339   :  { %2487 = vst.msk [vmem:[#allocation15 + $0x30] sm:$0xff] %vm7514_vm7, %v2455_v55  ;;  %2758 = vrsqrt.f32 %v6218_v13  ;;  %v1928_v19 = vsel %vm1926_vm11, %v1927_v1, %v1925_v62  ;;  %v2035_v39 = vmul.f32 %v2751_v52, %v6143_v22  ;;  %v2215_v2 = vand.u32 2147483648, %v6154_v36  ;;  %vm7520_vm13 = vmmov %vm7513_vm0 }
 0x33a   :  { %v2753_v7 = vpop.eup %2752  ;;  %v2439_v50 = vadd.f32 0.3, %v2407_v20  ;;  %v1750_v43 = vmin.f32 %v1622_v40, %v6061_v54  ;;  %v1558_v49 = vmax.f32 %v1430_v51, %v6063_v32  ;;  %v1766_v27 = vmin.f32 %v1638_v59, %v6088_v12  ;;  %vm7521_vm8 = vmmov %vm7513_vm0 }
 0x33b   :  { %v2211_v48 = vmul.f32 %v2753_v7, %v6154_v36  ;;  %v1574_v10 = vmax.f32 %v1446_v60, %v6090_v21  ;;  %v1751_v47 = vmin.f32 %v1623_v24, %v6106_v23  ;;  %v1559_v25 = vmax.f32 %v1431_v29, %v6108_v44  ;;  %v1449_v23 = vld [vmem:[#allocation2 + $0xe0] sm:$0xff]  ;;  %vm7522_vm3 = vmmov %vm7513_vm0  ;;  %v1435_v60 = vld [vmem:[#allocation2 + $0x70] sm:$0xff] }
 0x33c   :  { %v6212_v58 = vpop.xlane.xlu0 %1680  ;;  %v6214_v56 = vpop.xlane.xlu1 %1490  ;;  %v2471_v42 = vmax.f32 %v2439_v50, 0.0  ;;  %1782 = vst.msk [vmem:[#allocation3 + $0x40] sm:$0xff] %vm7515_vm4, %v1750_v43  ;;  %v1767_v32 = vmin.f32 %v1639_v5, %v6134_v34  ;;  %v1575_v12 = vmax.f32 %v1447_v31, %v6136_v16  ;;  %v1752_v21 = vmin.f32 %v1624_v45, %v6156_v61  ;;  %v1626_v44 = vld [vmem:[#allocation3 + $0x60] sm:$0xff]  ;;  %vm7523_vm10 = vmmov %vm7513_vm0 }
 0x33d   :  { %v2213_v54 = vsel %vm2212_vm2, %v6154_v36, %v2211_v48  ;;  %1591 = vst.msk [vmem:[#allocation2 + $0x48] sm:$0xff] %vm7516_vm1, %v1558_v49  ;;  %v1560_v34 = vmax.f32 %v1432_v9, %v6158_v46  ;;  %v1768_v16 = vmin.f32 %v1640_v18, %v6191_v11  ;;  %v1576_v61 = vmax.f32 %v1448_v6, %v6193_v26  ;;  %vm7524_vm6 = vmmov %vm7513_vm0 }
 0x33e   :  { %1798 = vst.msk [vmem:[#allocation3 + $0xc0] sm:$0xff] %vm7517_vm9, %v1766_v27  ;;  %v2216_v15 = vsel %vm2214_vm15, %v2215_v2, %v2213_v54  ;;  %v1753_v36 = vmin.f32 %v1625_v37, %v6212_v58  ;;  %v1561_v17 = vmax.f32 %v1433_v53, %v6214_v56  ;;  %vm2036_vm5 = vcmp.eq.f32.partialorder %v6143_v22, inf  ;;  %vm7525_vm7 = vmmov %vm7513_vm0 }
 0x33f   :  { %2503 = vst.msk [vmem:[#allocation15 + $0xb0] sm:$0xff] %vm7518_vm12, %v2471_v42  ;;  %v2392_v30 = vsub.f32 %v1928_v19, %v2216_v15  ;;  %vm7526_vm11 = vmmov %vm7513_vm0  ;;  %v2037_v58 = vsel %vm2036_vm5, %v6143_v22, %v2035_v39  ;;  %v2039_v40 = vand.u32 2147483648, %v6143_v22  ;;  %v2327_v7 = vand.u32 2147483648, %v6210_v41 }
 0x340   :  { %v6230_v4 = vpop.xlane.xlu0 %1728  ;;  %v6232_v28 = vpop.xlane.xlu1 %1538  ;;  %1607 = vst.msk [vmem:[#allocation2 + $0xc8] sm:$0xff] %vm7519_vm14, %v1574_v10  ;;  %vm7527_vm2 = vmmov %vm7513_vm0  ;;  %vm2038_vm14 = vcmp.eq.f32.partialorder %v6143_v22, 0.0 }
 0x341   :  { %1783 = vst.msk [vmem:[#allocation3 + $0x48] sm:$0xff] %vm7520_vm13, %v1751_v47  ;;  %v1769_v33 = vmin.f32 %v1641_v35, %v6230_v4  ;;  %v1577_v46 = vmax.f32 %v1449_v23, %v6232_v28  ;;  %v2755_v62 = vpop.eup %2754  ;;  %v2424_v56 = vadd.f32 0.3, %v2392_v30  ;;  %vm7528_vm15 = vmmov %vm7513_vm0  ;;  %vm2324_vm13 = vcmp.eq.f32.partialorder %v6210_v41, inf  ;;  %v1627_v28 = vld [vmem:[#allocation3 + $0x68] sm:$0xff] }
 0x342   :  { %1592 = vst.msk [vmem:[#allocation2 + $0x50] sm:$0xff] %vm7521_vm8, %v1559_v25  ;;  %vm7529_vm4 = vmmov %vm7513_vm0  ;;  %v2757_v20 = vpop.eup %2756  ;;  %v2040_v24 = vsel %vm2038_vm14, %v2039_v40, %v2037_v58  ;;  %v1930_v29 = vmul.f32 %v2755_v62, %v6208_v0  ;;  %v1643_v47 = vld [vmem:[#allocation3 + $0xe8] sm:$0xff]  ;;  %v1934_v23 = vand.u32 2147483648, %v6208_v0 }
 0x343   :  { %1799 = vst.msk [vmem:[#allocation3 + $0xc8] sm:$0xff] %vm7522_vm3, %v1767_v32  ;;  %vm7530_vm1 = vmmov %vm7513_vm0  ;;  %v2759_v51 = vpop.eup %2758  ;;  %v2456_v59 = vmax.f32 %v2424_v56, 0.0  ;;  %v2323_v4 = vmul.f32 %v2757_v20, %v6210_v41  ;;  %v2105_v19 = vld [vmem:[#allocation3 + $0x40] sm:$0xff] }
 0x344   :  { %v1684_v57 = vpop.xlane.xlu1 %1683  ;;  %v1494_v14 = vpop.xlane.xlu0 %1493  ;;  %1608 = vst.msk [vmem:[#allocation2 + $0xd0] sm:$0xff] %vm7523_vm10, %v1575_v12  ;;  %vm7531_vm9 = vmmov %vm7513_vm0  ;;  %vm2326_vm10 = vcmp.eq.f32.partialorder %v6210_v41, 0.0  ;;  %v1818_v22 = vld [vmem:[#allocation2 + $0x48] sm:$0xff]  ;;  %v6295_v31 = vmax.f32 %v2105_v19, 1e-12  ;;  %v2042_v49 = vmul.f32 %v2759_v51, %v6218_v13 }
 0x345   :  { %1784 = vst.msk [vmem:[#allocation3 + $0x50] sm:$0xff] %vm7524_vm6, %v1752_v21  ;;  %v1754_v11 = vmin.f32 %v1626_v44, %v1684_v57  ;;  %v1562_v26 = vmax.f32 %v1434_v8, %v1494_v14  ;;  %vm7532_vm12 = vmmov %vm7513_vm0  ;;  %v2121_v50 = vld [vmem:[#allocation3 + $0xc0] sm:$0xff]  ;;  %v2325_v5 = vsel %vm2324_vm13, %v6210_v41, %v2323_v4  ;;  %v6297_v45 = vmax.f32 %v1818_v22, 1e-12  ;;  %v1451_v21 = vld [vmem:[#allocation2 + $0xf0] sm:$0xff] }
 0x346   :  { %1593 = vst.msk [vmem:[#allocation2 + $0x58] sm:$0xff] %vm7513_vm0, %v1560_v34  ;;  %vm7533_vm8 = vmmov %vm7513_vm0  ;;  %v6299_v48 = vmax.f32 %v2121_v50, 1e-12  ;;  %v2328_v43 = vsel %vm2326_vm10, %v2327_v7, %v2325_v5  ;;  %2760 = vrsqrt.f32 %v6295_v31  ;;  %v2046_v44 = vand.u32 2147483648, %v6218_v13 }
 0x347   :  { %1800 = vst.msk [vmem:[#allocation3 + $0xd0] sm:$0xff] %vm7525_vm7, %v1768_v16  ;;  %vm7534_vm3 = vmmov %vm7513_vm0  ;;  %v2408_v18 = vsub.f32 %v2040_v24, %v2328_v43  ;;  %v1834_v6 = vld [vmem:[#allocation2 + $0xc8] sm:$0xff]  ;;  %2762 = vrsqrt.f32 %v6297_v45  ;;  %vm1931_vm7 = vcmp.eq.f32.partialorder %v6208_v0, inf  ;;  %vm1938_vm14 = vcmp.eq.f32.partialorder %v6297_v45, inf }
 0x348   :  { %1609 = vst.msk [vmem:[#allocation2 + $0xd8] sm:$0xff] %vm7526_vm11, %v1576_v61  ;;  %v1732_v52 = vpop.xlane.xlu1 %1731  ;;  %v1542_v55 = vpop.xlane.xlu0 %1541  ;;  %vm7535_vm6 = vmmov %vm7513_vm0  ;;  %v2106_v42 = vld [vmem:[#allocation3 + $0x48] sm:$0xff]  ;;  %vm2043_vm11 = vcmp.eq.f32.partialorder %v6218_v13, inf  ;;  %2764 = vrsqrt.f32 %v6299_v48  ;;  %v1932_v53 = vsel %vm1931_vm7, %v6208_v0, %v1930_v29  ;;  %v6311_v57 = vmax.f32 %v1834_v6, 1e-12  ;;  %v1628_v61 = vld [vmem:[#allocation3 + $0x70] sm:$0xff] }
 0x349   :  { %1785 = vst.msk [vmem:[#allocation3 + $0x58] sm:$0xff] %vm7527_vm2, %v1753_v36  ;;  %v1770_v63 = vmin.f32 %v1642_v38, %v1732_v52  ;;  %v1578_v1 = vmax.f32 %v1450_v3, %v1542_v55  ;;  %v1819_v10 = vld [vmem:[#allocation2 + $0x50] sm:$0xff]  ;;  %vm7536_vm5 = vmmov %vm7513_vm0  ;;  %v2440_v37 = vadd.f32 0.3, %v2408_v18  ;;  %v2044_v35 = vsel %vm2043_vm11, %v6218_v13, %v2042_v49 }
 0x34a   :  { %1594 = vst.msk [vmem:[#allocation2 + $0x60] sm:$0xff] %vm7528_vm15, %v1561_v17  ;;  %v6313_v54 = vmax.f32 %v2106_v42, 1e-12  ;;  %v6315_v32 = vmax.f32 %v1819_v10, 1e-12  ;;  %2766 = vrsqrt.f32 %v6311_v57  ;;  %v2122_v8 = vld [vmem:[#allocation3 + $0xc8] sm:$0xff]  ;;  %vm7537_vm15 = vmmov %vm7513_vm0 }
 0x34b   :  { %1801 = vst.msk [vmem:[#allocation3 + $0xd8] sm:$0xff] %vm7529_vm4, %v1769_v33  ;;  %v2472_v14 = vmax.f32 %v2440_v37, 0.0  ;;  %v1835_v15 = vld [vmem:[#allocation2 + $0xd0] sm:$0xff]  ;;  %vm1933_vm2 = vcmp.eq.f32.partialorder %v6208_v0, 0.0  ;;  %vm2045_vm4 = vcmp.eq.f32.partialorder %v6218_v13, 0.0  ;;  %v2222_v13 = vand.u32 2147483648, %v6295_v31 }
 0x34c   :  { %1610 = vst.msk [vmem:[#allocation2 + $0xe0] sm:$0xff] %vm7530_vm1, %v1577_v46  ;;  %v1687_v39 = vpop.xlane.xlu0 %1686  ;;  %v1497_v2 = vpop.xlane.xlu1 %1496  ;;  %v2107_v34 = vld [vmem:[#allocation3 + $0x50] sm:$0xff]  ;;  %2768 = vrsqrt.f32 %v6313_v54  ;;  %vm7538_vm1 = vmmov %vm7513_vm0  ;;  %v1935_v38 = vsel %vm1933_vm2, %v1934_v23, %v1932_v53  ;;  %v2047_v3 = vsel %vm2045_vm4, %v2046_v44, %v2044_v35  ;;  %v6326_v30 = vmax.f32 %v2122_v8, 1e-12 }
 0x34d   :  { %1786 = vst.msk [vmem:[#allocation3 + $0x60] sm:$0xff] %vm7531_vm9, %v1754_v11  ;;  %v1755_v27 = vmin.f32 %v1627_v28, %v1687_v39  ;;  %v1563_v9 = vmax.f32 %v1435_v60, %v1497_v2  ;;  %2770 = vrsqrt.f32 %v6315_v32  ;;  %v6328_v36 = vmax.f32 %v1835_v15, 1e-12  ;;  %v1820_v58 = vld [vmem:[#allocation2 + $0x58] sm:$0xff] }
 0x34e   :  { %1595 = vst.msk [vmem:[#allocation2 + $0x68] sm:$0xff] %vm7532_vm12, %v1562_v26  ;;  %v6330_v17 = vmax.f32 %v2107_v34, 1e-12  ;;  %vm2219_vm9 = vcmp.eq.f32.partialorder %v6295_v31, inf  ;;  %vm2221_vm12 = vcmp.eq.f32.partialorder %v6295_v31, 0.0  ;;  %v2123_v33 = vld [vmem:[#allocation3 + $0xd0] sm:$0xff]  ;;  %2772 = vrsqrt.f32 %v6326_v30 }
 0x34f   :  { %1802 = vst.msk [vmem:[#allocation3 + $0xe0] sm:$0xff] %vm7533_vm8, %v1770_v63  ;;  %v1941_v26 = vand.u32 2147483648, %v6297_v45  ;;  %vm2331_vm13 = vcmp.eq.f32.partialorder %v6299_v48, inf  ;;  %vm7539_vm8 = vmmov %vm7513_vm0  ;;  %vm2333_vm10 = vcmp.eq.f32.partialorder %v6299_v48, 0.0  ;;  %v2334_v62 = vand.u32 2147483648, %v6299_v48 }
 0x350   :  { %1611 = vst.msk [vmem:[#allocation2 + $0xe8] sm:$0xff] %vm7534_vm3, %v1578_v1  ;;  %v1735_v41 = vpop.xlane.xlu0 %1734  ;;  %v1545_v25 = vpop.xlane.xlu1 %1544  ;;  %vm1940_vm3 = vcmp.eq.f32.partialorder %v6297_v45, 0.0  ;;  %2774 = vrsqrt.f32 %v6328_v36  ;;  %v6349_v1 = vmax.f32 %v2123_v33, 1e-12  ;;  %v2053_v51 = vand.u32 2147483648, %v6311_v57  ;;  %v2108_v10 = vld [vmem:[#allocation3 + $0x58] sm:$0xff] }
 0x351   :  { %2488 = vst.msk [vmem:[#allocation15 + $0x38] sm:$0xff] %vm7535_vm6, %v2456_v59  ;;  %v1771_v12 = vmin.f32 %v1643_v47, %v1735_v41  ;;  %v1579_v0 = vmax.f32 %v1451_v21, %v1545_v25  ;;  %v2761_v11 = vpop.eup %2760  ;;  %vm7540_vm6 = vmmov %vm7513_vm0  ;;  %2776 = vrsqrt.f32 %v6330_v17  ;;  %v1836_v59 = vld [vmem:[#allocation2 + $0xd8] sm:$0xff]  ;;  %vm2228_vm7 = vcmp.eq.f32.partialorder %v6313_v54, 0.0 }
 0x352   :  { %1787 = vst.msk [vmem:[#allocation3 + $0x68] sm:$0xff] %vm7536_vm5, %v1755_v27  ;;  %v2763_v52 = vpop.eup %2762  ;;  %v2218_v55 = vmul.f32 %v2761_v11, %v6295_v31  ;;  %vm2050_vm5 = vcmp.eq.f32.partialorder %v6311_v57, inf  ;;  %v2229_v28 = vand.u32 2147483648, %v6313_v54  ;;  %v6361_v60 = vmax.f32 %v1820_v58, 1e-12 }
 0x353   :  { %1596 = vst.msk [vmem:[#allocation2 + $0x70] sm:$0xff] %vm7513_vm0, %v1563_v9  ;;  %v2765_v56 = vpop.eup %2764  ;;  %v1937_v63 = vmul.f32 %v2763_v52, %v6297_v45  ;;  %vm2226_vm0 = vcmp.eq.f32.partialorder %v6313_v54, inf  ;;  %vm2052_vm11 = vcmp.eq.f32.partialorder %v6311_v57, 0.0  ;;  %vm1945_vm2 = vcmp.eq.f32.partialorder %v6315_v32, inf  ;;  %v1837_v58 = vld [vmem:[#allocation2 + $0xe0] sm:$0xff] }
 0x354   :  { %2504 = vst.msk [vmem:[#allocation15 + $0xb8] sm:$0xff] %vm7537_vm15, %v2472_v14  ;;  %v1690_v16 = vpop.xlane.xlu1 %1689  ;;  %v2220_v20 = vsel %vm2219_vm9, %v6295_v31, %v2218_v55  ;;  %v2330_v40 = vmul.f32 %v2765_v56, %v6299_v48  ;;  %v2767_v24 = vpop.eup %2766  ;;  %v1948_v19 = vand.u32 2147483648, %v6315_v32  ;;  %2778 = vrsqrt.f32 %v6349_v1  ;;  %v2109_v56 = vld [vmem:[#allocation3 + $0x60] sm:$0xff] }
 0x355   :  { %1803 = vst.msk [vmem:[#allocation3 + $0xe8] sm:$0xff] %vm7538_vm1, %v1771_v12  ;;  %v1756_v46 = vmin.f32 %v1628_v61, %v1690_v16  ;;  %v2223_v4 = vsel %vm2221_vm12, %v2222_v13, %v2220_v20  ;;  %v1939_v50 = vsel %vm1938_vm14, %v6297_v45, %v1937_v63  ;;  %v6375_v2 = vmax.f32 %v1836_v59, 1e-12  ;;  %vm7541_vm14 = vmmov %vm7540_vm6  ;;  %v1821_v45 = vld [vmem:[#allocation2 + $0x60] sm:$0xff] }
 0x356   :  { %1612 = vst.msk [vmem:[#allocation2 + $0xf0] sm:$0xff] %vm7539_vm8, %v1579_v0  ;;  %v2393_v29 = vsub.f32 %v1935_v38, %v2223_v4  ;;  %v2332_v7 = vsel %vm2331_vm13, %v6299_v48, %v2330_v40  ;;  %v2769_v22 = vpop.eup %2768  ;;  %v2049_v49 = vmul.f32 %v2767_v24, %v6311_v57  ;;  %vm1947_vm15 = vcmp.eq.f32.partialorder %v6315_v32, 0.0  ;;  %vm7542_vm13 = vmmov %vm7540_vm6  ;;  %v1822_v4 = vld [vmem:[#allocation2 + $0x68] sm:$0xff] }
 0x357   :  { %1788 = vst.msk [vmem:[#allocation3 + $0x70] sm:$0xff] %vm7540_vm6, %v1756_v46  ;;  %v2335_v39 = vsel %vm2333_vm10, %v2334_v62, %v2332_v7  ;;  %v2771_v5 = vpop.eup %2770  ;;  %v2225_v27 = vmul.f32 %v2769_v22, %v6313_v54  ;;  %vm2338_vm4 = vcmp.eq.f32.partialorder %v6326_v30, inf  ;;  %vm2340_vm1 = vcmp.eq.f32.partialorder %v6326_v30, 0.0  ;;  %vm7543_vm10 = vmmov %vm7540_vm6 }
 0x358   :  { %v2425_v31 = vadd.f32 0.3, %v2393_v29  ;;  %v2409_v43 = vsub.f32 %v2047_v3, %v2335_v39  ;;  %v2341_v48 = vand.u32 2147483648, %v6326_v30  ;;  %2780 = vrsqrt.f32 %v6361_v60  ;;  %v2773_v41 = vpop.eup %2772 }
 0x359   :  { %v2227_v6 = vsel %vm2226_vm0, %v6313_v54, %v2225_v27  ;;  %v1944_v42 = vmul.f32 %v2771_v5, %v6315_v32  ;;  %v1942_v47 = vsel %vm1940_vm3, %v1941_v26, %v1939_v50  ;;  %vm2057_vm9 = vcmp.eq.f32.partialorder %v6328_v36, inf  ;;  %vm7544_vm0 = vmmov %vm7543_vm10 }
 0x35a   :  { %v2457_v9 = vmax.f32 %v2425_v31, 0.0  ;;  %v2441_v18 = vadd.f32 0.3, %v2409_v43  ;;  %v2230_v25 = vsel %vm2228_vm7, %v2229_v28, %v2227_v6  ;;  %vm2233_vm12 = vcmp.eq.f32.partialorder %v6330_v17, inf  ;;  %v2775_v37 = vpop.eup %2774  ;;  %vm7545_vm7 = vmmov %vm7544_vm0  ;;  %v2125_v43 = vld [vmem:[#allocation3 + $0xe0] sm:$0xff]  ;;  %v2110_v6 = vld [vmem:[#allocation3 + $0x68] sm:$0xff] }
 0x35b   :  { %v2051_v35 = vsel %vm2050_vm5, %v6311_v57, %v2049_v49  ;;  %v2394_v14 = vsub.f32 %v1942_v47, %v2230_v25  ;;  %v2337_v12 = vmul.f32 %v2773_v41, %v6326_v30  ;;  %v2777_v21 = vpop.eup %2776  ;;  %v2056_v54 = vmul.f32 %v2775_v37, %v6328_v36  ;;  %v1838_v49 = vld [vmem:[#allocation2 + $0xe8] sm:$0xff]  ;;  %v1823_v37 = vld [vmem:[#allocation2 + $0x70] sm:$0xff] }
 0x35c   :  { %2489 = vst.msk [vmem:[#allocation15 + $0x40] sm:$0xff] %vm7541_vm14, %v2457_v9  ;;  %v2473_v53 = vmax.f32 %v2441_v18, 0.0  ;;  %v2236_v23 = vand.u32 2147483648, %v6330_v17  ;;  %2782 = vrsqrt.f32 %v6375_v2  ;;  %v6402_v44 = vmax.f32 %v2108_v10, 1e-12 }
 0x35d   :  { %v2426_v8 = vadd.f32 0.3, %v2394_v14  ;;  %v1946_v15 = vsel %vm1945_vm2, %v6315_v32, %v1944_v42  ;;  %v2339_v34 = vsel %vm2338_vm4, %v6326_v30, %v2337_v12  ;;  %v2232_v16 = vmul.f32 %v2777_v21, %v6330_v17  ;;  %v6460_v42 = vpop.xlane.xlu0 %1499 }
 0x35e   :  { %2505 = vst.msk [vmem:[#allocation15 + $0xc0] sm:$0xff] %vm7542_vm13, %v2473_v53  ;;  %v2054_v61 = vsel %vm2052_vm11, %v2053_v51, %v2051_v35  ;;  %v2342_v38 = vsel %vm2340_vm1, %v2341_v48, %v2339_v34  ;;  %2784 = vrsqrt.f32 %v6402_v44  ;;  %v6417_v3 = vmax.f32 %v1821_v45, 1e-12  ;;  %v2779_v46 = vpop.eup %2778 }
 0x35f   :  { %v2458_v0 = vmax.f32 %v2426_v8, 0.0  ;;  %v2410_v13 = vsub.f32 %v2054_v61, %v2342_v38  ;;  %v2234_v33 = vsel %vm2233_vm12, %v6330_v17, %v2232_v16  ;;  %vm2235_vm8 = vcmp.eq.f32.partialorder %v6330_v17, 0.0  ;;  %v2124_v17 = vld [vmem:[#allocation3 + $0xd8] sm:$0xff] }
 0x360   :  { %v1949_v57 = vsel %vm1947_vm15, %v1948_v19, %v1946_v15  ;;  %v2058_v30 = vsel %vm2057_vm9, %v6328_v36, %v2056_v54  ;;  %vm2059_vm3 = vcmp.eq.f32.partialorder %v6328_v36, 0.0  ;;  %v2237_v11 = vsel %vm2235_vm8, %v2236_v23, %v2234_v33  ;;  %vm7546_vm9 = vmmov %vm7544_vm0  ;;  %v2126_v15 = vld [vmem:[#allocation3 + $0xe8] sm:$0xff] }
 0x361   :  { %2490 = vst.msk [vmem:[#allocation15 + $0x48] sm:$0xff] %vm7543_vm10, %v2458_v0  ;;  %v2442_v26 = vadd.f32 0.3, %v2410_v13  ;;  %v2060_v52 = vand.u32 2147483648, %v6328_v36  ;;  %v2395_v55 = vsub.f32 %v1949_v57, %v2237_v11  ;;  %v2344_v62 = vmul.f32 %v2779_v46, %v6349_v1  ;;  %v6491_v34 = vpop.xlane.xlu0 %1547 }
 0x362   :  { %v2781_v32 = vpop.eup %2780  ;;  %vm2345_vm6 = vcmp.eq.f32.partialorder %v6349_v1, inf  ;;  %vm2347_vm5 = vcmp.eq.f32.partialorder %v6349_v1, 0.0  ;;  %v2348_v63 = vand.u32 2147483648, %v6349_v1  ;;  %2786 = vrsqrt.f32 %v6417_v3 }
 0x363   :  { %v2474_v20 = vmax.f32 %v2442_v26, 0.0  ;;  %v2061_v40 = vsel %vm2059_vm3, %v2060_v52, %v2058_v30  ;;  %v2427_v51 = vadd.f32 0.3, %v2395_v55  ;;  %v2346_v59 = vsel %vm2345_vm6, %v6349_v1, %v2344_v62  ;;  %v2111_v30 = vld [vmem:[#allocation3 + $0x70] sm:$0xff] }
 0x364   :  { %v2349_v28 = vsel %vm2347_vm5, %v2348_v63, %v2346_v59  ;;  %v6439_v24 = vmax.f32 %v2124_v17, 1e-12  ;;  %v6441_v29 = vmax.f32 %v1837_v58, 1e-12  ;;  %v6443_v7 = vmax.f32 %v2109_v56, 1e-12 }
 0x365   :  { %2506 = vst.msk [vmem:[#allocation15 + $0xc8] sm:$0xff] %vm7544_vm0, %v2474_v20  ;;  %v2459_v19 = vmax.f32 %v2427_v51, 0.0  ;;  %v1951_v22 = vmul.f32 %v2781_v32, %v6361_v60  ;;  %v2411_v50 = vsub.f32 %v2061_v40, %v2349_v28  ;;  %v6448_v36 = vmax.f32 %v1822_v4, 1e-12  ;;  %v1693_v40 = vpop.xlane.xlu0 %1692 }
 0x366   :  { %v2783_v39 = vpop.eup %2782  ;;  %2788 = vrsqrt.f32 %v6439_v24  ;;  %vm1952_vm11 = vcmp.eq.f32.partialorder %v6361_v60, inf  ;;  %vm1954_vm2 = vcmp.eq.f32.partialorder %v6361_v60, 0.0  ;;  %v1955_v31 = vand.u32 2147483648, %v6361_v60 }
 0x367   :  { %2491 = vst.msk [vmem:[#allocation15 + $0x50] sm:$0xff] %vm7545_vm7, %v2459_v19  ;;  %v2443_v1 = vadd.f32 0.3, %v2411_v50  ;;  %2790 = vrsqrt.f32 %v6441_v29  ;;  %vm2064_vm15 = vcmp.eq.f32.partialorder %v6375_v2, inf  ;;  %v1953_v27 = vsel %vm1952_vm11, %v6361_v60, %v1951_v22 }
 0x368   :  { %v2785_v5 = vpop.eup %2784  ;;  %2792 = vrsqrt.f32 %v6443_v7  ;;  %v2063_v9 = vmul.f32 %v2783_v39, %v6375_v2  ;;  %vm2066_vm4 = vcmp.eq.f32.partialorder %v6375_v2, 0.0  ;;  %vm2240_vm1 = vcmp.eq.f32.partialorder %v6402_v44, inf }
 0x369   :  { %v2475_v48 = vmax.f32 %v2443_v1, 0.0  ;;  %v2239_v18 = vmul.f32 %v2785_v5, %v6402_v44  ;;  %v2243_v10 = vand.u32 2147483648, %v6402_v44  ;;  %2794 = vrsqrt.f32 %v6448_v36 }
 0x36a   :  { %vm2242_vm12 = vcmp.eq.f32.partialorder %v6402_v44, 0.0  ;;  %v6469_v47 = vmax.f32 %v2125_v43, 1e-12  ;;  %v6471_v25 = vmax.f32 %v1838_v49, 1e-12  ;;  %v1956_v35 = vsel %vm1954_vm2, %v1955_v31, %v1953_v27  ;;  %v1839_v31 = vld [vmem:[#allocation2 + $0xf0] sm:$0xff] }
 0x36b   :  { %2507 = vst.msk [vmem:[#allocation15 + $0xd0] sm:$0xff] %vm7546_vm9, %v2475_v48  ;;  %v2241_v41 = vsel %vm2240_vm1, %v6402_v44, %v2239_v18  ;;  %v2067_v14 = vand.u32 2147483648, %v6375_v2  ;;  %v6476_v45 = vmax.f32 %v2110_v6, 1e-12  ;;  %v2065_v21 = vsel %vm2064_vm15, %v6375_v2, %v2063_v9  ;;  %v1436_v43 = vld [vmem:[#allocation2 + $0x78] sm:$0xff]  ;;  %v1738_v18 = vpop.xlane.xlu1 %1737  ;;  %v1644_v6 = vld [vmem:[#allocation3 + $0xf0] sm:$0xff] }
 0x36c   :  { %v2787_v53 = vpop.eup %2786  ;;  %v2244_v12 = vsel %vm2242_vm12, %v2243_v10, %v2241_v41  ;;  %vm1959_vm14 = vcmp.eq.f32.partialorder %v6417_v3, inf  ;;  %2796 = vrsqrt.f32 %v6469_v47  ;;  %vm1961_vm13 = vcmp.eq.f32.partialorder %v6417_v3, 0.0  ;;  %v1452_v10 = vld [vmem:[#allocation2 + $0xf8] sm:$0xff] }
 0x36d   :  { %v2396_v54 = vsub.f32 %v1956_v35, %v2244_v12  ;;  %v1962_v23 = vand.u32 2147483648, %v6417_v3  ;;  %2798 = vrsqrt.f32 %v6471_v25  ;;  %v6486_v60 = vmax.f32 %v1823_v37, 1e-12  ;;  %v1629_v41 = vld [vmem:[#allocation3 + $0x78] sm:$0xff] }
 0x36e   :  { %v1958_v8 = vmul.f32 %v2787_v53, %v6417_v3  ;;  %vm2352_vm8 = vcmp.eq.f32.partialorder %v6439_v24, inf  ;;  %vm2354_vm3 = vcmp.eq.f32.partialorder %v6439_v24, 0.0  ;;  %v2068_v61 = vsel %vm2066_vm4, %v2067_v14, %v2065_v21  ;;  %v1741_v14 = vpop.xlane.xlu0 %1740  ;;  %v1645_v12 = vld [vmem:[#allocation3 + $0xf8] sm:$0xff] }
 0x36f   :  { %v2428_v44 = vadd.f32 0.3, %v2396_v54  ;;  %v2355_v38 = vand.u32 2147483648, %v6439_v24  ;;  %vm2071_vm10 = vcmp.eq.f32.partialorder %v6441_v29, inf  ;;  %2800 = vrsqrt.f32 %v6476_v45 }
 0x370   :  { %v2789_v16 = vpop.eup %2788  ;;  %vm2073_vm6 = vcmp.eq.f32.partialorder %v6441_v29, 0.0  ;;  %v2074_v46 = vand.u32 2147483648, %v6441_v29  ;;  %vm2247_vm5 = vcmp.eq.f32.partialorder %v6443_v7, inf  ;;  %vm2249_vm0 = vcmp.eq.f32.partialorder %v6443_v7, 0.0 }
 0x371   :  { %v2791_v0 = vpop.eup %2790  ;;  %v2460_v13 = vmax.f32 %v2428_v44, 0.0  ;;  %v2351_v33 = vmul.f32 %v2789_v16, %v6439_v24  ;;  %2802 = vrsqrt.f32 %v6486_v60  ;;  %v6504_v2 = vmax.f32 %v2126_v15, 1e-12 }
 0x372   :  { %v2793_v57 = vpop.eup %2792  ;;  %v1960_v11 = vsel %vm1959_vm14, %v6417_v3, %v1958_v8  ;;  %v2070_v52 = vmul.f32 %v2791_v0, %v6441_v29  ;;  %v2250_v58 = vand.u32 2147483648, %v6443_v7  ;;  %vm1966_vm11 = vcmp.eq.f32.partialorder %v6448_v36, inf  ;;  %vm7547_vm14 = vmmov %vm7545_vm7 }
 0x373   :  { %2492 = vst.msk [vmem:[#allocation15 + $0x58] sm:$0xff] %vm7545_vm7, %v2460_v13  ;;  %v2353_v26 = vsel %vm2352_vm8, %v6439_v24, %v2351_v33  ;;  %v2246_v55 = vmul.f32 %v2793_v57, %v6443_v7  ;;  %v2795_v62 = vpop.eup %2794  ;;  %2804 = vrsqrt.f32 %v6504_v2  ;;  %vm1968_vm2 = vcmp.eq.f32.partialorder %v6448_v36, 0.0  ;;  %vm7549_vm8 = vmmov %vm7545_vm7 }
 0x374   :  { %v2356_v17 = vsel %vm2354_vm3, %v2355_v38, %v2353_v26  ;;  %v1969_v63 = vand.u32 2147483648, %v6448_v36  ;;  %v6525_v20 = vmax.f32 %v2111_v30, 1e-12  ;;  %v1963_v51 = vsel %vm1961_vm13, %v1962_v23, %v1960_v11  ;;  %vm7548_vm13 = vmmov %vm7545_vm7 }
 0x375   :  { %v2412_v56 = vsub.f32 %v2068_v61, %v2356_v17  ;;  %v2248_v32 = vsel %vm2247_vm5, %v6443_v7, %v2246_v55  ;;  %v1965_v4 = vmul.f32 %v2795_v62, %v6448_v36  ;;  %vm2359_vm15 = vcmp.eq.f32.partialorder %v6469_v47, inf  ;;  %vm7550_vm3 = vmmov %vm7545_vm7 }
 0x376   :  { %v2251_v59 = vsel %vm2249_vm0, %v2250_v58, %v2248_v32  ;;  %v2797_v28 = vpop.eup %2796  ;;  %v2072_v19 = vsel %vm2071_vm10, %v6441_v29, %v2070_v52  ;;  %vm2361_vm4 = vcmp.eq.f32.partialorder %v6469_v47, 0.0  ;;  %v2362_v39 = vand.u32 2147483648, %v6469_v47  ;;  %vm7551_vm10 = vmmov %vm7550_vm3 }
 0x377   :  { %v2444_v24 = vadd.f32 0.3, %v2412_v56  ;;  %v2397_v22 = vsub.f32 %v1963_v51, %v2251_v59  ;;  %v2799_v50 = vpop.eup %2798  ;;  %v2358_v3 = vmul.f32 %v2797_v28, %v6469_v47  ;;  %vm2078_vm1 = vcmp.eq.f32.partialorder %v6471_v25, inf  ;;  %vm7553_vm0 = vmmov %vm7550_vm3 }
 0x378   :  { %v2081_v7 = vand.u32 2147483648, %v6471_v25  ;;  %vm2254_vm9 = vcmp.eq.f32.partialorder %v6476_v45, inf  ;;  %2806 = vrsqrt.f32 %v6525_v20  ;;  %v2075_v27 = vsel %vm2073_vm6, %v2074_v46, %v2072_v19  ;;  %vm7552_vm6 = vmmov %vm7550_vm3 }
 0x379   :  { %v2476_v1 = vmax.f32 %v2444_v24, 0.0  ;;  %v2429_v5 = vadd.f32 0.3, %v2397_v22  ;;  %v2801_v49 = vpop.eup %2800  ;;  %v1967_v48 = vsel %vm1966_vm11, %v6448_v36, %v1965_v4  ;;  %v2360_v9 = vsel %vm2359_vm15, %v6469_v47, %v2358_v3 }
 0x37a   :  { %vm2256_vm12 = vcmp.eq.f32.partialorder %v6476_v45, 0.0  ;;  %v2363_v29 = vsel %vm2361_vm4, %v2362_v39, %v2360_v9  ;;  %v2077_v53 = vmul.f32 %v2799_v50, %v6471_v25  ;;  %v2253_v35 = vmul.f32 %v2801_v49, %v6476_v45  ;;  %vm7555_vm4 = vmmov %vm7553_vm0 }
 0x37b   :  { %2508 = vst.msk [vmem:[#allocation15 + $0xd8] sm:$0xff] %vm7547_vm14, %v2476_v1  ;;  %v2461_v37 = vmax.f32 %v2429_v5, 0.0  ;;  %v2803_v21 = vpop.eup %2802  ;;  %v2413_v54 = vsub.f32 %v2075_v27, %v2363_v29  ;;  %v2257_v23 = vand.u32 2147483648, %v6476_v45  ;;  %v6558_v44 = vmax.f32 %v1839_v31, 1e-12  ;;  %vm7556_vm14 = vmmov %vm7553_vm0 }
 0x37c   :  { %v1564_v8 = vmax.f32 %v1436_v43, %v6460_v42  ;;  %v2255_v47 = vsel %vm2254_vm9, %v6476_v45, %v2253_v35  ;;  %v1772_v15 = vmin.f32 %v1644_v6, %v1738_v18  ;;  %v1580_v16 = vmax.f32 %v1452_v10, %v6491_v34 }
 0x37d   :  { %2493 = vst.msk [vmem:[#allocation15 + $0x60] sm:$0xff] %vm7548_vm13, %v2461_v37  ;;  %v1757_v61 = vmin.f32 %v1629_v41, %v1693_v40  ;;  %v2805_v38 = vpop.eup %2804  ;;  %v1970_v0 = vsel %vm1968_vm2, %v1969_v63, %v1967_v48  ;;  %v2445_v13 = vadd.f32 0.3, %v2413_v54  ;;  %v2258_v33 = vsel %vm2256_vm12, %v2257_v23, %v2255_v47  ;;  %vm7554_vm2 = vmmov %vm7553_vm0 }
 0x37e   :  { %1597 = vst.msk [vmem:[#allocation2 + $0x78] sm:$0xff] %vm7549_vm8, %v1564_v8  ;;  %v1773_v42 = vmin.f32 %v1645_v12, %v1741_v14  ;;  %v2079_v46 = vsel %vm2078_vm1, %v6471_v25, %v2077_v53  ;;  %v2398_v57 = vsub.f32 %v1970_v0, %v2258_v33  ;;  %v1972_v30 = vmul.f32 %v2803_v21, %v6486_v60  ;;  %vm7557_vm13 = vmmov %vm7553_vm0 }
 0x37f   :  { %v2365_v34 = vmul.f32 %v2805_v38, %v6504_v2  ;;  %1804 = vst.msk [vmem:[#allocation3 + $0xf0] sm:$0xff] %vm7550_vm3, %v1772_v15  ;;  %v2477_v36 = vmax.f32 %v2445_v13, 0.0  ;;  %vm2366_vm5 = vcmp.eq.f32.partialorder %v6504_v2, inf  ;;  %v2369_v45 = vand.u32 2147483648, %v6504_v2 }
 0x380   :  { %1613 = vst.msk [vmem:[#allocation2 + $0xf8] sm:$0xff] %vm7551_vm10, %v1580_v16  ;;  %2808 = vrsqrt.f32 %v6558_v44  ;;  %vm2080_vm7 = vcmp.eq.f32.partialorder %v6471_v25, 0.0  ;;  %v2430_v11 = vadd.f32 0.3, %v2398_v57  ;;  %vm2368_vm11 = vcmp.eq.f32.partialorder %v6504_v2, 0.0 }
 0x381   :  { %1789 = vst.msk [vmem:[#allocation3 + $0x78] sm:$0xff] %vm7552_vm6, %v1757_v61  ;;  %v2367_v26 = vsel %vm2366_vm5, %v6504_v2, %v2365_v34  ;;  %v2082_v52 = vsel %vm2080_vm7, %v2081_v7, %v2079_v46  ;;  %vm1973_vm15 = vcmp.eq.f32.partialorder %v6486_v60, inf  ;;  %v1976_v32 = vand.u32 2147483648, %v6486_v60 }
 0x382   :  { %1805 = vst.msk [vmem:[#allocation3 + $0xf8] sm:$0xff] %vm7553_vm0, %v1773_v42  ;;  %v2370_v55 = vsel %vm2368_vm11, %v2369_v45, %v2367_v26  ;;  %v2807_v62 = vpop.eup %2806  ;;  %v2462_v17 = vmax.f32 %v2430_v11, 0.0  ;;  %v1974_v58 = vsel %vm1973_vm15, %v6486_v60, %v1972_v30  ;;  %vm1975_vm1 = vcmp.eq.f32.partialorder %v6486_v60, 0.0 }
 0x383   :  { %2509 = vst.msk [vmem:[#allocation15 + $0xe0] sm:$0xff] %vm7554_vm2, %v2477_v36  ;;  %v2414_v56 = vsub.f32 %v2082_v52, %v2370_v55  ;;  %v2260_v25 = vmul.f32 %v2807_v62, %v6525_v20  ;;  %vm2261_vm9 = vcmp.eq.f32.partialorder %v6525_v20, inf  ;;  %v2264_v63 = vand.u32 2147483648, %v6525_v20 }
 0x384   :  { %2494 = vst.msk [vmem:[#allocation15 + $0x68] sm:$0xff] %vm7555_vm4, %v2462_v17  ;;  %v1977_v51 = vsel %vm1975_vm1, %v1976_v32, %v1974_v58  ;;  %vm2263_vm12 = vcmp.eq.f32.partialorder %v6525_v20, 0.0  ;;  %vm2085_vm8 = vcmp.eq.f32.partialorder %v6558_v44, inf  ;;  %v2088_v9 = vand.u32 2147483648, %v6558_v44 }
 0x385   :  { %v2446_v2 = vadd.f32 0.3, %v2414_v56  ;;  %v1824_v40 = vld [vmem:[#allocation2 + $0x78] sm:$0xff]  ;;  %v2262_v59 = vsel %vm2261_vm9, %v6525_v20, %v2260_v25  ;;  %vm2087_vm3 = vcmp.eq.f32.partialorder %v6558_v44, 0.0  ;;  %vm7558_vm9 = vmmov %vm7557_vm13 }
 0x386   :  { %v1856_v4 = vmax.f32 %v1824_v40, 1e-12  ;;  %v2127_v28 = vld [vmem:[#allocation3 + $0xf0] sm:$0xff]  ;;  %v2265_v22 = vsel %vm2263_vm12, %v2264_v63, %v2262_v59  ;;  %vm7559_vm12 = vmmov %vm7558_vm9 }
 0x387   :  { %v1840_v24 = vld [vmem:[#allocation2 + $0xf8] sm:$0xff]  ;;  %v2478_v19 = vmax.f32 %v2446_v2, 0.0  ;;  %v2159_v50 = vmax.f32 %v2127_v28, 1e-12  ;;  %v2399_v39 = vsub.f32 %v1977_v51, %v2265_v22 }
 0x388   :  { %v1872_v3 = vmax.f32 %v1840_v24, 1e-12  ;;  %2810 = vrsqrt.f32 %v1856_v4  ;;  %v2112_v60 = vld [vmem:[#allocation3 + $0x78] sm:$0xff]  ;;  %vm1980_vm10 = vcmp.eq.f32.partialorder %v1856_v4, inf  ;;  %vm1982_vm5 = vcmp.eq.f32.partialorder %v1856_v4, 0.0 }
 0x389   :  { %v2128_v7 = vld [vmem:[#allocation3 + $0xf8] sm:$0xff]  ;;  %2510 = vst.msk [vmem:[#allocation15 + $0xe8] sm:$0xff] %vm7556_vm14, %v2478_v19  ;;  %2812 = vrsqrt.f32 %v2159_v50  ;;  %v2431_v5 = vadd.f32 0.3, %v2399_v39  ;;  %v2144_v31 = vmax.f32 %v2112_v60, 1e-12  ;;  %vm7560_vm14 = vmmov %vm7558_vm9 }
 0x38a   :  { %v2809_v1 = vpop.eup %2808  ;;  %2814 = vrsqrt.f32 %v1872_v3  ;;  %v2160_v43 = vmax.f32 %v2128_v7, 1e-12  ;;  %vm2373_vm6 = vcmp.eq.f32.partialorder %v2159_v50, inf  ;;  %v2376_v29 = vand.u32 2147483648, %v2159_v50 }
 0x38b   :  { %v2463_v20 = vmax.f32 %v2431_v5, 0.0  ;;  %v2084_v49 = vmul.f32 %v2809_v1, %v6558_v44  ;;  %2816 = vrsqrt.f32 %v2144_v31  ;;  %v1983_v35 = vand.u32 2147483648, %v1856_v4 }
 0x38c   :  { %2818 = vrsqrt.f32 %v2160_v43  ;;  %vm2375_vm0 = vcmp.eq.f32.partialorder %v2159_v50, 0.0  ;;  %vm2092_vm7 = vcmp.eq.f32.partialorder %v1872_v3, inf  ;;  %vm2094_vm11 = vcmp.eq.f32.partialorder %v1872_v3, 0.0 }
 0x38d   :  { %2495 = vst.msk [vmem:[#allocation15 + $0x70] sm:$0xff] %vm7557_vm13, %v2463_v20  ;;  %v2086_v27 = vsel %vm2085_vm8, %v6558_v44, %v2084_v49  ;;  %v2095_v54 = vand.u32 2147483648, %v1872_v3  ;;  %vm2268_vm2 = vcmp.eq.f32.partialorder %v2144_v31, inf  ;;  %vm2270_vm15 = vcmp.eq.f32.partialorder %v2144_v31, 0.0 }
 0x38e   :  { %v2089_v10 = vsel %vm2087_vm3, %v2088_v9, %v2086_v27  ;;  %v2271_v16 = vand.u32 2147483648, %v2144_v31  ;;  %vm2380_vm4 = vcmp.eq.f32.partialorder %v2160_v43, inf  ;;  %v2383_v13 = vand.u32 2147483648, %v2160_v43 }
 0x38f   :  { %vm2382_vm1 = vcmp.eq.f32.partialorder %v2160_v43, 0.0 }
 0x392   :  { %v2811_v48 = vpop.eup %2810 }
 0x393   :  { %v2813_v18 = vpop.eup %2812  ;;  %v1979_v41 = vmul.f32 %v2811_v48, %v1856_v4 }
 0x394   :  { %v2815_v6 = vpop.eup %2814  ;;  %v2372_v37 = vmul.f32 %v2813_v18, %v2159_v50 }
 0x395   :  { %v2091_v53 = vmul.f32 %v2815_v6, %v1872_v3  ;;  %v2817_v12 = vpop.eup %2816  ;;  %v1981_v8 = vsel %vm1980_vm10, %v1856_v4, %v1979_v41 }
 0x396   :  { %v2374_v14 = vsel %vm2373_vm6, %v2159_v50, %v2372_v37  ;;  %v2819_v23 = vpop.eup %2818  ;;  %v2267_v47 = vmul.f32 %v2817_v12, %v2144_v31  ;;  %v1984_v33 = vsel %vm1982_vm5, %v1983_v35, %v1981_v8 }
 0x397   :  { %v2377_v21 = vsel %vm2375_vm0, %v2376_v29, %v2374_v14  ;;  %v2093_v15 = vsel %vm2092_vm7, %v1872_v3, %v2091_v53  ;;  %v2379_v61 = vmul.f32 %v2819_v23, %v2160_v43 }
 0x398   :  { %v2415_v44 = vsub.f32 %v2089_v10, %v2377_v21  ;;  %v2269_v0 = vsel %vm2268_vm2, %v2144_v31, %v2267_v47  ;;  %v2096_v30 = vsel %vm2094_vm11, %v2095_v54, %v2093_v15 }
 0x399   :  { %v2272_v42 = vsel %vm2270_vm15, %v2271_v16, %v2269_v0  ;;  %v2381_v46 = vsel %vm2380_vm4, %v2160_v43, %v2379_v61 }
 0x39a   :  { %v2447_v38 = vadd.f32 0.3, %v2415_v44  ;;  %v2400_v34 = vsub.f32 %v1984_v33, %v2272_v42  ;;  %v2384_v36 = vsel %vm2382_vm1, %v2383_v13, %v2381_v46 }
 0x39b   :  { %v2416_v45 = vsub.f32 %v2096_v30, %v2384_v36 }
 0x39c   :  { %v2479_v57 = vmax.f32 %v2447_v38, 0.0  ;;  %v2432_v11 = vadd.f32 0.3, %v2400_v34 }
 0x39d   :  { %v2448_v26 = vadd.f32 0.3, %v2416_v45 }
 0x39e   :  { %2511 = vst.msk [vmem:[#allocation15 + $0xf0] sm:$0xff] %vm7558_vm9, %v2479_v57  ;;  %v2464_v52 = vmax.f32 %v2432_v11, 0.0 }
 0x39f   :  { %v2480_v55 = vmax.f32 %v2448_v26, 0.0 }
 0x3a0   :  { %2496 = vst.msk [vmem:[#allocation15 + $0x78] sm:$0xff] %vm7559_vm12, %v2464_v52 }
 0x3a1   :  { %2512 = vst.msk [vmem:[#allocation15 + $0xf8] sm:$0xff] %vm7560_vm14, %v2480_v55 }
 0x3a2   :  { %2963 = shalt.err (!%p2960_p10)
}
 0x3a3   :  { %s2964_s22 = scalar_lea.hbm %s6630_s6, 4096 }
 0x3a4   :  { %p2965_p11 = scmp.ne.s32.totalorder %s6630_s6, %s2964_s22  ;;  %p2968_p12 = scmp.lt.u32.totalorder %s2964_s22, %s6630_s6 }
 0x3a6   :  { %p2970_p13 = pnand %p2968_p12, %p2965_p11 }
 0x3a8   :  { %2973 = shalt.err (!%p2970_p13)
}
 0x3a9   :  { %2524 = dma.vmem_to_hbm [thread:$0]  %s2519_s20, 4096, %s6630_s6, [#allocation6], %s2986_s9, %s2986_s9, %s2987_s10  }
 0x3aa   :  { %2982 = dma.done.wait [#allocation6], 4096  }
 0x3ab   :  { %2983 = vsyncadd [#allocation6], 4294963200 }
 0x3ac   :  { %2528 = vsyncpa [#allocation5], 1 }
 0x3ad   :  { %2529 = vsyncpa [#allocation8], 1 }
 0x3ae   :  { %2530 = vsyncpa [#allocation11], 1 }
 0x3af   :  { %2531 = vsyncpa [#allocation14], 1 }
 0x3b0   :  { %2532 = vsyncpa [#allocation6], 1 }

</bundles_post_ra>
